<compile_context>
chip_gen: v7x
topology: tpu7x:2x2x1
jax: 0.10.0
libtpu: 0.0.40
codegen_flags: <defaults>
</compile_context>

<pallas_src>
import jax
import jax.numpy as jnp
import numpy as np
from jax.experimental import pallas as pl
from jax.experimental.pallas import tpu as pltpu

D_MODEL = 32
N_HEAD = 4
HEAD_DIM = D_MODEL // N_HEAD
DIM_FF = 64
NUM_LAYERS = 2
SEQ = 8
BATCH = 2
EPS = 1e-5


# --------------------------------------------------------------------------
# Fused Pallas kernel: all layers + all batch elements in one invocation.
# Activations are carried as values (VMEM/vregs) across the unrolled layers.
# --------------------------------------------------------------------------
def make_fused_encoder_call(B, S, D, H, F, L):
    Hd = D // H
    scale = 1.0 / (Hd ** 0.5)
    N = B * S

    def kernel(x_ref, pos_ref,
               wq_ref, bq_ref, wk_ref, bk_ref, wv_ref, bv_ref,
               wo_ref, bo_ref, g1_ref, be1_ref,
               w1_ref, b1_ref, w2_ref, b2_ref, g2_ref, be2_ref,
               out_ref):
        x = x_ref[...]        # (B*S, D)
        pos = pos_ref[...]    # (B*S, D)

        def layer_norm(t, g, b):
            mu = jnp.mean(t, axis=-1, keepdims=True)
            var = jnp.mean((t - mu) ** 2, axis=-1, keepdims=True)
            return (t - mu) * jax.lax.rsqrt(var + EPS) * g + b

        for l in range(L):                       # static unroll: layers fused
            qk_in = x + pos
            # Dense projections over the whole flattened batch (one MXU op each).
            q = jnp.dot(qk_in, wq_ref[l],
                        preferred_element_type=jnp.float32) + bq_ref[l]
            k = jnp.dot(qk_in, wk_ref[l],
                        preferred_element_type=jnp.float32) + bk_ref[l]
            v = jnp.dot(x, wv_ref[l],
                        preferred_element_type=jnp.float32) + bv_ref[l]

            wo = wo_ref[l]                       # (D, D), rows head-blocked
            batch_rows = []
            for b in range(B):                   # static unroll over batch
                r0 = b * S                       # sublane-aligned (S == 8)
                q_b = q[r0:r0 + S, :]
                k_b = k[r0:r0 + S, :]
                v_b = v[r0:r0 + S, :]
                o_b = jnp.zeros((S, D), jnp.float32)
                for h in range(H):               # static unroll over heads
                    c0 = h * Hd
                    q_h = q_b[:, c0:c0 + Hd]
                    k_h = k_b[:, c0:c0 + Hd]
                    v_h = v_b[:, c0:c0 + Hd]
                    s_hb = jax.lax.dot_general(
                        q_h, k_h, (((1,), (1,)), ((), ())),
                        preferred_element_type=jnp.float32) * scale   # (S, S)
                    s_hb = s_hb - jnp.max(s_hb, axis=-1, keepdims=True)
                    p = jnp.exp(s_hb)
                    inv = pl.reciprocal(jnp.sum(p, axis=-1, keepdims=True),
                                        approx=True)
                    p = p * inv
                    pv = jnp.dot(p, v_h,
                                 preferred_element_type=jnp.float32)  # (S, Hd)
                    # Project this head straight through its Wo^T row block
                    # (sublane slice at multiple of 8) and accumulate: no concat.
                    o_b = o_b + jnp.dot(pv, wo[c0:c0 + Hd, :],
                                        preferred_element_type=jnp.float32)
                batch_rows.append(o_b)
            attn = jnp.concatenate(batch_rows, axis=0) + bo_ref[l]    # (N, D)

            # residual + LayerNorm1
            y = layer_norm(x + attn, g1_ref[l], be1_ref[l])

            # FFN: relu(y @ W1^T + b1) @ W2^T + b2   (whole batch per matmul)
            h1 = jnp.maximum(
                jnp.dot(y, w1_ref[l], preferred_element_type=jnp.float32)
                + b1_ref[l], 0.0)
            h2 = jnp.dot(h1, w2_ref[l],
                         preferred_element_type=jnp.float32) + b2_ref[l]

            # residual + LayerNorm2
            x = layer_norm(y + h2, g2_ref[l], be2_ref[l])

        out_ref[...] = x.astype(out_ref.dtype)

    def full_spec(shape):
        nd = len(shape)
        return pl.BlockSpec(shape, lambda i, _nd=nd: (0,) * _nd)

    in_specs = [
        full_spec((N, D)),                 # x  (flattened B*S, D)
        full_spec((N, D)),                 # pos
        full_spec((L, D, D)), full_spec((L, 1, D)),   # Wq^T, bq
        full_spec((L, D, D)), full_spec((L, 1, D)),   # Wk^T, bk
        full_spec((L, D, D)), full_spec((L, 1, D)),   # Wv^T, bv
        full_spec((L, D, D)), full_spec((L, 1, D)),   # Wo^T, bo
        full_spec((L, 1, D)), full_spec((L, 1, D)),   # ln1 gamma, beta
        full_spec((L, D, F)), full_spec((L, 1, F)),   # W1^T, b1
        full_spec((L, F, D)), full_spec((L, 1, D)),   # W2^T, b2
        full_spec((L, 1, D)), full_spec((L, 1, D)),   # ln2 gamma, beta
    ]
    return pl.pallas_call(
        kernel,
        out_shape=jax.ShapeDtypeStruct((N, D), jnp.float32),
        grid=(1,),
        in_specs=in_specs,
        out_specs=full_spec((N, D)),
        compiler_params=pltpu.CompilerParams(
            dimension_semantics=("arbitrary",)),
    )


# --------------------------------------------------------------------------
# TransformerEncoder forward (norm=None, return_intermediate=False)
# --------------------------------------------------------------------------
def transformer_encoder(src, pos, layer_params):
    B, S, D = src.shape
    # Stack per-layer params along a leading layer axis so a single kernel
    # invocation sees every layer's weights.
    stacked = [jnp.stack([p[i] for p in layer_params], axis=0)
               for i in range(len(layer_params[0]))]
    call = make_fused_encoder_call(B, S, D, N_HEAD, DIM_FF, NUM_LAYERS)
    out2d = call(src.reshape(B * S, D), pos.reshape(B * S, D), *stacked)
    return out2d.reshape(B, S, D)


# --------------------------------------------------------------------------
# Deterministic parameter init (synthetic; mirrors the PyTorch module shapes)
# --------------------------------------------------------------------------
def init_layer_params(key):
    ks = jax.random.split(key, 10)

    def lin(k, d_in, d_out, scale=0.05):
        k_w, k_b = jax.random.split(k)
        w_t = jax.random.normal(k_w, (d_in, d_out), jnp.float32) * scale  # W^T
        b = jax.random.normal(k_b, (1, d_out), jnp.float32) * 0.01
        return w_t, b

    wq, bq = lin(ks[0], D_MODEL, D_MODEL)
    wk, bk = lin(ks[1], D_MODEL, D_MODEL)
    wv, bv = lin(ks[2], D_MODEL, D_MODEL)
    wo, bo = lin(ks[3], D_MODEL, D_MODEL)
    g1 = 1.0 + 0.01 * jax.random.normal(ks[4], (1, D_MODEL), jnp.float32)
    be1 = 0.01 * jax.random.normal(ks[5], (1, D_MODEL), jnp.float32)
    w1, b1 = lin(ks[6], D_MODEL, DIM_FF)
    w2, b2 = lin(ks[7], DIM_FF, D_MODEL)
    g2 = 1.0 + 0.01 * jax.random.normal(ks[8], (1, D_MODEL), jnp.float32)
    be2 = 0.01 * jax.random.normal(ks[9], (1, D_MODEL), jnp.float32)
    return (wq, bq, wk, bk, wv, bv, wo, bo, g1, be1, w1, b1, w2, b2, g2, be2)


# --------------------------------------------------------------------------
# Pure-JAX reference (mirrors PyTorch semantics) for a correctness check
# --------------------------------------------------------------------------
def ref_layer(x, pos, p):
    (wq, bq, wk, bk, wv, bv, wo, bo, g1, be1, w1, b1, w2, b2, g2, be2) = p
    B, S, D = x.shape
    qk = x + pos
    q = qk @ wq + bq
    k = qk @ wk + bk
    v = x @ wv + bv
    q = q.reshape(B, S, N_HEAD, HEAD_DIM)
    k = k.reshape(B, S, N_HEAD, HEAD_DIM)
    v = v.reshape(B, S, N_HEAD, HEAD_DIM)
    scores = jnp.einsum("bqhd,bkhd->bhqk", q, k) / (HEAD_DIM ** 0.5)
    attn = jax.nn.softmax(scores, axis=-1)
    o = jnp.einsum("bhqk,bkhd->bqhd", attn, v).reshape(B, S, D)
    o = o @ wo + bo

    def ln(t, g, b):
        mu = jnp.mean(t, axis=-1, keepdims=True)
        var = jnp.mean((t - mu) ** 2, axis=-1, keepdims=True)
        return (t - mu) * jax.lax.rsqrt(var + EPS) * g + b

    y = ln(x + o, g1, be1)
    h = jnp.maximum(y @ w1 + b1, 0.0) @ w2 + b2
    return ln(y + h, g2, be2)


def ref_encoder(src, pos, layer_params):
    out = src
    for p in layer_params:
        out = ref_layer(out, pos, p)
    return out


if __name__ == "__main__":
    key = jax.random.PRNGKey(0)
    k_src, k_pos, k_par = jax.random.split(key, 3)
    src = jax.random.normal(k_src, (BATCH, SEQ, D_MODEL), jnp.float32)
    pos = jax.random.normal(k_pos, (BATCH, SEQ, D_MODEL), jnp.float32)

    layer_keys = jax.random.split(k_par, NUM_LAYERS)
    layer_params = [init_layer_params(k) for k in layer_keys]

    out = transformer_encoder(src, pos, layer_params)
    out = jax.block_until_ready(out)

    ref = jax.block_until_ready(ref_encoder(src, pos, layer_params))
    # Slightly relaxed tolerance: softmax normalization uses the EUP approx
    # reciprocal (pl.reciprocal(..., approx=True)).
    np.testing.assert_allclose(np.asarray(out), np.asarray(ref),
                               rtol=2e-3, atol=2e-3)
    print("KERNEL_OK")
</pallas_src>

<mosaic_0001>
module attributes {stable_mosaic.version = 11 : i64} {
  func.func @kernel(%arg0: i32, %arg1: memref<16x32xf32, #tpu.memory_space<vmem>>, %arg2: memref<16x32xf32, #tpu.memory_space<vmem>>, %arg3: memref<2x32x32xf32, #tpu.memory_space<vmem>>, %arg4: memref<2x1x32xf32, #tpu.memory_space<vmem>>, %arg5: memref<2x32x32xf32, #tpu.memory_space<vmem>>, %arg6: memref<2x1x32xf32, #tpu.memory_space<vmem>>, %arg7: memref<2x32x32xf32, #tpu.memory_space<vmem>>, %arg8: memref<2x1x32xf32, #tpu.memory_space<vmem>>, %arg9: memref<2x32x32xf32, #tpu.memory_space<vmem>>, %arg10: memref<2x1x32xf32, #tpu.memory_space<vmem>>, %arg11: memref<2x1x32xf32, #tpu.memory_space<vmem>>, %arg12: memref<2x1x32xf32, #tpu.memory_space<vmem>>, %arg13: memref<2x32x64xf32, #tpu.memory_space<vmem>>, %arg14: memref<2x1x64xf32, #tpu.memory_space<vmem>>, %arg15: memref<2x64x32xf32, #tpu.memory_space<vmem>>, %arg16: memref<2x1x32xf32, #tpu.memory_space<vmem>>, %arg17: memref<2x1x32xf32, #tpu.memory_space<vmem>>, %arg18: memref<2x1x32xf32, #tpu.memory_space<vmem>>, %arg19: memref<16x32xf32, #tpu.memory_space<vmem>>) attributes {dimension_semantics = [#tpu.dimension_semantics<arbitrary>], iteration_bounds = array<i64: 1>, scalar_prefetch = 0 : i64, scratch_operands = 0 : i64, tpu.core_type = #tpu.core_type<tc>, window_params = [{pipeline_mode = #tpu.pipeline_mode<synchronous>, transform_indices = @transform_0, window_bounds = array<i64: 16, 32>}, {pipeline_mode = #tpu.pipeline_mode<synchronous>, transform_indices = @transform_1, window_bounds = array<i64: 16, 32>}, {pipeline_mode = #tpu.pipeline_mode<synchronous>, transform_indices = @transform_2, window_bounds = array<i64: 2, 32, 32>}, {pipeline_mode = #tpu.pipeline_mode<synchronous>, transform_indices = @transform_3, window_bounds = array<i64: 2, 1, 32>}, {pipeline_mode = #tpu.pipeline_mode<synchronous>, transform_indices = @transform_4, window_bounds = array<i64: 2, 32, 32>}, {pipeline_mode = #tpu.pipeline_mode<synchronous>, transform_indices = @transform_5, window_bounds = array<i64: 2, 1, 32>}, {pipeline_mode = #tpu.pipeline_mode<synchronous>, transform_indices = @transform_6, window_bounds = array<i64: 2, 32, 32>}, {pipeline_mode = #tpu.pipeline_mode<synchronous>, transform_indices = @transform_7, window_bounds = array<i64: 2, 1, 32>}, {pipeline_mode = #tpu.pipeline_mode<synchronous>, transform_indices = @transform_8, window_bounds = array<i64: 2, 32, 32>}, {pipeline_mode = #tpu.pipeline_mode<synchronous>, transform_indices = @transform_9, window_bounds = array<i64: 2, 1, 32>}, {pipeline_mode = #tpu.pipeline_mode<synchronous>, transform_indices = @transform_10, window_bounds = array<i64: 2, 1, 32>}, {pipeline_mode = #tpu.pipeline_mode<synchronous>, transform_indices = @transform_11, window_bounds = array<i64: 2, 1, 32>}, {pipeline_mode = #tpu.pipeline_mode<synchronous>, transform_indices = @transform_12, window_bounds = array<i64: 2, 32, 64>}, {pipeline_mode = #tpu.pipeline_mode<synchronous>, transform_indices = @transform_13, window_bounds = array<i64: 2, 1, 64>}, {pipeline_mode = #tpu.pipeline_mode<synchronous>, transform_indices = @transform_14, window_bounds = array<i64: 2, 64, 32>}, {pipeline_mode = #tpu.pipeline_mode<synchronous>, transform_indices = @transform_15, window_bounds = array<i64: 2, 1, 32>}, {pipeline_mode = #tpu.pipeline_mode<synchronous>, transform_indices = @transform_16, window_bounds = array<i64: 2, 1, 32>}, {pipeline_mode = #tpu.pipeline_mode<synchronous>, transform_indices = @transform_17, window_bounds = array<i64: 2, 1, 32>}, {pipeline_mode = #tpu.pipeline_mode<synchronous>, transform_indices = @transform_18, window_bounds = array<i64: 16, 32>}]} {
    %c0 = arith.constant 0 : index
    %c0_0 = arith.constant 0 : index
    %0 = vector.load %arg1[%c0, %c0_0] : memref<16x32xf32, #tpu.memory_space<vmem>>, vector<16x32xf32>
    %c0_1 = arith.constant 0 : index
    %c0_2 = arith.constant 0 : index
    %1 = vector.load %arg2[%c0_1, %c0_2] : memref<16x32xf32, #tpu.memory_space<vmem>>, vector<16x32xf32>
    %2 = arith.addf %0, %1 : vector<16x32xf32>
    %c0_3 = arith.constant 0 : index
    %c0_4 = arith.constant 0 : index
    %c0_5 = arith.constant 0 : index
    %3 = vector.load %arg3[%c0_3, %c0_4, %c0_5] : memref<2x32x32xf32, #tpu.memory_space<vmem>>, vector<1x32x32xf32>
    %4 = vector.shape_cast %3 : vector<1x32x32xf32> to vector<32x32xf32>
    %cst = arith.constant dense<0.000000e+00> : vector<16x32xf32>
    %5 = tpu.matmul %2, %4, %cst {dimension_numbers = #tpu.dot_dimension_numbers<[1], [0], [0], [1], [0, 0, 1, 1], [], []>} : vector<16x32xf32>, vector<32x32xf32>, vector<16x32xf32> -> vector<16x32xf32>
    %c0_6 = arith.constant 0 : index
    %c0_7 = arith.constant 0 : index
    %c0_8 = arith.constant 0 : index
    %6 = vector.load %arg4[%c0_6, %c0_7, %c0_8] : memref<2x1x32xf32, #tpu.memory_space<vmem>>, vector<1x1x32xf32>
    %7 = vector.shape_cast %6 : vector<1x1x32xf32> to vector<1x32xf32>
    %8 = vector.broadcast %7 : vector<1x32xf32> to vector<16x32xf32>
    %9 = arith.addf %5, %8 : vector<16x32xf32>
    %c0_9 = arith.constant 0 : index
    %c0_10 = arith.constant 0 : index
    %c0_11 = arith.constant 0 : index
    %10 = vector.load %arg5[%c0_9, %c0_10, %c0_11] : memref<2x32x32xf32, #tpu.memory_space<vmem>>, vector<1x32x32xf32>
    %11 = vector.shape_cast %10 : vector<1x32x32xf32> to vector<32x32xf32>
    %cst_12 = arith.constant dense<0.000000e+00> : vector<16x32xf32>
    %12 = tpu.matmul %2, %11, %cst_12 {dimension_numbers = #tpu.dot_dimension_numbers<[1], [0], [0], [1], [0, 0, 1, 1], [], []>} : vector<16x32xf32>, vector<32x32xf32>, vector<16x32xf32> -> vector<16x32xf32>
    %c0_13 = arith.constant 0 : index
    %c0_14 = arith.constant 0 : index
    %c0_15 = arith.constant 0 : index
    %13 = vector.load %arg6[%c0_13, %c0_14, %c0_15] : memref<2x1x32xf32, #tpu.memory_space<vmem>>, vector<1x1x32xf32>
    %14 = vector.shape_cast %13 : vector<1x1x32xf32> to vector<1x32xf32>
    %15 = vector.broadcast %14 : vector<1x32xf32> to vector<16x32xf32>
    %16 = arith.addf %12, %15 : vector<16x32xf32>
    %c0_16 = arith.constant 0 : index
    %c0_17 = arith.constant 0 : index
    %c0_18 = arith.constant 0 : index
    %17 = vector.load %arg7[%c0_16, %c0_17, %c0_18] : memref<2x32x32xf32, #tpu.memory_space<vmem>>, vector<1x32x32xf32>
    %18 = vector.shape_cast %17 : vector<1x32x32xf32> to vector<32x32xf32>
    %cst_19 = arith.constant dense<0.000000e+00> : vector<16x32xf32>
    %19 = tpu.matmul %0, %18, %cst_19 {dimension_numbers = #tpu.dot_dimension_numbers<[1], [0], [0], [1], [0, 0, 1, 1], [], []>} : vector<16x32xf32>, vector<32x32xf32>, vector<16x32xf32> -> vector<16x32xf32>
    %c0_20 = arith.constant 0 : index
    %c0_21 = arith.constant 0 : index
    %c0_22 = arith.constant 0 : index
    %20 = vector.load %arg8[%c0_20, %c0_21, %c0_22] : memref<2x1x32xf32, #tpu.memory_space<vmem>>, vector<1x1x32xf32>
    %21 = vector.shape_cast %20 : vector<1x1x32xf32> to vector<1x32xf32>
    %22 = vector.broadcast %21 : vector<1x32xf32> to vector<16x32xf32>
    %23 = arith.addf %19, %22 : vector<16x32xf32>
    %c0_23 = arith.constant 0 : index
    %c0_24 = arith.constant 0 : index
    %c0_25 = arith.constant 0 : index
    %24 = vector.load %arg9[%c0_23, %c0_24, %c0_25] : memref<2x32x32xf32, #tpu.memory_space<vmem>>, vector<1x32x32xf32>
    %25 = vector.shape_cast %24 : vector<1x32x32xf32> to vector<32x32xf32>
    %26 = vector.extract_strided_slice %9 {offsets = [0, 0], sizes = [8, 32], strides = [1, 1]} : vector<16x32xf32> to vector<8x32xf32>
    %27 = vector.extract_strided_slice %16 {offsets = [0, 0], sizes = [8, 32], strides = [1, 1]} : vector<16x32xf32> to vector<8x32xf32>
    %28 = vector.extract_strided_slice %23 {offsets = [0, 0], sizes = [8, 32], strides = [1, 1]} : vector<16x32xf32> to vector<8x32xf32>
    %cst_26 = arith.constant 0.000000e+00 : f32
    %29 = vector.broadcast %cst_26 : f32 to vector<8x32xf32>
    %30 = vector.extract_strided_slice %26 {offsets = [0, 0], sizes = [8, 8], strides = [1, 1]} : vector<8x32xf32> to vector<8x8xf32>
    %31 = vector.extract_strided_slice %27 {offsets = [0, 0], sizes = [8, 8], strides = [1, 1]} : vector<8x32xf32> to vector<8x8xf32>
    %32 = vector.extract_strided_slice %28 {offsets = [0, 0], sizes = [8, 8], strides = [1, 1]} : vector<8x32xf32> to vector<8x8xf32>
    %cst_27 = arith.constant dense<0.000000e+00> : vector<8x8xf32>
    %33 = tpu.matmul %30, %31, %cst_27 {dimension_numbers = #tpu.dot_dimension_numbers<[1], [1], [0], [0], [0, 0, 1, 0], [], []>} : vector<8x8xf32>, vector<8x8xf32>, vector<8x8xf32> -> vector<8x8xf32>
    %cst_28 = arith.constant 0.353553385 : f32
    %34 = vector.broadcast %cst_28 : f32 to vector<8x8xf32>
    %35 = arith.mulf %33, %34 : vector<8x8xf32>
    %cst_29 = arith.constant dense<0xFF800000> : vector<8xf32>
    %36 = vector.multi_reduction <maximumf>, %35, %cst_29 [1] : vector<8x8xf32> to vector<8xf32>
    %37 = vector.shape_cast %36 : vector<8xf32> to vector<8x1xf32>
    %38 = vector.broadcast %37 : vector<8x1xf32> to vector<8x8xf32>
    %39 = arith.subf %35, %38 : vector<8x8xf32>
    %40 = math.exp %39 : vector<8x8xf32>
    %cst_30 = arith.constant dense<0.000000e+00> : vector<8xf32>
    %41 = vector.multi_reduction <add>, %40, %cst_30 [1] : vector<8x8xf32> to vector<8xf32>
    %42 = vector.shape_cast %41 : vector<8xf32> to vector<8x1xf32>
    %43 = tpu.reciprocal %42 {approx = true} : vector<8x1xf32> -> vector<8x1xf32>
    %44 = vector.broadcast %43 : vector<8x1xf32> to vector<8x8xf32>
    %45 = arith.mulf %40, %44 : vector<8x8xf32>
    %cst_31 = arith.constant dense<0.000000e+00> : vector<8x8xf32>
    %46 = tpu.matmul %45, %32, %cst_31 {dimension_numbers = #tpu.dot_dimension_numbers<[1], [0], [0], [1], [0, 0, 1, 1], [], []>} : vector<8x8xf32>, vector<8x8xf32>, vector<8x8xf32> -> vector<8x8xf32>
    %47 = vector.extract_strided_slice %25 {offsets = [0, 0], sizes = [8, 32], strides = [1, 1]} : vector<32x32xf32> to vector<8x32xf32>
    %cst_32 = arith.constant dense<0.000000e+00> : vector<8x32xf32>
    %48 = tpu.matmul %46, %47, %cst_32 {dimension_numbers = #tpu.dot_dimension_numbers<[1], [0], [0], [1], [0, 0, 1, 1], [], []>} : vector<8x8xf32>, vector<8x32xf32>, vector<8x32xf32> -> vector<8x32xf32>
    %49 = arith.addf %29, %48 : vector<8x32xf32>
    %50 = vector.extract_strided_slice %26 {offsets = [0, 8], sizes = [8, 8], strides = [1, 1]} : vector<8x32xf32> to vector<8x8xf32>
    %51 = vector.extract_strided_slice %27 {offsets = [0, 8], sizes = [8, 8], strides = [1, 1]} : vector<8x32xf32> to vector<8x8xf32>
    %52 = vector.extract_strided_slice %28 {offsets = [0, 8], sizes = [8, 8], strides = [1, 1]} : vector<8x32xf32> to vector<8x8xf32>
    %cst_33 = arith.constant dense<0.000000e+00> : vector<8x8xf32>
    %53 = tpu.matmul %50, %51, %cst_33 {dimension_numbers = #tpu.dot_dimension_numbers<[1], [1], [0], [0], [0, 0, 1, 0], [], []>} : vector<8x8xf32>, vector<8x8xf32>, vector<8x8xf32> -> vector<8x8xf32>
    %cst_34 = arith.constant 0.353553385 : f32
    %54 = vector.broadcast %cst_34 : f32 to vector<8x8xf32>
    %55 = arith.mulf %53, %54 : vector<8x8xf32>
    %cst_35 = arith.constant dense<0xFF800000> : vector<8xf32>
    %56 = vector.multi_reduction <maximumf>, %55, %cst_35 [1] : vector<8x8xf32> to vector<8xf32>
    %57 = vector.shape_cast %56 : vector<8xf32> to vector<8x1xf32>
    %58 = vector.broadcast %57 : vector<8x1xf32> to vector<8x8xf32>
    %59 = arith.subf %55, %58 : vector<8x8xf32>
    %60 = math.exp %59 : vector<8x8xf32>
    %cst_36 = arith.constant dense<0.000000e+00> : vector<8xf32>
    %61 = vector.multi_reduction <add>, %60, %cst_36 [1] : vector<8x8xf32> to vector<8xf32>
    %62 = vector.shape_cast %61 : vector<8xf32> to vector<8x1xf32>
    %63 = tpu.reciprocal %62 {approx = true} : vector<8x1xf32> -> vector<8x1xf32>
    %64 = vector.broadcast %63 : vector<8x1xf32> to vector<8x8xf32>
    %65 = arith.mulf %60, %64 : vector<8x8xf32>
    %cst_37 = arith.constant dense<0.000000e+00> : vector<8x8xf32>
    %66 = tpu.matmul %65, %52, %cst_37 {dimension_numbers = #tpu.dot_dimension_numbers<[1], [0], [0], [1], [0, 0, 1, 1], [], []>} : vector<8x8xf32>, vector<8x8xf32>, vector<8x8xf32> -> vector<8x8xf32>
    %67 = vector.extract_strided_slice %25 {offsets = [8, 0], sizes = [8, 32], strides = [1, 1]} : vector<32x32xf32> to vector<8x32xf32>
    %cst_38 = arith.constant dense<0.000000e+00> : vector<8x32xf32>
    %68 = tpu.matmul %66, %67, %cst_38 {dimension_numbers = #tpu.dot_dimension_numbers<[1], [0], [0], [1], [0, 0, 1, 1], [], []>} : vector<8x8xf32>, vector<8x32xf32>, vector<8x32xf32> -> vector<8x32xf32>
    %69 = arith.addf %49, %68 : vector<8x32xf32>
    %70 = vector.extract_strided_slice %26 {offsets = [0, 16], sizes = [8, 8], strides = [1, 1]} : vector<8x32xf32> to vector<8x8xf32>
    %71 = vector.extract_strided_slice %27 {offsets = [0, 16], sizes = [8, 8], strides = [1, 1]} : vector<8x32xf32> to vector<8x8xf32>
    %72 = vector.extract_strided_slice %28 {offsets = [0, 16], sizes = [8, 8], strides = [1, 1]} : vector<8x32xf32> to vector<8x8xf32>
    %cst_39 = arith.constant dense<0.000000e+00> : vector<8x8xf32>
    %73 = tpu.matmul %70, %71, %cst_39 {dimension_numbers = #tpu.dot_dimension_numbers<[1], [1], [0], [0], [0, 0, 1, 0], [], []>} : vector<8x8xf32>, vector<8x8xf32>, vector<8x8xf32> -> vector<8x8xf32>
    %cst_40 = arith.constant 0.353553385 : f32
    %74 = vector.broadcast %cst_40 : f32 to vector<8x8xf32>
    %75 = arith.mulf %73, %74 : vector<8x8xf32>
    %cst_41 = arith.constant dense<0xFF800000> : vector<8xf32>
    %76 = vector.multi_reduction <maximumf>, %75, %cst_41 [1] : vector<8x8xf32> to vector<8xf32>
    %77 = vector.shape_cast %76 : vector<8xf32> to vector<8x1xf32>
    %78 = vector.broadcast %77 : vector<8x1xf32> to vector<8x8xf32>
    %79 = arith.subf %75, %78 : vector<8x8xf32>
    %80 = math.exp %79 : vector<8x8xf32>
    %cst_42 = arith.constant dense<0.000000e+00> : vector<8xf32>
    %81 = vector.multi_reduction <add>, %80, %cst_42 [1] : vector<8x8xf32> to vector<8xf32>
    %82 = vector.shape_cast %81 : vector<8xf32> to vector<8x1xf32>
    %83 = tpu.reciprocal %82 {approx = true} : vector<8x1xf32> -> vector<8x1xf32>
    %84 = vector.broadcast %83 : vector<8x1xf32> to vector<8x8xf32>
    %85 = arith.mulf %80, %84 : vector<8x8xf32>
    %cst_43 = arith.constant dense<0.000000e+00> : vector<8x8xf32>
    %86 = tpu.matmul %85, %72, %cst_43 {dimension_numbers = #tpu.dot_dimension_numbers<[1], [0], [0], [1], [0, 0, 1, 1], [], []>} : vector<8x8xf32>, vector<8x8xf32>, vector<8x8xf32> -> vector<8x8xf32>
    %87 = vector.extract_strided_slice %25 {offsets = [16, 0], sizes = [8, 32], strides = [1, 1]} : vector<32x32xf32> to vector<8x32xf32>
    %cst_44 = arith.constant dense<0.000000e+00> : vector<8x32xf32>
    %88 = tpu.matmul %86, %87, %cst_44 {dimension_numbers = #tpu.dot_dimension_numbers<[1], [0], [0], [1], [0, 0, 1, 1], [], []>} : vector<8x8xf32>, vector<8x32xf32>, vector<8x32xf32> -> vector<8x32xf32>
    %89 = arith.addf %69, %88 : vector<8x32xf32>
    %90 = vector.extract_strided_slice %26 {offsets = [0, 24], sizes = [8, 8], strides = [1, 1]} : vector<8x32xf32> to vector<8x8xf32>
    %91 = vector.extract_strided_slice %27 {offsets = [0, 24], sizes = [8, 8], strides = [1, 1]} : vector<8x32xf32> to vector<8x8xf32>
    %92 = vector.extract_strided_slice %28 {offsets = [0, 24], sizes = [8, 8], strides = [1, 1]} : vector<8x32xf32> to vector<8x8xf32>
    %cst_45 = arith.constant dense<0.000000e+00> : vector<8x8xf32>
    %93 = tpu.matmul %90, %91, %cst_45 {dimension_numbers = #tpu.dot_dimension_numbers<[1], [1], [0], [0], [0, 0, 1, 0], [], []>} : vector<8x8xf32>, vector<8x8xf32>, vector<8x8xf32> -> vector<8x8xf32>
    %cst_46 = arith.constant 0.353553385 : f32
    %94 = vector.broadcast %cst_46 : f32 to vector<8x8xf32>
    %95 = arith.mulf %93, %94 : vector<8x8xf32>
    %cst_47 = arith.constant dense<0xFF800000> : vector<8xf32>
    %96 = vector.multi_reduction <maximumf>, %95, %cst_47 [1] : vector<8x8xf32> to vector<8xf32>
    %97 = vector.shape_cast %96 : vector<8xf32> to vector<8x1xf32>
    %98 = vector.broadcast %97 : vector<8x1xf32> to vector<8x8xf32>
    %99 = arith.subf %95, %98 : vector<8x8xf32>
    %100 = math.exp %99 : vector<8x8xf32>
    %cst_48 = arith.constant dense<0.000000e+00> : vector<8xf32>
    %101 = vector.multi_reduction <add>, %100, %cst_48 [1] : vector<8x8xf32> to vector<8xf32>
    %102 = vector.shape_cast %101 : vector<8xf32> to vector<8x1xf32>
    %103 = tpu.reciprocal %102 {approx = true} : vector<8x1xf32> -> vector<8x1xf32>
    %104 = vector.broadcast %103 : vector<8x1xf32> to vector<8x8xf32>
    %105 = arith.mulf %100, %104 : vector<8x8xf32>
    %cst_49 = arith.constant dense<0.000000e+00> : vector<8x8xf32>
    %106 = tpu.matmul %105, %92, %cst_49 {dimension_numbers = #tpu.dot_dimension_numbers<[1], [0], [0], [1], [0, 0, 1, 1], [], []>} : vector<8x8xf32>, vector<8x8xf32>, vector<8x8xf32> -> vector<8x8xf32>
    %107 = vector.extract_strided_slice %25 {offsets = [24, 0], sizes = [8, 32], strides = [1, 1]} : vector<32x32xf32> to vector<8x32xf32>
    %cst_50 = arith.constant dense<0.000000e+00> : vector<8x32xf32>
    %108 = tpu.matmul %106, %107, %cst_50 {dimension_numbers = #tpu.dot_dimension_numbers<[1], [0], [0], [1], [0, 0, 1, 1], [], []>} : vector<8x8xf32>, vector<8x32xf32>, vector<8x32xf32> -> vector<8x32xf32>
    %109 = arith.addf %89, %108 : vector<8x32xf32>
    %110 = vector.extract_strided_slice %9 {offsets = [8, 0], sizes = [8, 32], strides = [1, 1]} : vector<16x32xf32> to vector<8x32xf32>
    %111 = vector.extract_strided_slice %16 {offsets = [8, 0], sizes = [8, 32], strides = [1, 1]} : vector<16x32xf32> to vector<8x32xf32>
    %112 = vector.extract_strided_slice %23 {offsets = [8, 0], sizes = [8, 32], strides = [1, 1]} : vector<16x32xf32> to vector<8x32xf32>
    %cst_51 = arith.constant 0.000000e+00 : f32
    %113 = vector.broadcast %cst_51 : f32 to vector<8x32xf32>
    %114 = vector.extract_strided_slice %110 {offsets = [0, 0], sizes = [8, 8], strides = [1, 1]} : vector<8x32xf32> to vector<8x8xf32>
    %115 = vector.extract_strided_slice %111 {offsets = [0, 0], sizes = [8, 8], strides = [1, 1]} : vector<8x32xf32> to vector<8x8xf32>
    %116 = vector.extract_strided_slice %112 {offsets = [0, 0], sizes = [8, 8], strides = [1, 1]} : vector<8x32xf32> to vector<8x8xf32>
    %cst_52 = arith.constant dense<0.000000e+00> : vector<8x8xf32>
    %117 = tpu.matmul %114, %115, %cst_52 {dimension_numbers = #tpu.dot_dimension_numbers<[1], [1], [0], [0], [0, 0, 1, 0], [], []>} : vector<8x8xf32>, vector<8x8xf32>, vector<8x8xf32> -> vector<8x8xf32>
    %cst_53 = arith.constant 0.353553385 : f32
    %118 = vector.broadcast %cst_53 : f32 to vector<8x8xf32>
    %119 = arith.mulf %117, %118 : vector<8x8xf32>
    %cst_54 = arith.constant dense<0xFF800000> : vector<8xf32>
    %120 = vector.multi_reduction <maximumf>, %119, %cst_54 [1] : vector<8x8xf32> to vector<8xf32>
    %121 = vector.shape_cast %120 : vector<8xf32> to vector<8x1xf32>
    %122 = vector.broadcast %121 : vector<8x1xf32> to vector<8x8xf32>
    %123 = arith.subf %119, %122 : vector<8x8xf32>
    %124 = math.exp %123 : vector<8x8xf32>
    %cst_55 = arith.constant dense<0.000000e+00> : vector<8xf32>
    %125 = vector.multi_reduction <add>, %124, %cst_55 [1] : vector<8x8xf32> to vector<8xf32>
    %126 = vector.shape_cast %125 : vector<8xf32> to vector<8x1xf32>
    %127 = tpu.reciprocal %126 {approx = true} : vector<8x1xf32> -> vector<8x1xf32>
    %128 = vector.broadcast %127 : vector<8x1xf32> to vector<8x8xf32>
    %129 = arith.mulf %124, %128 : vector<8x8xf32>
    %cst_56 = arith.constant dense<0.000000e+00> : vector<8x8xf32>
    %130 = tpu.matmul %129, %116, %cst_56 {dimension_numbers = #tpu.dot_dimension_numbers<[1], [0], [0], [1], [0, 0, 1, 1], [], []>} : vector<8x8xf32>, vector<8x8xf32>, vector<8x8xf32> -> vector<8x8xf32>
    %131 = vector.extract_strided_slice %25 {offsets = [0, 0], sizes = [8, 32], strides = [1, 1]} : vector<32x32xf32> to vector<8x32xf32>
    %cst_57 = arith.constant dense<0.000000e+00> : vector<8x32xf32>
    %132 = tpu.matmul %130, %131, %cst_57 {dimension_numbers = #tpu.dot_dimension_numbers<[1], [0], [0], [1], [0, 0, 1, 1], [], []>} : vector<8x8xf32>, vector<8x32xf32>, vector<8x32xf32> -> vector<8x32xf32>
    %133 = arith.addf %113, %132 : vector<8x32xf32>
    %134 = vector.extract_strided_slice %110 {offsets = [0, 8], sizes = [8, 8], strides = [1, 1]} : vector<8x32xf32> to vector<8x8xf32>
    %135 = vector.extract_strided_slice %111 {offsets = [0, 8], sizes = [8, 8], strides = [1, 1]} : vector<8x32xf32> to vector<8x8xf32>
    %136 = vector.extract_strided_slice %112 {offsets = [0, 8], sizes = [8, 8], strides = [1, 1]} : vector<8x32xf32> to vector<8x8xf32>
    %cst_58 = arith.constant dense<0.000000e+00> : vector<8x8xf32>
    %137 = tpu.matmul %134, %135, %cst_58 {dimension_numbers = #tpu.dot_dimension_numbers<[1], [1], [0], [0], [0, 0, 1, 0], [], []>} : vector<8x8xf32>, vector<8x8xf32>, vector<8x8xf32> -> vector<8x8xf32>
    %cst_59 = arith.constant 0.353553385 : f32
    %138 = vector.broadcast %cst_59 : f32 to vector<8x8xf32>
    %139 = arith.mulf %137, %138 : vector<8x8xf32>
    %cst_60 = arith.constant dense<0xFF800000> : vector<8xf32>
    %140 = vector.multi_reduction <maximumf>, %139, %cst_60 [1] : vector<8x8xf32> to vector<8xf32>
    %141 = vector.shape_cast %140 : vector<8xf32> to vector<8x1xf32>
    %142 = vector.broadcast %141 : vector<8x1xf32> to vector<8x8xf32>
    %143 = arith.subf %139, %142 : vector<8x8xf32>
    %144 = math.exp %143 : vector<8x8xf32>
    %cst_61 = arith.constant dense<0.000000e+00> : vector<8xf32>
    %145 = vector.multi_reduction <add>, %144, %cst_61 [1] : vector<8x8xf32> to vector<8xf32>
    %146 = vector.shape_cast %145 : vector<8xf32> to vector<8x1xf32>
    %147 = tpu.reciprocal %146 {approx = true} : vector<8x1xf32> -> vector<8x1xf32>
    %148 = vector.broadcast %147 : vector<8x1xf32> to vector<8x8xf32>
    %149 = arith.mulf %144, %148 : vector<8x8xf32>
    %cst_62 = arith.constant dense<0.000000e+00> : vector<8x8xf32>
    %150 = tpu.matmul %149, %136, %cst_62 {dimension_numbers = #tpu.dot_dimension_numbers<[1], [0], [0], [1], [0, 0, 1, 1], [], []>} : vector<8x8xf32>, vector<8x8xf32>, vector<8x8xf32> -> vector<8x8xf32>
    %151 = vector.extract_strided_slice %25 {offsets = [8, 0], sizes = [8, 32], strides = [1, 1]} : vector<32x32xf32> to vector<8x32xf32>
    %cst_63 = arith.constant dense<0.000000e+00> : vector<8x32xf32>
    %152 = tpu.matmul %150, %151, %cst_63 {dimension_numbers = #tpu.dot_dimension_numbers<[1], [0], [0], [1], [0, 0, 1, 1], [], []>} : vector<8x8xf32>, vector<8x32xf32>, vector<8x32xf32> -> vector<8x32xf32>
    %153 = arith.addf %133, %152 : vector<8x32xf32>
    %154 = vector.extract_strided_slice %110 {offsets = [0, 16], sizes = [8, 8], strides = [1, 1]} : vector<8x32xf32> to vector<8x8xf32>
    %155 = vector.extract_strided_slice %111 {offsets = [0, 16], sizes = [8, 8], strides = [1, 1]} : vector<8x32xf32> to vector<8x8xf32>
    %156 = vector.extract_strided_slice %112 {offsets = [0, 16], sizes = [8, 8], strides = [1, 1]} : vector<8x32xf32> to vector<8x8xf32>
    %cst_64 = arith.constant dense<0.000000e+00> : vector<8x8xf32>
    %157 = tpu.matmul %154, %155, %cst_64 {dimension_numbers = #tpu.dot_dimension_numbers<[1], [1], [0], [0], [0, 0, 1, 0], [], []>} : vector<8x8xf32>, vector<8x8xf32>, vector<8x8xf32> -> vector<8x8xf32>
    %cst_65 = arith.constant 0.353553385 : f32
    %158 = vector.broadcast %cst_65 : f32 to vector<8x8xf32>
    %159 = arith.mulf %157, %158 : vector<8x8xf32>
    %cst_66 = arith.constant dense<0xFF800000> : vector<8xf32>
    %160 = vector.multi_reduction <maximumf>, %159, %cst_66 [1] : vector<8x8xf32> to vector<8xf32>
    %161 = vector.shape_cast %160 : vector<8xf32> to vector<8x1xf32>
    %162 = vector.broadcast %161 : vector<8x1xf32> to vector<8x8xf32>
    %163 = arith.subf %159, %162 : vector<8x8xf32>
    %164 = math.exp %163 : vector<8x8xf32>
    %cst_67 = arith.constant dense<0.000000e+00> : vector<8xf32>
    %165 = vector.multi_reduction <add>, %164, %cst_67 [1] : vector<8x8xf32> to vector<8xf32>
    %166 = vector.shape_cast %165 : vector<8xf32> to vector<8x1xf32>
    %167 = tpu.reciprocal %166 {approx = true} : vector<8x1xf32> -> vector<8x1xf32>
    %168 = vector.broadcast %167 : vector<8x1xf32> to vector<8x8xf32>
    %169 = arith.mulf %164, %168 : vector<8x8xf32>
    %cst_68 = arith.constant dense<0.000000e+00> : vector<8x8xf32>
    %170 = tpu.matmul %169, %156, %cst_68 {dimension_numbers = #tpu.dot_dimension_numbers<[1], [0], [0], [1], [0, 0, 1, 1], [], []>} : vector<8x8xf32>, vector<8x8xf32>, vector<8x8xf32> -> vector<8x8xf32>
    %171 = vector.extract_strided_slice %25 {offsets = [16, 0], sizes = [8, 32], strides = [1, 1]} : vector<32x32xf32> to vector<8x32xf32>
    %cst_69 = arith.constant dense<0.000000e+00> : vector<8x32xf32>
    %172 = tpu.matmul %170, %171, %cst_69 {dimension_numbers = #tpu.dot_dimension_numbers<[1], [0], [0], [1], [0, 0, 1, 1], [], []>} : vector<8x8xf32>, vector<8x32xf32>, vector<8x32xf32> -> vector<8x32xf32>
    %173 = arith.addf %153, %172 : vector<8x32xf32>
    %174 = vector.extract_strided_slice %110 {offsets = [0, 24], sizes = [8, 8], strides = [1, 1]} : vector<8x32xf32> to vector<8x8xf32>
    %175 = vector.extract_strided_slice %111 {offsets = [0, 24], sizes = [8, 8], strides = [1, 1]} : vector<8x32xf32> to vector<8x8xf32>
    %176 = vector.extract_strided_slice %112 {offsets = [0, 24], sizes = [8, 8], strides = [1, 1]} : vector<8x32xf32> to vector<8x8xf32>
    %cst_70 = arith.constant dense<0.000000e+00> : vector<8x8xf32>
    %177 = tpu.matmul %174, %175, %cst_70 {dimension_numbers = #tpu.dot_dimension_numbers<[1], [1], [0], [0], [0, 0, 1, 0], [], []>} : vector<8x8xf32>, vector<8x8xf32>, vector<8x8xf32> -> vector<8x8xf32>
    %cst_71 = arith.constant 0.353553385 : f32
    %178 = vector.broadcast %cst_71 : f32 to vector<8x8xf32>
    %179 = arith.mulf %177, %178 : vector<8x8xf32>
    %cst_72 = arith.constant dense<0xFF800000> : vector<8xf32>
    %180 = vector.multi_reduction <maximumf>, %179, %cst_72 [1] : vector<8x8xf32> to vector<8xf32>
    %181 = vector.shape_cast %180 : vector<8xf32> to vector<8x1xf32>
    %182 = vector.broadcast %181 : vector<8x1xf32> to vector<8x8xf32>
    %183 = arith.subf %179, %182 : vector<8x8xf32>
    %184 = math.exp %183 : vector<8x8xf32>
    %cst_73 = arith.constant dense<0.000000e+00> : vector<8xf32>
    %185 = vector.multi_reduction <add>, %184, %cst_73 [1] : vector<8x8xf32> to vector<8xf32>
    %186 = vector.shape_cast %185 : vector<8xf32> to vector<8x1xf32>
    %187 = tpu.reciprocal %186 {approx = true} : vector<8x1xf32> -> vector<8x1xf32>
    %188 = vector.broadcast %187 : vector<8x1xf32> to vector<8x8xf32>
    %189 = arith.mulf %184, %188 : vector<8x8xf32>
    %cst_74 = arith.constant dense<0.000000e+00> : vector<8x8xf32>
    %190 = tpu.matmul %189, %176, %cst_74 {dimension_numbers = #tpu.dot_dimension_numbers<[1], [0], [0], [1], [0, 0, 1, 1], [], []>} : vector<8x8xf32>, vector<8x8xf32>, vector<8x8xf32> -> vector<8x8xf32>
    %191 = vector.extract_strided_slice %25 {offsets = [24, 0], sizes = [8, 32], strides = [1, 1]} : vector<32x32xf32> to vector<8x32xf32>
    %cst_75 = arith.constant dense<0.000000e+00> : vector<8x32xf32>
    %192 = tpu.matmul %190, %191, %cst_75 {dimension_numbers = #tpu.dot_dimension_numbers<[1], [0], [0], [1], [0, 0, 1, 1], [], []>} : vector<8x8xf32>, vector<8x32xf32>, vector<8x32xf32> -> vector<8x32xf32>
    %193 = arith.addf %173, %192 : vector<8x32xf32>
    %194 = tpu.concatenate %109, %193 in 0 : vector<8x32xf32>, vector<8x32xf32> -> vector<16x32xf32>
    %c0_76 = arith.constant 0 : index
    %c0_77 = arith.constant 0 : index
    %c0_78 = arith.constant 0 : index
    %195 = vector.load %arg10[%c0_76, %c0_77, %c0_78] : memref<2x1x32xf32, #tpu.memory_space<vmem>>, vector<1x1x32xf32>
    %196 = vector.shape_cast %195 : vector<1x1x32xf32> to vector<1x32xf32>
    %197 = vector.broadcast %196 : vector<1x32xf32> to vector<16x32xf32>
    %198 = arith.addf %194, %197 : vector<16x32xf32>
    %199 = arith.addf %0, %198 : vector<16x32xf32>
    %c0_79 = arith.constant 0 : index
    %c0_80 = arith.constant 0 : index
    %c0_81 = arith.constant 0 : index
    %200 = vector.load %arg11[%c0_79, %c0_80, %c0_81] : memref<2x1x32xf32, #tpu.memory_space<vmem>>, vector<1x1x32xf32>
    %201 = vector.shape_cast %200 : vector<1x1x32xf32> to vector<1x32xf32>
    %c0_82 = arith.constant 0 : index
    %c0_83 = arith.constant 0 : index
    %c0_84 = arith.constant 0 : index
    %202 = vector.load %arg12[%c0_82, %c0_83, %c0_84] : memref<2x1x32xf32, #tpu.memory_space<vmem>>, vector<1x1x32xf32>
    %203 = vector.shape_cast %202 : vector<1x1x32xf32> to vector<1x32xf32>
    %cst_85 = arith.constant dense<0.000000e+00> : vector<16xf32>
    %204 = vector.multi_reduction <add>, %199, %cst_85 [1] : vector<16x32xf32> to vector<16xf32>
    %205 = vector.shape_cast %204 : vector<16xf32> to vector<16x1xf32>
    %cst_86 = arith.constant 3.200000e+01 : f32
    %206 = vector.broadcast %cst_86 : f32 to vector<16x1xf32>
    %207 = arith.divf %205, %206 : vector<16x1xf32>
    %208 = vector.broadcast %207 : vector<16x1xf32> to vector<16x32xf32>
    %209 = arith.subf %199, %208 : vector<16x32xf32>
    %210 = arith.mulf %209, %209 : vector<16x32xf32>
    %cst_87 = arith.constant dense<0.000000e+00> : vector<16xf32>
    %211 = vector.multi_reduction <add>, %210, %cst_87 [1] : vector<16x32xf32> to vector<16xf32>
    %212 = vector.shape_cast %211 : vector<16xf32> to vector<16x1xf32>
    %cst_88 = arith.constant 3.200000e+01 : f32
    %213 = vector.broadcast %cst_88 : f32 to vector<16x1xf32>
    %214 = arith.divf %212, %213 : vector<16x1xf32>
    %215 = vector.broadcast %207 : vector<16x1xf32> to vector<16x32xf32>
    %216 = arith.subf %199, %215 : vector<16x32xf32>
    %cst_89 = arith.constant 9.99999974E-6 : f32
    %217 = vector.broadcast %cst_89 : f32 to vector<16x1xf32>
    %218 = arith.addf %214, %217 : vector<16x1xf32>
    %219 = math.rsqrt %218 : vector<16x1xf32>
    %220 = vector.broadcast %219 : vector<16x1xf32> to vector<16x32xf32>
    %221 = arith.mulf %216, %220 : vector<16x32xf32>
    %222 = vector.broadcast %201 : vector<1x32xf32> to vector<16x32xf32>
    %223 = arith.mulf %221, %222 : vector<16x32xf32>
    %224 = vector.broadcast %203 : vector<1x32xf32> to vector<16x32xf32>
    %225 = arith.addf %223, %224 : vector<16x32xf32>
    %c0_90 = arith.constant 0 : index
    %c0_91 = arith.constant 0 : index
    %c0_92 = arith.constant 0 : index
    %226 = vector.load %arg13[%c0_90, %c0_91, %c0_92] : memref<2x32x64xf32, #tpu.memory_space<vmem>>, vector<1x32x64xf32>
    %227 = vector.shape_cast %226 : vector<1x32x64xf32> to vector<32x64xf32>
    %cst_93 = arith.constant dense<0.000000e+00> : vector<16x64xf32>
    %228 = tpu.matmul %225, %227, %cst_93 {dimension_numbers = #tpu.dot_dimension_numbers<[1], [0], [0], [1], [0, 0, 1, 1], [], []>} : vector<16x32xf32>, vector<32x64xf32>, vector<16x64xf32> -> vector<16x64xf32>
    %c0_94 = arith.constant 0 : index
    %c0_95 = arith.constant 0 : index
    %c0_96 = arith.constant 0 : index
    %229 = vector.load %arg14[%c0_94, %c0_95, %c0_96] : memref<2x1x64xf32, #tpu.memory_space<vmem>>, vector<1x1x64xf32>
    %230 = vector.shape_cast %229 : vector<1x1x64xf32> to vector<1x64xf32>
    %231 = vector.broadcast %230 : vector<1x64xf32> to vector<16x64xf32>
    %232 = arith.addf %228, %231 : vector<16x64xf32>
    %cst_97 = arith.constant 0.000000e+00 : f32
    %233 = vector.broadcast %cst_97 : f32 to vector<16x64xf32>
    %234 = arith.maximumf %232, %233 : vector<16x64xf32>
    %c0_98 = arith.constant 0 : index
    %c0_99 = arith.constant 0 : index
    %c0_100 = arith.constant 0 : index
    %235 = vector.load %arg15[%c0_98, %c0_99, %c0_100] : memref<2x64x32xf32, #tpu.memory_space<vmem>>, vector<1x64x32xf32>
    %236 = vector.shape_cast %235 : vector<1x64x32xf32> to vector<64x32xf32>
    %cst_101 = arith.constant dense<0.000000e+00> : vector<16x32xf32>
    %237 = tpu.matmul %234, %236, %cst_101 {dimension_numbers = #tpu.dot_dimension_numbers<[1], [0], [0], [1], [0, 0, 1, 1], [], []>} : vector<16x64xf32>, vector<64x32xf32>, vector<16x32xf32> -> vector<16x32xf32>
    %c0_102 = arith.constant 0 : index
    %c0_103 = arith.constant 0 : index
    %c0_104 = arith.constant 0 : index
    %238 = vector.load %arg16[%c0_102, %c0_103, %c0_104] : memref<2x1x32xf32, #tpu.memory_space<vmem>>, vector<1x1x32xf32>
    %239 = vector.shape_cast %238 : vector<1x1x32xf32> to vector<1x32xf32>
    %240 = vector.broadcast %239 : vector<1x32xf32> to vector<16x32xf32>
    %241 = arith.addf %237, %240 : vector<16x32xf32>
    %242 = arith.addf %225, %241 : vector<16x32xf32>
    %c0_105 = arith.constant 0 : index
    %c0_106 = arith.constant 0 : index
    %c0_107 = arith.constant 0 : index
    %243 = vector.load %arg17[%c0_105, %c0_106, %c0_107] : memref<2x1x32xf32, #tpu.memory_space<vmem>>, vector<1x1x32xf32>
    %244 = vector.shape_cast %243 : vector<1x1x32xf32> to vector<1x32xf32>
    %c0_108 = arith.constant 0 : index
    %c0_109 = arith.constant 0 : index
    %c0_110 = arith.constant 0 : index
    %245 = vector.load %arg18[%c0_108, %c0_109, %c0_110] : memref<2x1x32xf32, #tpu.memory_space<vmem>>, vector<1x1x32xf32>
    %246 = vector.shape_cast %245 : vector<1x1x32xf32> to vector<1x32xf32>
    %cst_111 = arith.constant dense<0.000000e+00> : vector<16xf32>
    %247 = vector.multi_reduction <add>, %242, %cst_111 [1] : vector<16x32xf32> to vector<16xf32>
    %248 = vector.shape_cast %247 : vector<16xf32> to vector<16x1xf32>
    %cst_112 = arith.constant 3.200000e+01 : f32
    %249 = vector.broadcast %cst_112 : f32 to vector<16x1xf32>
    %250 = arith.divf %248, %249 : vector<16x1xf32>
    %251 = vector.broadcast %250 : vector<16x1xf32> to vector<16x32xf32>
    %252 = arith.subf %242, %251 : vector<16x32xf32>
    %253 = arith.mulf %252, %252 : vector<16x32xf32>
    %cst_113 = arith.constant dense<0.000000e+00> : vector<16xf32>
    %254 = vector.multi_reduction <add>, %253, %cst_113 [1] : vector<16x32xf32> to vector<16xf32>
    %255 = vector.shape_cast %254 : vector<16xf32> to vector<16x1xf32>
    %cst_114 = arith.constant 3.200000e+01 : f32
    %256 = vector.broadcast %cst_114 : f32 to vector<16x1xf32>
    %257 = arith.divf %255, %256 : vector<16x1xf32>
    %258 = vector.broadcast %250 : vector<16x1xf32> to vector<16x32xf32>
    %259 = arith.subf %242, %258 : vector<16x32xf32>
    %cst_115 = arith.constant 9.99999974E-6 : f32
    %260 = vector.broadcast %cst_115 : f32 to vector<16x1xf32>
    %261 = arith.addf %257, %260 : vector<16x1xf32>
    %262 = math.rsqrt %261 : vector<16x1xf32>
    %263 = vector.broadcast %262 : vector<16x1xf32> to vector<16x32xf32>
    %264 = arith.mulf %259, %263 : vector<16x32xf32>
    %265 = vector.broadcast %244 : vector<1x32xf32> to vector<16x32xf32>
    %266 = arith.mulf %264, %265 : vector<16x32xf32>
    %267 = vector.broadcast %246 : vector<1x32xf32> to vector<16x32xf32>
    %268 = arith.addf %266, %267 : vector<16x32xf32>
    %269 = arith.addf %268, %1 : vector<16x32xf32>
    %c1 = arith.constant 1 : index
    %c0_116 = arith.constant 0 : index
    %c0_117 = arith.constant 0 : index
    %270 = vector.load %arg3[%c1, %c0_116, %c0_117] : memref<2x32x32xf32, #tpu.memory_space<vmem>>, vector<1x32x32xf32>
    %271 = vector.shape_cast %270 : vector<1x32x32xf32> to vector<32x32xf32>
    %cst_118 = arith.constant dense<0.000000e+00> : vector<16x32xf32>
    %272 = tpu.matmul %269, %271, %cst_118 {dimension_numbers = #tpu.dot_dimension_numbers<[1], [0], [0], [1], [0, 0, 1, 1], [], []>} : vector<16x32xf32>, vector<32x32xf32>, vector<16x32xf32> -> vector<16x32xf32>
    %c1_119 = arith.constant 1 : index
    %c0_120 = arith.constant 0 : index
    %c0_121 = arith.constant 0 : index
    %273 = vector.load %arg4[%c1_119, %c0_120, %c0_121] : memref<2x1x32xf32, #tpu.memory_space<vmem>>, vector<1x1x32xf32>
    %274 = vector.shape_cast %273 : vector<1x1x32xf32> to vector<1x32xf32>
    %275 = vector.broadcast %274 : vector<1x32xf32> to vector<16x32xf32>
    %276 = arith.addf %272, %275 : vector<16x32xf32>
    %c1_122 = arith.constant 1 : index
    %c0_123 = arith.constant 0 : index
    %c0_124 = arith.constant 0 : index
    %277 = vector.load %arg5[%c1_122, %c0_123, %c0_124] : memref<2x32x32xf32, #tpu.memory_space<vmem>>, vector<1x32x32xf32>
    %278 = vector.shape_cast %277 : vector<1x32x32xf32> to vector<32x32xf32>
    %cst_125 = arith.constant dense<0.000000e+00> : vector<16x32xf32>
    %279 = tpu.matmul %269, %278, %cst_125 {dimension_numbers = #tpu.dot_dimension_numbers<[1], [0], [0], [1], [0, 0, 1, 1], [], []>} : vector<16x32xf32>, vector<32x32xf32>, vector<16x32xf32> -> vector<16x32xf32>
    %c1_126 = arith.constant 1 : index
    %c0_127 = arith.constant 0 : index
    %c0_128 = arith.constant 0 : index
    %280 = vector.load %arg6[%c1_126, %c0_127, %c0_128] : memref<2x1x32xf32, #tpu.memory_space<vmem>>, vector<1x1x32xf32>
    %281 = vector.shape_cast %280 : vector<1x1x32xf32> to vector<1x32xf32>
    %282 = vector.broadcast %281 : vector<1x32xf32> to vector<16x32xf32>
    %283 = arith.addf %279, %282 : vector<16x32xf32>
    %c1_129 = arith.constant 1 : index
    %c0_130 = arith.constant 0 : index
    %c0_131 = arith.constant 0 : index
    %284 = vector.load %arg7[%c1_129, %c0_130, %c0_131] : memref<2x32x32xf32, #tpu.memory_space<vmem>>, vector<1x32x32xf32>
    %285 = vector.shape_cast %284 : vector<1x32x32xf32> to vector<32x32xf32>
    %cst_132 = arith.constant dense<0.000000e+00> : vector<16x32xf32>
    %286 = tpu.matmul %268, %285, %cst_132 {dimension_numbers = #tpu.dot_dimension_numbers<[1], [0], [0], [1], [0, 0, 1, 1], [], []>} : vector<16x32xf32>, vector<32x32xf32>, vector<16x32xf32> -> vector<16x32xf32>
    %c1_133 = arith.constant 1 : index
    %c0_134 = arith.constant 0 : index
    %c0_135 = arith.constant 0 : index
    %287 = vector.load %arg8[%c1_133, %c0_134, %c0_135] : memref<2x1x32xf32, #tpu.memory_space<vmem>>, vector<1x1x32xf32>
    %288 = vector.shape_cast %287 : vector<1x1x32xf32> to vector<1x32xf32>
    %289 = vector.broadcast %288 : vector<1x32xf32> to vector<16x32xf32>
    %290 = arith.addf %286, %289 : vector<16x32xf32>
    %c1_136 = arith.constant 1 : index
    %c0_137 = arith.constant 0 : index
    %c0_138 = arith.constant 0 : index
    %291 = vector.load %arg9[%c1_136, %c0_137, %c0_138] : memref<2x32x32xf32, #tpu.memory_space<vmem>>, vector<1x32x32xf32>
    %292 = vector.shape_cast %291 : vector<1x32x32xf32> to vector<32x32xf32>
    %293 = vector.extract_strided_slice %276 {offsets = [0, 0], sizes = [8, 32], strides = [1, 1]} : vector<16x32xf32> to vector<8x32xf32>
    %294 = vector.extract_strided_slice %283 {offsets = [0, 0], sizes = [8, 32], strides = [1, 1]} : vector<16x32xf32> to vector<8x32xf32>
    %295 = vector.extract_strided_slice %290 {offsets = [0, 0], sizes = [8, 32], strides = [1, 1]} : vector<16x32xf32> to vector<8x32xf32>
    %cst_139 = arith.constant 0.000000e+00 : f32
    %296 = vector.broadcast %cst_139 : f32 to vector<8x32xf32>
    %297 = vector.extract_strided_slice %293 {offsets = [0, 0], sizes = [8, 8], strides = [1, 1]} : vector<8x32xf32> to vector<8x8xf32>
    %298 = vector.extract_strided_slice %294 {offsets = [0, 0], sizes = [8, 8], strides = [1, 1]} : vector<8x32xf32> to vector<8x8xf32>
    %299 = vector.extract_strided_slice %295 {offsets = [0, 0], sizes = [8, 8], strides = [1, 1]} : vector<8x32xf32> to vector<8x8xf32>
    %cst_140 = arith.constant dense<0.000000e+00> : vector<8x8xf32>
    %300 = tpu.matmul %297, %298, %cst_140 {dimension_numbers = #tpu.dot_dimension_numbers<[1], [1], [0], [0], [0, 0, 1, 0], [], []>} : vector<8x8xf32>, vector<8x8xf32>, vector<8x8xf32> -> vector<8x8xf32>
    %cst_141 = arith.constant 0.353553385 : f32
    %301 = vector.broadcast %cst_141 : f32 to vector<8x8xf32>
    %302 = arith.mulf %300, %301 : vector<8x8xf32>
    %cst_142 = arith.constant dense<0xFF800000> : vector<8xf32>
    %303 = vector.multi_reduction <maximumf>, %302, %cst_142 [1] : vector<8x8xf32> to vector<8xf32>
    %304 = vector.shape_cast %303 : vector<8xf32> to vector<8x1xf32>
    %305 = vector.broadcast %304 : vector<8x1xf32> to vector<8x8xf32>
    %306 = arith.subf %302, %305 : vector<8x8xf32>
    %307 = math.exp %306 : vector<8x8xf32>
    %cst_143 = arith.constant dense<0.000000e+00> : vector<8xf32>
    %308 = vector.multi_reduction <add>, %307, %cst_143 [1] : vector<8x8xf32> to vector<8xf32>
    %309 = vector.shape_cast %308 : vector<8xf32> to vector<8x1xf32>
    %310 = tpu.reciprocal %309 {approx = true} : vector<8x1xf32> -> vector<8x1xf32>
    %311 = vector.broadcast %310 : vector<8x1xf32> to vector<8x8xf32>
    %312 = arith.mulf %307, %311 : vector<8x8xf32>
    %cst_144 = arith.constant dense<0.000000e+00> : vector<8x8xf32>
    %313 = tpu.matmul %312, %299, %cst_144 {dimension_numbers = #tpu.dot_dimension_numbers<[1], [0], [0], [1], [0, 0, 1, 1], [], []>} : vector<8x8xf32>, vector<8x8xf32>, vector<8x8xf32> -> vector<8x8xf32>
    %314 = vector.extract_strided_slice %292 {offsets = [0, 0], sizes = [8, 32], strides = [1, 1]} : vector<32x32xf32> to vector<8x32xf32>
    %cst_145 = arith.constant dense<0.000000e+00> : vector<8x32xf32>
    %315 = tpu.matmul %313, %314, %cst_145 {dimension_numbers = #tpu.dot_dimension_numbers<[1], [0], [0], [1], [0, 0, 1, 1], [], []>} : vector<8x8xf32>, vector<8x32xf32>, vector<8x32xf32> -> vector<8x32xf32>
    %316 = arith.addf %296, %315 : vector<8x32xf32>
    %317 = vector.extract_strided_slice %293 {offsets = [0, 8], sizes = [8, 8], strides = [1, 1]} : vector<8x32xf32> to vector<8x8xf32>
    %318 = vector.extract_strided_slice %294 {offsets = [0, 8], sizes = [8, 8], strides = [1, 1]} : vector<8x32xf32> to vector<8x8xf32>
    %319 = vector.extract_strided_slice %295 {offsets = [0, 8], sizes = [8, 8], strides = [1, 1]} : vector<8x32xf32> to vector<8x8xf32>
    %cst_146 = arith.constant dense<0.000000e+00> : vector<8x8xf32>
    %320 = tpu.matmul %317, %318, %cst_146 {dimension_numbers = #tpu.dot_dimension_numbers<[1], [1], [0], [0], [0, 0, 1, 0], [], []>} : vector<8x8xf32>, vector<8x8xf32>, vector<8x8xf32> -> vector<8x8xf32>
    %cst_147 = arith.constant 0.353553385 : f32
    %321 = vector.broadcast %cst_147 : f32 to vector<8x8xf32>
    %322 = arith.mulf %320, %321 : vector<8x8xf32>
    %cst_148 = arith.constant dense<0xFF800000> : vector<8xf32>
    %323 = vector.multi_reduction <maximumf>, %322, %cst_148 [1] : vector<8x8xf32> to vector<8xf32>
    %324 = vector.shape_cast %323 : vector<8xf32> to vector<8x1xf32>
    %325 = vector.broadcast %324 : vector<8x1xf32> to vector<8x8xf32>
    %326 = arith.subf %322, %325 : vector<8x8xf32>
    %327 = math.exp %326 : vector<8x8xf32>
    %cst_149 = arith.constant dense<0.000000e+00> : vector<8xf32>
    %328 = vector.multi_reduction <add>, %327, %cst_149 [1] : vector<8x8xf32> to vector<8xf32>
    %329 = vector.shape_cast %328 : vector<8xf32> to vector<8x1xf32>
    %330 = tpu.reciprocal %329 {approx = true} : vector<8x1xf32> -> vector<8x1xf32>
    %331 = vector.broadcast %330 : vector<8x1xf32> to vector<8x8xf32>
    %332 = arith.mulf %327, %331 : vector<8x8xf32>
    %cst_150 = arith.constant dense<0.000000e+00> : vector<8x8xf32>
    %333 = tpu.matmul %332, %319, %cst_150 {dimension_numbers = #tpu.dot_dimension_numbers<[1], [0], [0], [1], [0, 0, 1, 1], [], []>} : vector<8x8xf32>, vector<8x8xf32>, vector<8x8xf32> -> vector<8x8xf32>
    %334 = vector.extract_strided_slice %292 {offsets = [8, 0], sizes = [8, 32], strides = [1, 1]} : vector<32x32xf32> to vector<8x32xf32>
    %cst_151 = arith.constant dense<0.000000e+00> : vector<8x32xf32>
    %335 = tpu.matmul %333, %334, %cst_151 {dimension_numbers = #tpu.dot_dimension_numbers<[1], [0], [0], [1], [0, 0, 1, 1], [], []>} : vector<8x8xf32>, vector<8x32xf32>, vector<8x32xf32> -> vector<8x32xf32>
    %336 = arith.addf %316, %335 : vector<8x32xf32>
    %337 = vector.extract_strided_slice %293 {offsets = [0, 16], sizes = [8, 8], strides = [1, 1]} : vector<8x32xf32> to vector<8x8xf32>
    %338 = vector.extract_strided_slice %294 {offsets = [0, 16], sizes = [8, 8], strides = [1, 1]} : vector<8x32xf32> to vector<8x8xf32>
    %339 = vector.extract_strided_slice %295 {offsets = [0, 16], sizes = [8, 8], strides = [1, 1]} : vector<8x32xf32> to vector<8x8xf32>
    %cst_152 = arith.constant dense<0.000000e+00> : vector<8x8xf32>
    %340 = tpu.matmul %337, %338, %cst_152 {dimension_numbers = #tpu.dot_dimension_numbers<[1], [1], [0], [0], [0, 0, 1, 0], [], []>} : vector<8x8xf32>, vector<8x8xf32>, vector<8x8xf32> -> vector<8x8xf32>
    %cst_153 = arith.constant 0.353553385 : f32
    %341 = vector.broadcast %cst_153 : f32 to vector<8x8xf32>
    %342 = arith.mulf %340, %341 : vector<8x8xf32>
    %cst_154 = arith.constant dense<0xFF800000> : vector<8xf32>
    %343 = vector.multi_reduction <maximumf>, %342, %cst_154 [1] : vector<8x8xf32> to vector<8xf32>
    %344 = vector.shape_cast %343 : vector<8xf32> to vector<8x1xf32>
    %345 = vector.broadcast %344 : vector<8x1xf32> to vector<8x8xf32>
    %346 = arith.subf %342, %345 : vector<8x8xf32>
    %347 = math.exp %346 : vector<8x8xf32>
    %cst_155 = arith.constant dense<0.000000e+00> : vector<8xf32>
    %348 = vector.multi_reduction <add>, %347, %cst_155 [1] : vector<8x8xf32> to vector<8xf32>
    %349 = vector.shape_cast %348 : vector<8xf32> to vector<8x1xf32>
    %350 = tpu.reciprocal %349 {approx = true} : vector<8x1xf32> -> vector<8x1xf32>
    %351 = vector.broadcast %350 : vector<8x1xf32> to vector<8x8xf32>
    %352 = arith.mulf %347, %351 : vector<8x8xf32>
    %cst_156 = arith.constant dense<0.000000e+00> : vector<8x8xf32>
    %353 = tpu.matmul %352, %339, %cst_156 {dimension_numbers = #tpu.dot_dimension_numbers<[1], [0], [0], [1], [0, 0, 1, 1], [], []>} : vector<8x8xf32>, vector<8x8xf32>, vector<8x8xf32> -> vector<8x8xf32>
    %354 = vector.extract_strided_slice %292 {offsets = [16, 0], sizes = [8, 32], strides = [1, 1]} : vector<32x32xf32> to vector<8x32xf32>
    %cst_157 = arith.constant dense<0.000000e+00> : vector<8x32xf32>
    %355 = tpu.matmul %353, %354, %cst_157 {dimension_numbers = #tpu.dot_dimension_numbers<[1], [0], [0], [1], [0, 0, 1, 1], [], []>} : vector<8x8xf32>, vector<8x32xf32>, vector<8x32xf32> -> vector<8x32xf32>
    %356 = arith.addf %336, %355 : vector<8x32xf32>
    %357 = vector.extract_strided_slice %293 {offsets = [0, 24], sizes = [8, 8], strides = [1, 1]} : vector<8x32xf32> to vector<8x8xf32>
    %358 = vector.extract_strided_slice %294 {offsets = [0, 24], sizes = [8, 8], strides = [1, 1]} : vector<8x32xf32> to vector<8x8xf32>
    %359 = vector.extract_strided_slice %295 {offsets = [0, 24], sizes = [8, 8], strides = [1, 1]} : vector<8x32xf32> to vector<8x8xf32>
    %cst_158 = arith.constant dense<0.000000e+00> : vector<8x8xf32>
    %360 = tpu.matmul %357, %358, %cst_158 {dimension_numbers = #tpu.dot_dimension_numbers<[1], [1], [0], [0], [0, 0, 1, 0], [], []>} : vector<8x8xf32>, vector<8x8xf32>, vector<8x8xf32> -> vector<8x8xf32>
    %cst_159 = arith.constant 0.353553385 : f32
    %361 = vector.broadcast %cst_159 : f32 to vector<8x8xf32>
    %362 = arith.mulf %360, %361 : vector<8x8xf32>
    %cst_160 = arith.constant dense<0xFF800000> : vector<8xf32>
    %363 = vector.multi_reduction <maximumf>, %362, %cst_160 [1] : vector<8x8xf32> to vector<8xf32>
    %364 = vector.shape_cast %363 : vector<8xf32> to vector<8x1xf32>
    %365 = vector.broadcast %364 : vector<8x1xf32> to vector<8x8xf32>
    %366 = arith.subf %362, %365 : vector<8x8xf32>
    %367 = math.exp %366 : vector<8x8xf32>
    %cst_161 = arith.constant dense<0.000000e+00> : vector<8xf32>
    %368 = vector.multi_reduction <add>, %367, %cst_161 [1] : vector<8x8xf32> to vector<8xf32>
    %369 = vector.shape_cast %368 : vector<8xf32> to vector<8x1xf32>
    %370 = tpu.reciprocal %369 {approx = true} : vector<8x1xf32> -> vector<8x1xf32>
    %371 = vector.broadcast %370 : vector<8x1xf32> to vector<8x8xf32>
    %372 = arith.mulf %367, %371 : vector<8x8xf32>
    %cst_162 = arith.constant dense<0.000000e+00> : vector<8x8xf32>
    %373 = tpu.matmul %372, %359, %cst_162 {dimension_numbers = #tpu.dot_dimension_numbers<[1], [0], [0], [1], [0, 0, 1, 1], [], []>} : vector<8x8xf32>, vector<8x8xf32>, vector<8x8xf32> -> vector<8x8xf32>
    %374 = vector.extract_strided_slice %292 {offsets = [24, 0], sizes = [8, 32], strides = [1, 1]} : vector<32x32xf32> to vector<8x32xf32>
    %cst_163 = arith.constant dense<0.000000e+00> : vector<8x32xf32>
    %375 = tpu.matmul %373, %374, %cst_163 {dimension_numbers = #tpu.dot_dimension_numbers<[1], [0], [0], [1], [0, 0, 1, 1], [], []>} : vector<8x8xf32>, vector<8x32xf32>, vector<8x32xf32> -> vector<8x32xf32>
    %376 = arith.addf %356, %375 : vector<8x32xf32>
    %377 = vector.extract_strided_slice %276 {offsets = [8, 0], sizes = [8, 32], strides = [1, 1]} : vector<16x32xf32> to vector<8x32xf32>
    %378 = vector.extract_strided_slice %283 {offsets = [8, 0], sizes = [8, 32], strides = [1, 1]} : vector<16x32xf32> to vector<8x32xf32>
    %379 = vector.extract_strided_slice %290 {offsets = [8, 0], sizes = [8, 32], strides = [1, 1]} : vector<16x32xf32> to vector<8x32xf32>
    %cst_164 = arith.constant 0.000000e+00 : f32
    %380 = vector.broadcast %cst_164 : f32 to vector<8x32xf32>
    %381 = vector.extract_strided_slice %377 {offsets = [0, 0], sizes = [8, 8], strides = [1, 1]} : vector<8x32xf32> to vector<8x8xf32>
    %382 = vector.extract_strided_slice %378 {offsets = [0, 0], sizes = [8, 8], strides = [1, 1]} : vector<8x32xf32> to vector<8x8xf32>
    %383 = vector.extract_strided_slice %379 {offsets = [0, 0], sizes = [8, 8], strides = [1, 1]} : vector<8x32xf32> to vector<8x8xf32>
    %cst_165 = arith.constant dense<0.000000e+00> : vector<8x8xf32>
    %384 = tpu.matmul %381, %382, %cst_165 {dimension_numbers = #tpu.dot_dimension_numbers<[1], [1], [0], [0], [0, 0, 1, 0], [], []>} : vector<8x8xf32>, vector<8x8xf32>, vector<8x8xf32> -> vector<8x8xf32>
    %cst_166 = arith.constant 0.353553385 : f32
    %385 = vector.broadcast %cst_166 : f32 to vector<8x8xf32>
    %386 = arith.mulf %384, %385 : vector<8x8xf32>
    %cst_167 = arith.constant dense<0xFF800000> : vector<8xf32>
    %387 = vector.multi_reduction <maximumf>, %386, %cst_167 [1] : vector<8x8xf32> to vector<8xf32>
    %388 = vector.shape_cast %387 : vector<8xf32> to vector<8x1xf32>
    %389 = vector.broadcast %388 : vector<8x1xf32> to vector<8x8xf32>
    %390 = arith.subf %386, %389 : vector<8x8xf32>
    %391 = math.exp %390 : vector<8x8xf32>
    %cst_168 = arith.constant dense<0.000000e+00> : vector<8xf32>
    %392 = vector.multi_reduction <add>, %391, %cst_168 [1] : vector<8x8xf32> to vector<8xf32>
    %393 = vector.shape_cast %392 : vector<8xf32> to vector<8x1xf32>
    %394 = tpu.reciprocal %393 {approx = true} : vector<8x1xf32> -> vector<8x1xf32>
    %395 = vector.broadcast %394 : vector<8x1xf32> to vector<8x8xf32>
    %396 = arith.mulf %391, %395 : vector<8x8xf32>
    %cst_169 = arith.constant dense<0.000000e+00> : vector<8x8xf32>
    %397 = tpu.matmul %396, %383, %cst_169 {dimension_numbers = #tpu.dot_dimension_numbers<[1], [0], [0], [1], [0, 0, 1, 1], [], []>} : vector<8x8xf32>, vector<8x8xf32>, vector<8x8xf32> -> vector<8x8xf32>
    %398 = vector.extract_strided_slice %292 {offsets = [0, 0], sizes = [8, 32], strides = [1, 1]} : vector<32x32xf32> to vector<8x32xf32>
    %cst_170 = arith.constant dense<0.000000e+00> : vector<8x32xf32>
    %399 = tpu.matmul %397, %398, %cst_170 {dimension_numbers = #tpu.dot_dimension_numbers<[1], [0], [0], [1], [0, 0, 1, 1], [], []>} : vector<8x8xf32>, vector<8x32xf32>, vector<8x32xf32> -> vector<8x32xf32>
    %400 = arith.addf %380, %399 : vector<8x32xf32>
    %401 = vector.extract_strided_slice %377 {offsets = [0, 8], sizes = [8, 8], strides = [1, 1]} : vector<8x32xf32> to vector<8x8xf32>
    %402 = vector.extract_strided_slice %378 {offsets = [0, 8], sizes = [8, 8], strides = [1, 1]} : vector<8x32xf32> to vector<8x8xf32>
    %403 = vector.extract_strided_slice %379 {offsets = [0, 8], sizes = [8, 8], strides = [1, 1]} : vector<8x32xf32> to vector<8x8xf32>
    %cst_171 = arith.constant dense<0.000000e+00> : vector<8x8xf32>
    %404 = tpu.matmul %401, %402, %cst_171 {dimension_numbers = #tpu.dot_dimension_numbers<[1], [1], [0], [0], [0, 0, 1, 0], [], []>} : vector<8x8xf32>, vector<8x8xf32>, vector<8x8xf32> -> vector<8x8xf32>
    %cst_172 = arith.constant 0.353553385 : f32
    %405 = vector.broadcast %cst_172 : f32 to vector<8x8xf32>
    %406 = arith.mulf %404, %405 : vector<8x8xf32>
    %cst_173 = arith.constant dense<0xFF800000> : vector<8xf32>
    %407 = vector.multi_reduction <maximumf>, %406, %cst_173 [1] : vector<8x8xf32> to vector<8xf32>
    %408 = vector.shape_cast %407 : vector<8xf32> to vector<8x1xf32>
    %409 = vector.broadcast %408 : vector<8x1xf32> to vector<8x8xf32>
    %410 = arith.subf %406, %409 : vector<8x8xf32>
    %411 = math.exp %410 : vector<8x8xf32>
    %cst_174 = arith.constant dense<0.000000e+00> : vector<8xf32>
    %412 = vector.multi_reduction <add>, %411, %cst_174 [1] : vector<8x8xf32> to vector<8xf32>
    %413 = vector.shape_cast %412 : vector<8xf32> to vector<8x1xf32>
    %414 = tpu.reciprocal %413 {approx = true} : vector<8x1xf32> -> vector<8x1xf32>
    %415 = vector.broadcast %414 : vector<8x1xf32> to vector<8x8xf32>
    %416 = arith.mulf %411, %415 : vector<8x8xf32>
    %cst_175 = arith.constant dense<0.000000e+00> : vector<8x8xf32>
    %417 = tpu.matmul %416, %403, %cst_175 {dimension_numbers = #tpu.dot_dimension_numbers<[1], [0], [0], [1], [0, 0, 1, 1], [], []>} : vector<8x8xf32>, vector<8x8xf32>, vector<8x8xf32> -> vector<8x8xf32>
    %418 = vector.extract_strided_slice %292 {offsets = [8, 0], sizes = [8, 32], strides = [1, 1]} : vector<32x32xf32> to vector<8x32xf32>
    %cst_176 = arith.constant dense<0.000000e+00> : vector<8x32xf32>
    %419 = tpu.matmul %417, %418, %cst_176 {dimension_numbers = #tpu.dot_dimension_numbers<[1], [0], [0], [1], [0, 0, 1, 1], [], []>} : vector<8x8xf32>, vector<8x32xf32>, vector<8x32xf32> -> vector<8x32xf32>
    %420 = arith.addf %400, %419 : vector<8x32xf32>
    %421 = vector.extract_strided_slice %377 {offsets = [0, 16], sizes = [8, 8], strides = [1, 1]} : vector<8x32xf32> to vector<8x8xf32>
    %422 = vector.extract_strided_slice %378 {offsets = [0, 16], sizes = [8, 8], strides = [1, 1]} : vector<8x32xf32> to vector<8x8xf32>
    %423 = vector.extract_strided_slice %379 {offsets = [0, 16], sizes = [8, 8], strides = [1, 1]} : vector<8x32xf32> to vector<8x8xf32>
    %cst_177 = arith.constant dense<0.000000e+00> : vector<8x8xf32>
    %424 = tpu.matmul %421, %422, %cst_177 {dimension_numbers = #tpu.dot_dimension_numbers<[1], [1], [0], [0], [0, 0, 1, 0], [], []>} : vector<8x8xf32>, vector<8x8xf32>, vector<8x8xf32> -> vector<8x8xf32>
    %cst_178 = arith.constant 0.353553385 : f32
    %425 = vector.broadcast %cst_178 : f32 to vector<8x8xf32>
    %426 = arith.mulf %424, %425 : vector<8x8xf32>
    %cst_179 = arith.constant dense<0xFF800000> : vector<8xf32>
    %427 = vector.multi_reduction <maximumf>, %426, %cst_179 [1] : vector<8x8xf32> to vector<8xf32>
    %428 = vector.shape_cast %427 : vector<8xf32> to vector<8x1xf32>
    %429 = vector.broadcast %428 : vector<8x1xf32> to vector<8x8xf32>
    %430 = arith.subf %426, %429 : vector<8x8xf32>
    %431 = math.exp %430 : vector<8x8xf32>
    %cst_180 = arith.constant dense<0.000000e+00> : vector<8xf32>
    %432 = vector.multi_reduction <add>, %431, %cst_180 [1] : vector<8x8xf32> to vector<8xf32>
    %433 = vector.shape_cast %432 : vector<8xf32> to vector<8x1xf32>
    %434 = tpu.reciprocal %433 {approx = true} : vector<8x1xf32> -> vector<8x1xf32>
    %435 = vector.broadcast %434 : vector<8x1xf32> to vector<8x8xf32>
    %436 = arith.mulf %431, %435 : vector<8x8xf32>
    %cst_181 = arith.constant dense<0.000000e+00> : vector<8x8xf32>
    %437 = tpu.matmul %436, %423, %cst_181 {dimension_numbers = #tpu.dot_dimension_numbers<[1], [0], [0], [1], [0, 0, 1, 1], [], []>} : vector<8x8xf32>, vector<8x8xf32>, vector<8x8xf32> -> vector<8x8xf32>
    %438 = vector.extract_strided_slice %292 {offsets = [16, 0], sizes = [8, 32], strides = [1, 1]} : vector<32x32xf32> to vector<8x32xf32>
    %cst_182 = arith.constant dense<0.000000e+00> : vector<8x32xf32>
    %439 = tpu.matmul %437, %438, %cst_182 {dimension_numbers = #tpu.dot_dimension_numbers<[1], [0], [0], [1], [0, 0, 1, 1], [], []>} : vector<8x8xf32>, vector<8x32xf32>, vector<8x32xf32> -> vector<8x32xf32>
    %440 = arith.addf %420, %439 : vector<8x32xf32>
    %441 = vector.extract_strided_slice %377 {offsets = [0, 24], sizes = [8, 8], strides = [1, 1]} : vector<8x32xf32> to vector<8x8xf32>
    %442 = vector.extract_strided_slice %378 {offsets = [0, 24], sizes = [8, 8], strides = [1, 1]} : vector<8x32xf32> to vector<8x8xf32>
    %443 = vector.extract_strided_slice %379 {offsets = [0, 24], sizes = [8, 8], strides = [1, 1]} : vector<8x32xf32> to vector<8x8xf32>
    %cst_183 = arith.constant dense<0.000000e+00> : vector<8x8xf32>
    %444 = tpu.matmul %441, %442, %cst_183 {dimension_numbers = #tpu.dot_dimension_numbers<[1], [1], [0], [0], [0, 0, 1, 0], [], []>} : vector<8x8xf32>, vector<8x8xf32>, vector<8x8xf32> -> vector<8x8xf32>
    %cst_184 = arith.constant 0.353553385 : f32
    %445 = vector.broadcast %cst_184 : f32 to vector<8x8xf32>
    %446 = arith.mulf %444, %445 : vector<8x8xf32>
    %cst_185 = arith.constant dense<0xFF800000> : vector<8xf32>
    %447 = vector.multi_reduction <maximumf>, %446, %cst_185 [1] : vector<8x8xf32> to vector<8xf32>
    %448 = vector.shape_cast %447 : vector<8xf32> to vector<8x1xf32>
    %449 = vector.broadcast %448 : vector<8x1xf32> to vector<8x8xf32>
    %450 = arith.subf %446, %449 : vector<8x8xf32>
    %451 = math.exp %450 : vector<8x8xf32>
    %cst_186 = arith.constant dense<0.000000e+00> : vector<8xf32>
    %452 = vector.multi_reduction <add>, %451, %cst_186 [1] : vector<8x8xf32> to vector<8xf32>
    %453 = vector.shape_cast %452 : vector<8xf32> to vector<8x1xf32>
    %454 = tpu.reciprocal %453 {approx = true} : vector<8x1xf32> -> vector<8x1xf32>
    %455 = vector.broadcast %454 : vector<8x1xf32> to vector<8x8xf32>
    %456 = arith.mulf %451, %455 : vector<8x8xf32>
    %cst_187 = arith.constant dense<0.000000e+00> : vector<8x8xf32>
    %457 = tpu.matmul %456, %443, %cst_187 {dimension_numbers = #tpu.dot_dimension_numbers<[1], [0], [0], [1], [0, 0, 1, 1], [], []>} : vector<8x8xf32>, vector<8x8xf32>, vector<8x8xf32> -> vector<8x8xf32>
    %458 = vector.extract_strided_slice %292 {offsets = [24, 0], sizes = [8, 32], strides = [1, 1]} : vector<32x32xf32> to vector<8x32xf32>
    %cst_188 = arith.constant dense<0.000000e+00> : vector<8x32xf32>
    %459 = tpu.matmul %457, %458, %cst_188 {dimension_numbers = #tpu.dot_dimension_numbers<[1], [0], [0], [1], [0, 0, 1, 1], [], []>} : vector<8x8xf32>, vector<8x32xf32>, vector<8x32xf32> -> vector<8x32xf32>
    %460 = arith.addf %440, %459 : vector<8x32xf32>
    %461 = tpu.concatenate %376, %460 in 0 : vector<8x32xf32>, vector<8x32xf32> -> vector<16x32xf32>
    %c1_189 = arith.constant 1 : index
    %c0_190 = arith.constant 0 : index
    %c0_191 = arith.constant 0 : index
    %462 = vector.load %arg10[%c1_189, %c0_190, %c0_191] : memref<2x1x32xf32, #tpu.memory_space<vmem>>, vector<1x1x32xf32>
    %463 = vector.shape_cast %462 : vector<1x1x32xf32> to vector<1x32xf32>
    %464 = vector.broadcast %463 : vector<1x32xf32> to vector<16x32xf32>
    %465 = arith.addf %461, %464 : vector<16x32xf32>
    %466 = arith.addf %268, %465 : vector<16x32xf32>
    %c1_192 = arith.constant 1 : index
    %c0_193 = arith.constant 0 : index
    %c0_194 = arith.constant 0 : index
    %467 = vector.load %arg11[%c1_192, %c0_193, %c0_194] : memref<2x1x32xf32, #tpu.memory_space<vmem>>, vector<1x1x32xf32>
    %468 = vector.shape_cast %467 : vector<1x1x32xf32> to vector<1x32xf32>
    %c1_195 = arith.constant 1 : index
    %c0_196 = arith.constant 0 : index
    %c0_197 = arith.constant 0 : index
    %469 = vector.load %arg12[%c1_195, %c0_196, %c0_197] : memref<2x1x32xf32, #tpu.memory_space<vmem>>, vector<1x1x32xf32>
    %470 = vector.shape_cast %469 : vector<1x1x32xf32> to vector<1x32xf32>
    %cst_198 = arith.constant dense<0.000000e+00> : vector<16xf32>
    %471 = vector.multi_reduction <add>, %466, %cst_198 [1] : vector<16x32xf32> to vector<16xf32>
    %472 = vector.shape_cast %471 : vector<16xf32> to vector<16x1xf32>
    %cst_199 = arith.constant 3.200000e+01 : f32
    %473 = vector.broadcast %cst_199 : f32 to vector<16x1xf32>
    %474 = arith.divf %472, %473 : vector<16x1xf32>
    %475 = vector.broadcast %474 : vector<16x1xf32> to vector<16x32xf32>
    %476 = arith.subf %466, %475 : vector<16x32xf32>
    %477 = arith.mulf %476, %476 : vector<16x32xf32>
    %cst_200 = arith.constant dense<0.000000e+00> : vector<16xf32>
    %478 = vector.multi_reduction <add>, %477, %cst_200 [1] : vector<16x32xf32> to vector<16xf32>
    %479 = vector.shape_cast %478 : vector<16xf32> to vector<16x1xf32>
    %cst_201 = arith.constant 3.200000e+01 : f32
    %480 = vector.broadcast %cst_201 : f32 to vector<16x1xf32>
    %481 = arith.divf %479, %480 : vector<16x1xf32>
    %482 = vector.broadcast %474 : vector<16x1xf32> to vector<16x32xf32>
    %483 = arith.subf %466, %482 : vector<16x32xf32>
    %cst_202 = arith.constant 9.99999974E-6 : f32
    %484 = vector.broadcast %cst_202 : f32 to vector<16x1xf32>
    %485 = arith.addf %481, %484 : vector<16x1xf32>
    %486 = math.rsqrt %485 : vector<16x1xf32>
    %487 = vector.broadcast %486 : vector<16x1xf32> to vector<16x32xf32>
    %488 = arith.mulf %483, %487 : vector<16x32xf32>
    %489 = vector.broadcast %468 : vector<1x32xf32> to vector<16x32xf32>
    %490 = arith.mulf %488, %489 : vector<16x32xf32>
    %491 = vector.broadcast %470 : vector<1x32xf32> to vector<16x32xf32>
    %492 = arith.addf %490, %491 : vector<16x32xf32>
    %c1_203 = arith.constant 1 : index
    %c0_204 = arith.constant 0 : index
    %c0_205 = arith.constant 0 : index
    %493 = vector.load %arg13[%c1_203, %c0_204, %c0_205] : memref<2x32x64xf32, #tpu.memory_space<vmem>>, vector<1x32x64xf32>
    %494 = vector.shape_cast %493 : vector<1x32x64xf32> to vector<32x64xf32>
    %cst_206 = arith.constant dense<0.000000e+00> : vector<16x64xf32>
    %495 = tpu.matmul %492, %494, %cst_206 {dimension_numbers = #tpu.dot_dimension_numbers<[1], [0], [0], [1], [0, 0, 1, 1], [], []>} : vector<16x32xf32>, vector<32x64xf32>, vector<16x64xf32> -> vector<16x64xf32>
    %c1_207 = arith.constant 1 : index
    %c0_208 = arith.constant 0 : index
    %c0_209 = arith.constant 0 : index
    %496 = vector.load %arg14[%c1_207, %c0_208, %c0_209] : memref<2x1x64xf32, #tpu.memory_space<vmem>>, vector<1x1x64xf32>
    %497 = vector.shape_cast %496 : vector<1x1x64xf32> to vector<1x64xf32>
    %498 = vector.broadcast %497 : vector<1x64xf32> to vector<16x64xf32>
    %499 = arith.addf %495, %498 : vector<16x64xf32>
    %cst_210 = arith.constant 0.000000e+00 : f32
    %500 = vector.broadcast %cst_210 : f32 to vector<16x64xf32>
    %501 = arith.maximumf %499, %500 : vector<16x64xf32>
    %c1_211 = arith.constant 1 : index
    %c0_212 = arith.constant 0 : index
    %c0_213 = arith.constant 0 : index
    %502 = vector.load %arg15[%c1_211, %c0_212, %c0_213] : memref<2x64x32xf32, #tpu.memory_space<vmem>>, vector<1x64x32xf32>
    %503 = vector.shape_cast %502 : vector<1x64x32xf32> to vector<64x32xf32>
    %cst_214 = arith.constant dense<0.000000e+00> : vector<16x32xf32>
    %504 = tpu.matmul %501, %503, %cst_214 {dimension_numbers = #tpu.dot_dimension_numbers<[1], [0], [0], [1], [0, 0, 1, 1], [], []>} : vector<16x64xf32>, vector<64x32xf32>, vector<16x32xf32> -> vector<16x32xf32>
    %c1_215 = arith.constant 1 : index
    %c0_216 = arith.constant 0 : index
    %c0_217 = arith.constant 0 : index
    %505 = vector.load %arg16[%c1_215, %c0_216, %c0_217] : memref<2x1x32xf32, #tpu.memory_space<vmem>>, vector<1x1x32xf32>
    %506 = vector.shape_cast %505 : vector<1x1x32xf32> to vector<1x32xf32>
    %507 = vector.broadcast %506 : vector<1x32xf32> to vector<16x32xf32>
    %508 = arith.addf %504, %507 : vector<16x32xf32>
    %509 = arith.addf %492, %508 : vector<16x32xf32>
    %c1_218 = arith.constant 1 : index
    %c0_219 = arith.constant 0 : index
    %c0_220 = arith.constant 0 : index
    %510 = vector.load %arg17[%c1_218, %c0_219, %c0_220] : memref<2x1x32xf32, #tpu.memory_space<vmem>>, vector<1x1x32xf32>
    %511 = vector.shape_cast %510 : vector<1x1x32xf32> to vector<1x32xf32>
    %c1_221 = arith.constant 1 : index
    %c0_222 = arith.constant 0 : index
    %c0_223 = arith.constant 0 : index
    %512 = vector.load %arg18[%c1_221, %c0_222, %c0_223] : memref<2x1x32xf32, #tpu.memory_space<vmem>>, vector<1x1x32xf32>
    %513 = vector.shape_cast %512 : vector<1x1x32xf32> to vector<1x32xf32>
    %cst_224 = arith.constant dense<0.000000e+00> : vector<16xf32>
    %514 = vector.multi_reduction <add>, %509, %cst_224 [1] : vector<16x32xf32> to vector<16xf32>
    %515 = vector.shape_cast %514 : vector<16xf32> to vector<16x1xf32>
    %cst_225 = arith.constant 3.200000e+01 : f32
    %516 = vector.broadcast %cst_225 : f32 to vector<16x1xf32>
    %517 = arith.divf %515, %516 : vector<16x1xf32>
    %518 = vector.broadcast %517 : vector<16x1xf32> to vector<16x32xf32>
    %519 = arith.subf %509, %518 : vector<16x32xf32>
    %520 = arith.mulf %519, %519 : vector<16x32xf32>
    %cst_226 = arith.constant dense<0.000000e+00> : vector<16xf32>
    %521 = vector.multi_reduction <add>, %520, %cst_226 [1] : vector<16x32xf32> to vector<16xf32>
    %522 = vector.shape_cast %521 : vector<16xf32> to vector<16x1xf32>
    %cst_227 = arith.constant 3.200000e+01 : f32
    %523 = vector.broadcast %cst_227 : f32 to vector<16x1xf32>
    %524 = arith.divf %522, %523 : vector<16x1xf32>
    %525 = vector.broadcast %517 : vector<16x1xf32> to vector<16x32xf32>
    %526 = arith.subf %509, %525 : vector<16x32xf32>
    %cst_228 = arith.constant 9.99999974E-6 : f32
    %527 = vector.broadcast %cst_228 : f32 to vector<16x1xf32>
    %528 = arith.addf %524, %527 : vector<16x1xf32>
    %529 = math.rsqrt %528 : vector<16x1xf32>
    %530 = vector.broadcast %529 : vector<16x1xf32> to vector<16x32xf32>
    %531 = arith.mulf %526, %530 : vector<16x32xf32>
    %532 = vector.broadcast %511 : vector<1x32xf32> to vector<16x32xf32>
    %533 = arith.mulf %531, %532 : vector<16x32xf32>
    %534 = vector.broadcast %513 : vector<1x32xf32> to vector<16x32xf32>
    %535 = arith.addf %533, %534 : vector<16x32xf32>
    %c0_229 = arith.constant 0 : index
    %c0_230 = arith.constant 0 : index
    %536 = vector.load %arg19[%c0_229, %c0_230] : memref<16x32xf32, #tpu.memory_space<vmem>>, vector<16x32xf32>
    tpu.vector_store %arg19[%c0_229, %c0_230], %535 {strides = array<i32>} : memref<16x32xf32, #tpu.memory_space<vmem>>, vector<16x32xf32>,
    return
  }
  func.func @transform_0(%arg0: i32) -> (i32, i32) {
    %c0_i32 = arith.constant 0 : i32
    %c0_i32_0 = arith.constant 0 : i32
    %c0_i32_1 = arith.constant 0 : i32
    return %c0_i32, %c0_i32_0 : i32, i32
  }
  func.func @transform_1(%arg0: i32) -> (i32, i32) {
    %c0_i32 = arith.constant 0 : i32
    %c0_i32_0 = arith.constant 0 : i32
    %c0_i32_1 = arith.constant 0 : i32
    return %c0_i32, %c0_i32_0 : i32, i32
  }
  func.func @transform_2(%arg0: i32) -> (i32, i32, i32) {
    %c0_i32 = arith.constant 0 : i32
    %c0_i32_0 = arith.constant 0 : i32
    %c0_i32_1 = arith.constant 0 : i32
    %c0_i32_2 = arith.constant 0 : i32
    return %c0_i32, %c0_i32_0, %c0_i32_1 : i32, i32, i32
  }
  func.func @transform_3(%arg0: i32) -> (i32, i32, i32) {
    %c0_i32 = arith.constant 0 : i32
    %c0_i32_0 = arith.constant 0 : i32
    %c0_i32_1 = arith.constant 0 : i32
    %c0_i32_2 = arith.constant 0 : i32
    return %c0_i32, %c0_i32_0, %c0_i32_1 : i32, i32, i32
  }
  func.func @transform_4(%arg0: i32) -> (i32, i32, i32) {
    %c0_i32 = arith.constant 0 : i32
    %c0_i32_0 = arith.constant 0 : i32
    %c0_i32_1 = arith.constant 0 : i32
    %c0_i32_2 = arith.constant 0 : i32
    return %c0_i32, %c0_i32_0, %c0_i32_1 : i32, i32, i32
  }
  func.func @transform_5(%arg0: i32) -> (i32, i32, i32) {
    %c0_i32 = arith.constant 0 : i32
    %c0_i32_0 = arith.constant 0 : i32
    %c0_i32_1 = arith.constant 0 : i32
    %c0_i32_2 = arith.constant 0 : i32
    return %c0_i32, %c0_i32_0, %c0_i32_1 : i32, i32, i32
  }
  func.func @transform_6(%arg0: i32) -> (i32, i32, i32) {
    %c0_i32 = arith.constant 0 : i32
    %c0_i32_0 = arith.constant 0 : i32
    %c0_i32_1 = arith.constant 0 : i32
    %c0_i32_2 = arith.constant 0 : i32
    return %c0_i32, %c0_i32_0, %c0_i32_1 : i32, i32, i32
  }
  func.func @transform_7(%arg0: i32) -> (i32, i32, i32) {
    %c0_i32 = arith.constant 0 : i32
    %c0_i32_0 = arith.constant 0 : i32
    %c0_i32_1 = arith.constant 0 : i32
    %c0_i32_2 = arith.constant 0 : i32
    return %c0_i32, %c0_i32_0, %c0_i32_1 : i32, i32, i32
  }
  func.func @transform_8(%arg0: i32) -> (i32, i32, i32) {
    %c0_i32 = arith.constant 0 : i32
    %c0_i32_0 = arith.constant 0 : i32
    %c0_i32_1 = arith.constant 0 : i32
    %c0_i32_2 = arith.constant 0 : i32
    return %c0_i32, %c0_i32_0, %c0_i32_1 : i32, i32, i32
  }
  func.func @transform_9(%arg0: i32) -> (i32, i32, i32) {
    %c0_i32 = arith.constant 0 : i32
    %c0_i32_0 = arith.constant 0 : i32
    %c0_i32_1 = arith.constant 0 : i32
    %c0_i32_2 = arith.constant 0 : i32
    return %c0_i32, %c0_i32_0, %c0_i32_1 : i32, i32, i32
  }
  func.func @transform_10(%arg0: i32) -> (i32, i32, i32) {
    %c0_i32 = arith.constant 0 : i32
    %c0_i32_0 = arith.constant 0 : i32
    %c0_i32_1 = arith.constant 0 : i32
    %c0_i32_2 = arith.constant 0 : i32
    return %c0_i32, %c0_i32_0, %c0_i32_1 : i32, i32, i32
  }
  func.func @transform_11(%arg0: i32) -> (i32, i32, i32) {
    %c0_i32 = arith.constant 0 : i32
    %c0_i32_0 = arith.constant 0 : i32
    %c0_i32_1 = arith.constant 0 : i32
    %c0_i32_2 = arith.constant 0 : i32
    return %c0_i32, %c0_i32_0, %c0_i32_1 : i32, i32, i32
  }
  func.func @transform_12(%arg0: i32) -> (i32, i32, i32) {
    %c0_i32 = arith.constant 0 : i32
    %c0_i32_0 = arith.constant 0 : i32
    %c0_i32_1 = arith.constant 0 : i32
    %c0_i32_2 = arith.constant 0 : i32
    return %c0_i32, %c0_i32_0, %c0_i32_1 : i32, i32, i32
  }
  func.func @transform_13(%arg0: i32) -> (i32, i32, i32) {
    %c0_i32 = arith.constant 0 : i32
    %c0_i32_0 = arith.constant 0 : i32
    %c0_i32_1 = arith.constant 0 : i32
    %c0_i32_2 = arith.constant 0 : i32
    return %c0_i32, %c0_i32_0, %c0_i32_1 : i32, i32, i32
  }
  func.func @transform_14(%arg0: i32) -> (i32, i32, i32) {
    %c0_i32 = arith.constant 0 : i32
    %c0_i32_0 = arith.constant 0 : i32
    %c0_i32_1 = arith.constant 0 : i32
    %c0_i32_2 = arith.constant 0 : i32
    return %c0_i32, %c0_i32_0, %c0_i32_1 : i32, i32, i32
  }
  func.func @transform_15(%arg0: i32) -> (i32, i32, i32) {
    %c0_i32 = arith.constant 0 : i32
    %c0_i32_0 = arith.constant 0 : i32
    %c0_i32_1 = arith.constant 0 : i32
    %c0_i32_2 = arith.constant 0 : i32
    return %c0_i32, %c0_i32_0, %c0_i32_1 : i32, i32, i32
  }
  func.func @transform_16(%arg0: i32) -> (i32, i32, i32) {
    %c0_i32 = arith.constant 0 : i32
    %c0_i32_0 = arith.constant 0 : i32
    %c0_i32_1 = arith.constant 0 : i32
    %c0_i32_2 = arith.constant 0 : i32
    return %c0_i32, %c0_i32_0, %c0_i32_1 : i32, i32, i32
  }
  func.func @transform_17(%arg0: i32) -> (i32, i32, i32) {
    %c0_i32 = arith.constant 0 : i32
    %c0_i32_0 = arith.constant 0 : i32
    %c0_i32_1 = arith.constant 0 : i32
    %c0_i32_2 = arith.constant 0 : i32
    return %c0_i32, %c0_i32_0, %c0_i32_1 : i32, i32, i32
  }
  func.func @transform_18(%arg0: i32) -> (i32, i32) {
    %c0_i32 = arith.constant 0 : i32
    %c0_i32_0 = arith.constant 0 : i32
    %c0_i32_1 = arith.constant 0 : i32
    return %c0_i32, %c0_i32_0 : i32, i32
  }
}

</mosaic_0001>

<bundles_post_ra>
// kernel: tpu_custom_call.1
= control target key start
LH: loop header
LB: loop body
LE: loop exit
PB: predicated region body
PF: predicated region fallthrough
CT: control target
= control target key end

     0   :  { %s6906_s0 = inlined_call_operand.hbm [shape: f32[16,32], index: 0, kind: input, shape index: {}]   ;;  %s6907_s1 = inlined_call_operand.hbm [shape: f32[16,32], index: 1, kind: input, shape index: {}]   ;;  %s6908_s2 = inlined_call_operand.vmem [shape: f32[2,32,32], index: 2, kind: input, shape index: {}]   ;;  %s6909_s3 = inlined_call_operand.vmem [shape: f32[2,1,32], index: 3, kind: input, shape index: {}]   ;;  %s6910_s4 = inlined_call_operand.vmem [shape: f32[2,32,32], index: 4, kind: input, shape index: {}]   ;;  %s6911_s5 = inlined_call_operand.vmem [shape: f32[2,1,32], index: 5, kind: input, shape index: {}]   ;;  %s6912_s6 = inlined_call_operand.vmem [shape: f32[2,32,32], index: 6, kind: input, shape index: {}]   ;;  %s6913_s7 = inlined_call_operand.vmem [shape: f32[2,1,32], index: 7, kind: input, shape index: {}]   ;;  %s6914_s8 = inlined_call_operand.hbm [shape: f32[2,32,32], index: 8, kind: input, shape index: {}]   ;;  %s6915_s9 = inlined_call_operand.vmem [shape: f32[2,1,32], index: 9, kind: input, shape index: {}]   ;;  %s6916_s10 = inlined_call_operand.vmem [shape: f32[2,1,32], index: 10, kind: input, shape index: {}]   ;;  %s6917_s11 = inlined_call_operand.vmem [shape: f32[2,1,32], index: 11, kind: input, shape index: {}]   ;;  %s6918_s12 = inlined_call_operand.hbm [shape: f32[2,32,64], index: 12, kind: input, shape index: {}]   ;;  %s6919_s13 = inlined_call_operand.vmem [shape: f32[2,1,64], index: 13, kind: input, shape index: {}]   ;;  %s6920_s14 = inlined_call_operand.vmem [shape: f32[2,64,32], index: 14, kind: input, shape index: {}]   ;;  %s6921_s15 = inlined_call_operand.vmem [shape: f32[2,1,32], index: 15, kind: input, shape index: {}]   ;;  %s6922_s16 = inlined_call_operand.vmem [shape: f32[2,1,32], index: 16, kind: input, shape index: {}]   ;;  %s6923_s17 = inlined_call_operand.vmem [shape: f32[2,1,32], index: 17, kind: input, shape index: {}]   ;;  %s6924_s18 = inlined_call_operand.hbm [shape: f32[16,32], index: 18, kind: output, shape index: {}]  }
   0x1   :  { %6930 = sst [smem:[#allocation15_spill]] %s6906_s0 }
   0x2   :  { %6931 = sst [smem:[#allocation16_spill]] %s6907_s1 }
   0x3   :  { %6932 = sst [smem:[#allocation17_spill]] %s6908_s2 }
   0x4   :  { %6933 = sst [smem:[#allocation18_spill]] %s6923_s17 }
   0x5   :  { %6934 = sst [smem:[#allocation19_spill]] %s6924_s18 }
   0x6   :  { %23 = vsyncpa [#allocation3], 0 }
   0x7   :  { %24 = vsyncpa [#allocation6], 0 }
   0x8   :  { %25 = vsyncpa [#allocation9], 0 }
   0x9   :  { %26 = vsyncpa [#allocation4], 0  ;;  %s6080_s27 = smov [#allocation5]   ;;  %s6081_s29 = smov [#allocation2]  }
   0xa   :  { %s44_s28 = sshll.u32 %s6080_s27, 4  ;;  %s32_s30 = sshll.u32 %s6081_s29, 4  ;;  %s45_s28 = int_to_ptr.vmem [resolvable:$true] %s44_s28  ;;  %s6187_s30 = int_to_ptr.vmem [resolvable:$true] %s32_s30 }
   0xb   :  { %s6935_s1 = sld [smem:[#allocation16_spill]] }
  0x11   :  { %s5962_s20 = scalar_lea.hbm %s6935_s1, 256 }
  0x12   :  { %p5963_p0 = scmp.ne.s32.totalorder %s6935_s1, %s5962_s20  ;;  %p5966_p1 = scmp.lt.u32.totalorder %s5962_s20, %s6935_s1 }
  0x14   :  { %p5968_p2 = pnand %p5966_p1, %p5963_p0 }
  0x16   :  { %5971 = shalt.err (!%p5968_p2)
}
  0x17   :  { %s5972_s24 = scalar_lea.vmem %s45_s28, 256  ;;  %p5977_p4 = scmp.lt.s32.totalorder %s45_s28, %s45_s28 }
  0x18   :  { %p5973_p3 = scmp.ne.s32.totalorder %s45_s28, %s5972_s24  ;;  %p5978_p5 = scmp.lt.s32.totalorder %s5972_s24, %s5972_s24 }
  0x1a   :  { %p5979_p6 = por %p5978_p5, %p5977_p4 }
  0x1c   :  { %p5980_p7 = pnand %p5979_p6, %p5973_p3 }
  0x1e   :  { %5983 = shalt.err (!%p5980_p7)
}
  0x1f   :  { %s6082_s25 = smov 128   ;;  %s6083_s26 = smov 8  }
  0x20   :  { %50 = dma.hbm_to_vmem [thread:$0]  %s6935_s1, 256, %s45_s28, [#allocation6], %s6082_s25, %s6082_s25, %s6083_s26  }
  0x21   :  { %s6936_s20 = sld [smem:[#allocation15_spill]] }
  0x27   :  { %s5984_s21 = scalar_lea.hbm %s6936_s20, 256 }
  0x28   :  { %p5985_p8 = scmp.ne.s32.totalorder %s6936_s20, %s5984_s21  ;;  %p5988_p9 = scmp.lt.u32.totalorder %s5984_s21, %s6936_s20 }
  0x2a   :  { %p5990_p10 = pnand %p5988_p9, %p5985_p8 }
  0x2c   :  { %5993 = shalt.err (!%p5990_p10)
}
  0x2d   :  { %s5994_s18 = scalar_lea.vmem %s6187_s30, 256  ;;  %p5999_p12 = scmp.lt.s32.totalorder %s6187_s30, %s6187_s30 }
  0x2e   :  { %p5995_p11 = scmp.ne.s32.totalorder %s6187_s30, %s5994_s18  ;;  %p6000_p13 = scmp.lt.s32.totalorder %s5994_s18, %s5994_s18 }
  0x30   :  { %p6001_p0 = por %p6000_p13, %p5999_p12 }
  0x32   :  { %p6002_p1 = pnand %p6001_p0, %p5995_p11 }
  0x34   :  { %6005 = shalt.err (!%p6002_p1)
}
  0x35   :  { %38 = dma.hbm_to_vmem [thread:$0]  %s6936_s20, 256, %s6187_s30, [#allocation3], %s6082_s25, %s6082_s25, %s6083_s26  }
  0x36   :  { %s6084_s27 = smov [#allocation7]   ;;  %s6085_s0 = smov [#allocation8]  }
  0x37   :  { %s68_s29 = sshll.u32 %s6084_s27, 4  ;;  %s86_s19 = sshll.u32 %s6085_s0, 4  ;;  %s69_s29 = int_to_ptr.vmem [resolvable:$true] %s68_s29  ;;  %s6224_s19 = int_to_ptr.vmem [resolvable:$true] %s86_s19 }
  0x38   :  { %s6006_s22 = scalar_lea.hbm %s6914_s8, 1024 }
  0x39   :  { %p6007_p2 = scmp.ne.s32.totalorder %s6914_s8, %s6006_s22  ;;  %p6010_p3 = scmp.lt.u32.totalorder %s6006_s22, %s6914_s8 }
  0x3b   :  { %p6012_p4 = pnand %p6010_p3, %p6007_p2 }
  0x3d   :  { %6015 = shalt.err (!%p6012_p4)
}
  0x3e   :  { %s6016_s30 = scalar_lea.vmem %s69_s29, 1024  ;;  %p6021_p6 = scmp.lt.s32.totalorder %s69_s29, %s69_s29 }
  0x3f   :  { %p6017_p5 = scmp.ne.s32.totalorder %s69_s29, %s6016_s30  ;;  %p6022_p7 = scmp.lt.s32.totalorder %s6016_s30, %s6016_s30 }
  0x41   :  { %p6023_p8 = por %p6022_p7, %p6021_p6 }
  0x43   :  { %p6024_p9 = pnand %p6023_p8, %p6017_p5 }
  0x45   :  { %6027 = shalt.err (!%p6024_p9)
}
  0x46   :  { %74 = dma.hbm_to_vmem [thread:$0]  %s6914_s8, 1024, %s69_s29, [#allocation6], %s6082_s25, %s6082_s25, %s6083_s26  }
  0x47   :  { %s6028_s17 = scalar_lea.hbm %s6918_s12, 1024 }
  0x48   :  { %p6029_p10 = scmp.ne.s32.totalorder %s6918_s12, %s6028_s17  ;;  %p6032_p11 = scmp.lt.u32.totalorder %s6028_s17, %s6918_s12 }
  0x4a   :  { %p6034_p12 = pnand %p6032_p11, %p6029_p10 }
  0x4c   :  { %6037 = shalt.err (!%p6034_p12)
}
  0x4d   :  { %s6038_s2 = scalar_lea.vmem %s6224_s19, 1024  ;;  %p6043_p0 = scmp.lt.s32.totalorder %s6224_s19, %s6224_s19 }
  0x4e   :  { %p6039_p13 = scmp.ne.s32.totalorder %s6224_s19, %s6038_s2  ;;  %p6044_p1 = scmp.lt.s32.totalorder %s6038_s2, %s6038_s2 }
  0x50   :  { %p6045_p2 = por %p6044_p1, %p6043_p0 }
  0x52   :  { %p6046_p3 = pnand %p6045_p2, %p6039_p13 }
  0x54   :  { %6049 = shalt.err (!%p6046_p3)
}
  0x55   :  { %92 = dma.hbm_to_vmem [thread:$0]  %s6918_s12, 1024, %s6224_s19, [#allocation9], %s6082_s25, %s6082_s25, %s6083_s26  }
  0x56   :  { %6072 = dma.done.wait [#allocation3], 256  }
  0x57   :  { %6073 = vsyncadd [#allocation3], 4294967040 }
  0x58   :  { %6074 = dma.done.wait [#allocation6], 1280  }
  0x59   :  { %6075 = vsyncadd [#allocation6], 4294966016 }
  0x5a   :  { %6076 = dma.done.wait [#allocation9], 1024  }
  0x5b   :  { %6077 = vsyncadd [#allocation9], 4294966272  ;;  %v214_v0 = vld [vmem:[%s6910_s4] sm:$0xff]  ;;  %v215_v1 = vld [vmem:[%s6910_s4 + $0x8] sm:$0xff]  ;;  %s6937_s27 = sld [smem:[#allocation17_spill]]  ;;  %vm132_vm0 = vcmask 261120  }
  0x5c   :  { %v5782_v3 = vpack.c.bf16 %v215_v1, %v214_v0  ;;  %v216_v5 = vld [vmem:[%s6910_s4 + $0x10] sm:$0xff]  ;;  %v217_v6 = vld [vmem:[%s6910_s4 + $0x18] sm:$0xff]  ;;  %v6285_v11 = vld [vmem:[#allocation2] sm:$0xff]  ;;  %v6086_v24 = vmov 0.0   ;;  %vm6087_vm1 = vmmov 0   ;;  %vm396_vm2 = vcmask 64512  }
  0x5d   :  { %v5786_v8 = vpack.c.bf16 %v217_v6, %v216_v5  ;;  %v6287_v13 = vld [vmem:[#allocation5] sm:$0xff]  ;;  %v6289_v14 = vld [vmem:[#allocation2 + $0x8] sm:$0xff]  ;;  %v6293_v16 = vld [vmem:[#allocation5 + $0x8] sm:$0xff]  ;;  %s6088_s22 = smov 120   ;;  %s6089_s29 = smov 112   ;;  %vm2470_vm3 = vcmask 523264  }
  0x5e   :  { %5783 = vmatprep.subr.bf16.mxu1 %v5782_v3  ;;  %v119_v15 = vadd.f32 %v6287_v13, %v6285_v11  ;;  %v300_v17 = vld [vmem:[%s6912_s6] sm:$0xff]  ;;  %v301_v18 = vld [vmem:[%s6912_s6 + $0x8] sm:$0xff]  ;;  %v120_v20 = vadd.f32 %v6293_v16, %v6289_v14  ;;  %v302_v21 = vld [vmem:[%s6912_s6 + $0x10] sm:$0xff]  ;;  %s6090_s23 = smov 104   ;;  %s6938_s21 = sld [smem:[#allocation18_spill]] }
  0x5f   :  { %5785 = vmatpush3.bf16.msra.mxu1 %v5782_v3  ;;  %v5790_v19 = vpack.c.bf16 %v301_v18, %v300_v17  ;;  %v303_v22 = vld [vmem:[%s6912_s6 + $0x18] sm:$0xff]  ;;  %v5113_v25 = vld [vmem:[%s6911_s5] ss:$0 sm:$0xff]  ;;  %v6373_v63 = vld [vmem:[#allocation7 + $0x8] sm:$0xff] }
  0x60   :  { %5787 = vmatprep.subr.bf16.mxu1 %v5786_v8  ;;  %5427 = vmatprep.mubr.msk.f32.mxu1 %vm132_vm0, %v119_v15  ;;  %v5794_v23 = vpack.c.bf16 %v303_v22, %v302_v21  ;;  %v5110_v26 = vld [vmem:[%s6909_s3] ss:$0 sm:$0xff] }
  0x61   :  { %v121_v2 = vld [vmem:[%s6937_s27] sm:$0xff]  ;;  %v122_v4 = vld [vmem:[%s6937_s27 + $0x8] sm:$0xff]  ;;  %v123_v9 = vld [vmem:[%s6937_s27 + $0x10] sm:$0xff]  ;;  %5416 = vmatprep.mubr.msk.f32.mxu0 %vm132_vm0, %v119_v15 }
  0x62   :  { %v5774_v7 = vpack.c.bf16 %v122_v4, %v121_v2  ;;  %v124_v10 = vld [vmem:[%s6937_s27 + $0x18] sm:$0xff]  ;;  %v5116_v35 = vld [vmem:[%s6913_s7] ss:$0 sm:$0xff] }
  0x63   :  { %v5778_v12 = vpack.c.bf16 %v124_v10, %v123_v9  ;;  %5789 = vmatpush3.bf16.msra.mxu1 %v5786_v8  ;;  %v6378_v4 = vld [vmem:[#allocation7] sm:$0xff] }
  0x64   :  { %5775 = vmatprep.subr.bf16.mxu0 %v5774_v7  ;;  %5446 = vmatprep.subr.mxu1 %v6086_v24 }
  0x65   :  { %5777 = vmatpush3.bf16.msra.mxu0 %v5774_v7 }
  0x66   :  { %5779 = vmatprep.subr.bf16.mxu0 %v5778_v12  ;;  %5428 = vmatmul.mubr.msk.f32.vlgmr.msra.gmra.mrb[0].mxu1 %vm132_vm0, %v120_v20 }
  0x67   :  { %5448 = vmatprep.mubr.msk.f32.mxu1 %vm6087_vm1, %v6086_v24 }
  0x69   :  { %5781 = vmatpush3.bf16.msra.mxu0 %v5778_v12 }
  0x6a   :  { %5791 = vmatprep.subr.bf16.mxu0 %v5790_v19 }
  0x6c   :  { %5417 = vmatmul.mubr.msk.f32.vlgmr.msra.gmra.mrb[0].mxu0 %vm132_vm0, %v120_v20 }
  0x6d   :  { %5793 = vmatpush3.bf16.msra.mxu0 %v5790_v19  ;;  %5438 = vmatprep.mubr.msk.f32.mxu0 %vm132_vm0, %v6285_v11 }
  0x6e   :  { %5795 = vmatprep.subr.bf16.mxu0 %v5794_v23 }
  0x71   :  { %5797 = vmatpush3.bf16.msra.mxu0 %v5794_v23 }
  0x72   :  { %5441 = vmatprep.subr.mxu0 %v6086_v24 }
  0x74   :  { %5439 = vmatmul.mubr.msk.f32.vlgmr.msra.gmra.mrb[2].mxu0 %vm132_vm0, %v6289_v14 }
  0x75   :  { %5443 = vmatprep.mubr.msk.f32.mxu0 %vm6087_vm1, %v6086_v24 }
 0x139   :  { %v5429_v27 = vpop.f32.mrb[0].mxu1 }
 0x13a   :  { %v6329_v28 = vadd.f32 %v5429_v27, %v5113_v25  ;;  %v291_v29 = vpop.f32.mrb[1].mxu1 }
 0x13b   :  { %v292_v31 = vadd.f32 %v5113_v25, %v291_v29 }
 0x13d   :  { %560 = vrot.lane.b32.xlu0 %v292_v31, %s6088_s22  ;;  %5442 = vmatpush3.xpose.msk.msra.mxu0 %vm396_vm2, %v292_v31 }
 0x13e   :  { %5451 = vmatprep.subr.mxu0 %v6086_v24 }
 0x13f   :  { %v5418_v30 = vpop.f32.mrb[0].mxu0 }
 0x140   :  { %v6331_v32 = vadd.f32 %v5418_v30, %v5110_v26  ;;  %v205_v33 = vpop.f32.mrb[1].mxu0 }
 0x141   :  { %v6333_v34 = vadd.f32 %v5110_v26, %v205_v33  ;;  %v6405_v33 = vld [vmem:[#allocation7 + $0x10] sm:$0xff] }
 0x143   :  { %5444 = vmatmul.mubr.msk.f32.vlgmr.msra.gmra.mrb[4].mxu0 %vm396_vm2, %v6333_v34  ;;  %558 = vrot.lane.b32.xlu0 %v6333_v34, %s6088_s22 }
 0x144   :  { %5453 = vmatprep.mubr.msk.f32.mxu0 %vm6087_vm1, %v6086_v24 }
 0x147   :  { %v5440_v36 = vpop.f32.mrb[2].mxu0 }
 0x148   :  { %v6347_v37 = vadd.f32 %v5440_v36, %v5116_v35  ;;  %v383_v38 = vpop.f32.mrb[3].mxu0 }
 0x149   :  { %v6349_v39 = vadd.f32 %v5116_v35, %v383_v38 }
 0x14b   :  { %5447 = vmatpush3.msra.mxu1 %v6349_v39 }
 0x14c   :  { %5456 = vmatprep.subr.mxu1 %v6086_v24 }
 0x1af   :  { %v561_v40 = vpop.permute.xlu0 %560 }
 0x1b0   :  { %5452 = vmatpush3.xpose.msk.msra.mxu0 %vm396_vm2, %v561_v40 }
 0x1b1   :  { %5461 = vmatprep.subr.mxu0 %v6086_v24 }
 0x1b5   :  { %v559_v41 = vpop.permute.xlu0 %558 }
 0x1b6   :  { %5454 = vmatmul.mubr.msk.f32.vlgmr.msra.gmra.mrb[6].mxu0 %vm396_vm2, %v559_v41 }
 0x1b7   :  { %5463 = vmatprep.mubr.msk.f32.mxu0 %vm6087_vm1, %v6086_v24  ;;  %5462 = vmatpush3.msra.mxu0 %v6373_v63 }
 0x1b8   :  { %5471 = vmatprep.subr.mxu0 %v6086_v24 }
 0x216   :  { %v469_v42 = vpop.f32.mrb[4].mxu0 }
 0x217   :  { %v473_v43 = vmul.f32 0.35355338, %v469_v42  ;;  %v5445_v44 = vpop.f32.mrb[5].mxu0 }
 0x219   :  { %v474_v45 = vsel %vm396_vm2, %v473_v43, -inf }
 0x21a   :  { %475 = vmax.xlane.f32.xlu1 %v474_v45 }
 0x289   :  { %v632_v46 = vpop.f32.mrb[6].mxu0 }
 0x28a   :  { %v636_v47 = vmul.f32 0.35355338, %v632_v46  ;;  %v5455_v48 = vpop.f32.mrb[7].mxu0 }
 0x28c   :  { %v637_v49 = vsel %vm396_vm2, %v636_v47, -inf }
 0x28d   :  { %638 = vmax.xlane.f32.xlu1 %v637_v49 }
 0x2a7   :  { %v476_v50 = vpop.xlane.xlu1 %475 }
 0x2a8   :  { %v477_v51 = vsub.f32 %v473_v43, %v476_v50 }
 0x2aa   :  { %v478_v52 = vmul.f32 1.442695, %v477_v51 }
 0x2ac   :  { %5882 = vpow2.f32 %v478_v52  ;;  %v6425_v52 = vld [vmem:[#allocation7 + $0x18] sm:$0xff] }
 0x2b6   :  { %v5883_v53 = vpop.eup %5882 }
 0x2b7   :  { %v480_v54 = vsel %vm396_vm2, %v5883_v53, 0.0 }
 0x2b8   :  { %481 = vadd.xlane.f32.xlu0 %v480_v54 }
 0x2ce   :  { %961 = vrot.lane.b32.xlu0 %v6349_v39, %s6089_s29 }
 0x2d2   :  { %1113 = vrot.lane.b32.xlu0 %v292_v31, %s6090_s23 }
 0x31a   :  { %v639_v55 = vpop.xlane.xlu1 %638 }
 0x31b   :  { %v640_v56 = vsub.f32 %v636_v47, %v639_v55 }
 0x31d   :  { %v641_v57 = vmul.f32 1.442695, %v640_v56 }
 0x31f   :  { %5884 = vpow2.f32 %v641_v57 }
 0x329   :  { %v5885_v58 = vpop.eup %5884 }
 0x32a   :  { %v643_v59 = vsel %vm396_vm2, %v5885_v58, 0.0 }
 0x32b   :  { %644 = vadd.xlane.f32.xlu1 %v643_v59 }
 0x33c   :  { %649 = vrot.lane.b32.xlu1 %v6349_v39, %s6088_s22 }
 0x340   :  { %873 = vrot.lane.b32.xlu1 %v292_v31, %s6089_s29 }
 0x344   :  { %871 = vrot.lane.b32.xlu1 %v6333_v34, %s6089_s29 }
 0x345   :  { %v482_v60 = vpop.xlane.xlu0 %481 }
 0x346   :  { %5886 = vrcp.f32 %v482_v60 }
 0x349   :  { %v962_v6 = vpop.permute.xlu0 %961 }
 0x34d   :  { %v1114_v35 = vpop.permute.xlu0 %1113 }
 0x350   :  { %v5887_v61 = vpop.eup %5886 }
 0x351   :  { %v484_v62 = vmul.f32 %v5887_v61, %v5883_v53 }
 0x353   :  { %5449 = vmatmul.mubr.msk.f32.vlgmr.msra.gmra.mrb[2].mxu1 %vm396_vm2, %v484_v62 }
 0x354   :  { %5458 = vmatprep.mubr.msk.f32.mxu1 %vm6087_vm1, %v6086_v24 }
 0x3b8   :  { %v645_v0 = vpop.xlane.xlu1 %644 }
 0x3b9   :  { %5888 = vrcp.f32 %v645_v0 }
 0x3bc   :  { %v650_v1 = vpop.permute.xlu1 %649 }
 0x3bd   :  { %5457 = vmatpush3.msra.mxu1 %v650_v1 }
 0x3be   :  { %5466 = vmatprep.subr.mxu1 %v6086_v24 }
 0x3c0   :  { %v874_v8 = vpop.permute.xlu1 %873 }
 0x3c3   :  { %v5889_v2 = vpop.eup %5888 }
 0x3c4   :  { %v647_v3 = vmul.f32 %v5889_v2, %v5885_v58  ;;  %v872_v12 = vpop.permute.xlu1 %871 }
 0x3c6   :  { %5459 = vmatmul.mubr.msk.f32.vlgmr.msra.gmra.mrb[4].mxu1 %vm396_vm2, %v647_v3 }
 0x3c7   :  { %5467 = vmatpush3.msra.mxu1 %v6378_v4  ;;  %5468 = vmatprep.mubr.msk.f32.mxu1 %vm6087_vm1, %v6086_v24 }
 0x3c8   :  { %5476 = vmatprep.subr.mxu1 %v6086_v24 }
 0x426   :  { %v554_v5 = vpop.f32.mrb[2].mxu1 }
 0x427   :  { %v5450_v7 = vpop.f32.mrb[3].mxu1  ;;  %5469 = vmatmul.mubr.msk.f32.vlgmr.msra.gmra.mrb[6].mxu1 %vm396_vm2, %v554_v5 }
 0x428   :  { %5477 = vmatpush3.msra.mxu1 %v962_v6  ;;  %5478 = vmatprep.mubr.msk.f32.mxu1 %vm6087_vm1, %v6086_v24 }
 0x429   :  { %5486 = vmatprep.subr.mxu1 %v6086_v24 }
 0x499   :  { %v721_v9 = vpop.f32.mrb[4].mxu1 }
 0x49a   :  { %v5460_v10 = vpop.f32.mrb[5].mxu1  ;;  %5464 = vmatmul.mubr.msk.f32.vlgmr.msra.gmra.mrb[8].mxu0 %vm396_vm2, %v721_v9 }
 0x49b   :  { %5472 = vmatpush3.xpose.msk.msra.mxu0 %vm396_vm2, %v874_v8  ;;  %5473 = vmatprep.mubr.msk.f32.mxu0 %vm6087_vm1, %v6086_v24 }
 0x49c   :  { %5481 = vmatprep.subr.mxu0 %v6086_v24 }
 0x49e   :  { %5474 = vmatmul.mubr.msk.f32.vlgmr.msra.gmra.mrb[10].mxu0 %vm396_vm2, %v872_v12 }
 0x49f   :  { %5483 = vmatprep.mubr.msk.f32.mxu0 %vm6087_vm1, %v6086_v24  ;;  %5482 = vmatpush3.msra.mxu0 %v6405_v33 }
 0x4a0   :  { %5491 = vmatprep.subr.mxu0 %v6086_v24 }
 0x4fa   :  { %v867_v15 = vpop.f32.mrb[6].mxu1 }
 0x4fb   :  { %v5470_v17 = vpop.f32.mrb[7].mxu1 }
 0x56d   :  { %v794_v18 = vpop.f32.mrb[8].mxu0 }
 0x56e   :  { %v868_v19 = vadd.f32 %v867_v15, %v794_v18  ;;  %v5465_v20 = vpop.f32.mrb[9].mxu0 }
 0x571   :  { %v945_v21 = vpop.f32.mrb[10].mxu0 }
 0x572   :  { %v949_v22 = vmul.f32 0.35355338, %v945_v21  ;;  %v5475_v23 = vpop.f32.mrb[11].mxu0 }
 0x574   :  { %v950_v25 = vsel %vm396_vm2, %v949_v22, -inf }
 0x575   :  { %951 = vmax.xlane.f32.xlu1 %v950_v25 }
 0x586   :  { %1201 = vrot.lane.b32.xlu1 %v6349_v39, %s6090_s23 }
 0x58a   :  { %1514 = vrot.lane.b32.xlu1 %v6329_v28, %s6088_s22 }
 0x602   :  { %v952_v26 = vpop.xlane.xlu1 %951 }
 0x603   :  { %v953_v27 = vsub.f32 %v949_v22, %v952_v26 }
 0x605   :  { %v954_v29 = vmul.f32 1.442695, %v953_v27 }
 0x606   :  { %v1202_v41 = vpop.permute.xlu1 %1201 }
 0x607   :  { %5890 = vpow2.f32 %v954_v29 }
 0x60a   :  { %v1515_v56 = vpop.permute.xlu1 %1514 }
 0x611   :  { %v5891_v30 = vpop.eup %5890 }
 0x612   :  { %v956_v31 = vsel %vm396_vm2, %v5891_v30, 0.0 }
 0x613   :  { %957 = vadd.xlane.f32.xlu0 %v956_v31 }
 0x629   :  { %1111 = vrot.lane.b32.xlu0 %v6333_v34, %s6090_s23 }
 0x6a0   :  { %v958_v36 = vpop.xlane.xlu0 %957 }
 0x6a1   :  { %5892 = vrcp.f32 %v958_v36 }
 0x6a4   :  { %v1112_v34 = vpop.permute.xlu0 %1111 }
 0x6ab   :  { %v5893_v38 = vpop.eup %5892 }
 0x6ac   :  { %v960_v39 = vmul.f32 %v5893_v38, %v5891_v30 }
 0x6ae   :  { %5479 = vmatmul.mubr.msk.f32.vlgmr.msra.gmra.mrb[8].mxu1 %vm396_vm2, %v960_v39 }
 0x6af   :  { %5487 = vmatpush3.xpose.msk.msra.mxu1 %vm396_vm2, %v1114_v35  ;;  %5488 = vmatprep.mubr.msk.f32.mxu1 %vm6087_vm1, %v6086_v24 }
 0x6b0   :  { %5496 = vmatprep.subr.mxu1 %v6086_v24 }
 0x6b2   :  { %5489 = vmatmul.mubr.msk.f32.vlgmr.msra.gmra.mrb[10].mxu1 %vm396_vm2, %v1112_v34 }
 0x6b3   :  { %5498 = vmatprep.mubr.msk.f32.mxu1 %vm6087_vm1, %v6086_v24  ;;  %5497 = vmatpush3.msra.mxu1 %v6425_v52 }
 0x6b4   :  { %5506 = vmatprep.subr.mxu1 %v6086_v24 }
 0x781   :  { %v1033_v40 = vpop.f32.mrb[8].mxu1 }
 0x782   :  { %v5480_v42 = vpop.f32.mrb[9].mxu1  ;;  %5484 = vmatmul.mubr.msk.f32.vlgmr.msra.gmra.mrb[12].mxu0 %vm396_vm2, %v1033_v40 }
 0x783   :  { %5492 = vmatpush3.msra.mxu0 %v1202_v41  ;;  %5493 = vmatprep.mubr.msk.f32.mxu0 %vm6087_vm1, %v6086_v24 }
 0x784   :  { %5501 = vmatprep.subr.mxu0 %v6086_v24 }
 0x785   :  { %v1185_v43 = vpop.f32.mrb[10].mxu1 }
 0x786   :  { %v1189_v44 = vmul.f32 0.35355338, %v1185_v43  ;;  %v5490_v45 = vpop.f32.mrb[11].mxu1 }
 0x788   :  { %v1190_v46 = vsel %vm396_vm2, %v1189_v44, -inf }
 0x789   :  { %1191 = vmax.xlane.f32.xlu0 %v1190_v46 }
 0x816   :  { %v1192_v47 = vpop.xlane.xlu0 %1191 }
 0x817   :  { %v1193_v48 = vsub.f32 %v1189_v44, %v1192_v47 }
 0x819   :  { %v1194_v49 = vmul.f32 1.442695, %v1193_v48 }
 0x81b   :  { %5894 = vpow2.f32 %v1194_v49 }
 0x825   :  { %v5895_v50 = vpop.eup %5894 }
 0x826   :  { %v1196_v51 = vsel %vm396_vm2, %v5895_v50, 0.0 }
 0x827   :  { %1197 = vadd.xlane.f32.xlu1 %v1196_v51 }
 0x838   :  { %1512 = vrot.lane.b32.xlu1 %v6331_v32, %s6088_s22 }
 0x855   :  { %v1106_v53 = vpop.f32.mrb[12].mxu0 }
 0x856   :  { %v1110_v54 = vadd.f32 %v1106_v53, %v868_v19  ;;  %v5485_v55 = vpop.f32.mrb[13].mxu0 }
 0x8b4   :  { %v1198_v57 = vpop.xlane.xlu1 %1197 }
 0x8b5   :  { %5896 = vrcp.f32 %v1198_v57 }
 0x8b8   :  { %v1513_v60 = vpop.permute.xlu1 %1512 }
 0x8bf   :  { %v5897_v58 = vpop.eup %5896 }
 0x8c0   :  { %v1200_v59 = vmul.f32 %v5897_v58, %v5895_v50 }
 0x8c2   :  { %5494 = vmatmul.mubr.msk.f32.vlgmr.msra.gmra.mrb[14].mxu0 %vm396_vm2, %v1200_v59 }
 0x8c3   :  { %5502 = vmatpush3.xpose.msk.msra.mxu0 %vm396_vm2, %v6329_v28  ;;  %5503 = vmatprep.mubr.msk.f32.mxu0 %vm6087_vm1, %v6086_v24 }
 0x8c4   :  { %5511 = vmatprep.subr.mxu0 %v6086_v24 }
 0x8c6   :  { %5504 = vmatmul.mubr.msk.f32.vlgmr.msra.gmra.mrb[16].mxu0 %vm396_vm2, %v6331_v32 }
 0x8c7   :  { %5512 = vmatpush3.xpose.msk.msra.mxu0 %vm396_vm2, %v1515_v56  ;;  %5513 = vmatprep.mubr.msk.f32.mxu0 %vm6087_vm1, %v6086_v24 }
 0x8c8   :  { %5521 = vmatprep.subr.mxu0 %v6086_v24 }
 0x8ca   :  { %5514 = vmatmul.mubr.msk.f32.vlgmr.msra.gmra.mrb[18].mxu0 %vm396_vm2, %v1513_v60 }
 0x8cb   :  { %5522 = vmatpush3.msra.mxu0 %v6373_v63  ;;  %5523 = vmatprep.mubr.msk.f32.mxu0 %vm6087_vm1, %v6086_v24 }
 0x8cc   :  { %5531 = vmatprep.subr.mxu0 %v6086_v24 }
 0x995   :  { %v1273_v61 = vpop.f32.mrb[14].mxu0 }
 0x996   :  { %v5495_v62 = vpop.f32.mrb[15].mxu0  ;;  %5499 = vmatmul.mubr.msk.f32.vlgmr.msra.gmra.mrb[12].mxu1 %vm396_vm2, %v1273_v61 }
 0x997   :  { %5507 = vmatpush3.msra.mxu1 %v6347_v37  ;;  %5508 = vmatprep.mubr.msk.f32.mxu1 %vm6087_vm1, %v6086_v24 }
 0x998   :  { %5516 = vmatprep.subr.mxu1 %v6086_v24 }
 0x999   :  { %v1423_v0 = vpop.f32.mrb[16].mxu0 }
 0x99a   :  { %v1427_v1 = vmul.f32 0.35355338, %v1423_v0  ;;  %v5505_v2 = vpop.f32.mrb[17].mxu0 }
 0x99c   :  { %v1428_v63 = vsel %vm396_vm2, %v1427_v1, -inf }
 0x99d   :  { %1429 = vmax.xlane.f32.xlu1 %v1428_v63  ;;  %v1586_v3 = vpop.f32.mrb[18].mxu0 }
 0x99e   :  { %v1590_v5 = vmul.f32 0.35355338, %v1586_v3  ;;  %v5515_v6 = vpop.f32.mrb[19].mxu0 }
 0x99f   :  { %v5151_v6 = vld [vmem:[%s6915_s9] ss:$0 sm:$0xff] }
 0x9a0   :  { %v1591_v7 = vsel %vm396_vm2, %v1590_v5, -inf }
 0x9a1   :  { %1592 = vmax.xlane.f32.xlu0 %v1591_v7 }
 0x9ae   :  { %1825 = vrot.lane.b32.xlu1 %v6331_v32, %s6089_s29 }
 0xa2a   :  { %v1430_v8 = vpop.xlane.xlu1 %1429 }
 0xa2b   :  { %v1431_v9 = vsub.f32 %v1427_v1, %v1430_v8 }
 0xa2d   :  { %v1432_v10 = vmul.f32 1.442695, %v1431_v9 }
 0xa2e   :  { %v1593_v12 = vpop.xlane.xlu0 %1592 }
 0xa2f   :  { %5898 = vpow2.f32 %v1432_v10  ;;  %v1594_v15 = vsub.f32 %v1590_v5, %v1593_v12 }
 0xa31   :  { %v1595_v17 = vmul.f32 1.442695, %v1594_v15 }
 0xa33   :  { %5900 = vpow2.f32 %v1595_v17 }
 0xa39   :  { %v5899_v18 = vpop.eup %5898 }
 0xa3a   :  { %v1434_v19 = vsel %vm396_vm2, %v5899_v18, 0.0 }
 0xa3b   :  { %1435 = vadd.xlane.f32.xlu0 %v1434_v19 }
 0xa3d   :  { %v5901_v20 = vpop.eup %5900 }
 0xa3e   :  { %v1597_v21 = vsel %vm396_vm2, %v5901_v20, 0.0 }
 0xa3f   :  { %1598 = vadd.xlane.f32.xlu0 %v1597_v21 }
 0xa55   :  { %1603 = vrot.lane.b32.xlu0 %v6347_v37, %s6088_s22 }
 0xa59   :  { %1827 = vrot.lane.b32.xlu0 %v6329_v28, %s6089_s29 }
 0xa69   :  { %v1346_v22 = vpop.f32.mrb[12].mxu1 }
 0xa6a   :  { %v6461_v23 = vadd.f32 %v1346_v22, %v1110_v54  ;;  %v5500_v25 = vpop.f32.mrb[13].mxu1 }
 0xa6c   :  { %v2312_v7 = vadd.f32 %v5151_v6, %v6461_v23 }
 0xa6e   :  { %v2314_v10 = vadd.f32 %v2312_v7, %v6285_v11  ;;  %v2462_v7 = vld [vmem:[%s6920_s14 + $0x38] sm:$0xff] }
 0xac8   :  { %v1436_v26 = vpop.xlane.xlu0 %1435 }
 0xac9   :  { %5902 = vrcp.f32 %v1436_v26 }
 0xacc   :  { %v1599_v27 = vpop.xlane.xlu0 %1598 }
 0xacd   :  { %5904 = vrcp.f32 %v1599_v27 }
 0xad0   :  { %v1604_v31 = vpop.permute.xlu0 %1603 }
 0xad3   :  { %v5903_v29 = vpop.eup %5902 }
 0xad4   :  { %v1438_v30 = vmul.f32 %v5903_v29, %v5899_v18  ;;  %v1828_v40 = vpop.permute.xlu0 %1827 }
 0xad6   :  { %5509 = vmatmul.mubr.msk.f32.vlgmr.msra.gmra.mrb[14].mxu1 %vm396_vm2, %v1438_v30 }
 0xad7   :  { %v5905_v35 = vpop.eup %5904  ;;  %5517 = vmatpush3.msra.mxu1 %v1604_v31  ;;  %5518 = vmatprep.mubr.msk.f32.mxu1 %vm6087_vm1, %v6086_v24  ;;  %v5152_v31 = vld [vmem:[%s6916_s10] ss:$0 sm:$0xff] }
 0xad8   :  { %v1601_v36 = vmul.f32 %v5905_v35, %v5901_v20  ;;  %5526 = vmatprep.subr.mxu1 %v6086_v24 }
 0xada   :  { %5519 = vmatmul.mubr.msk.f32.vlgmr.msra.gmra.mrb[16].mxu1 %vm396_vm2, %v1601_v36  ;;  %v5153_v36 = vld [vmem:[%s6917_s11] ss:$0 sm:$0xff] }
 0xadb   :  { %5527 = vmatpush3.msra.mxu1 %v6378_v4  ;;  %5528 = vmatprep.mubr.msk.f32.mxu1 %vm6087_vm1, %v6086_v24  ;;  %v1826_v4 = vpop.permute.xlu1 %1825 }
 0xadc   :  { %5536 = vmatprep.subr.mxu1 %v6086_v24 }
 0xba9   :  { %v1508_v38 = vpop.f32.mrb[14].mxu1 }
 0xbaa   :  { %v5510_v39 = vpop.f32.mrb[15].mxu1  ;;  %5529 = vmatmul.mubr.msk.f32.vlgmr.msra.gmra.mrb[18].mxu1 %vm396_vm2, %v1508_v38 }
 0xbab   :  { %5538 = vmatprep.mubr.msk.f32.mxu1 %vm6087_vm1, %v6086_v24 }
 0xbad   :  { %v1675_v34 = vpop.f32.mrb[16].mxu1 }
 0xbae   :  { %v5520_v41 = vpop.f32.mrb[17].mxu1  ;;  %5524 = vmatmul.mubr.msk.f32.vlgmr.msra.gmra.mrb[20].mxu0 %vm396_vm2, %v1675_v34 }
 0xbaf   :  { %5532 = vmatpush3.xpose.msk.msra.mxu0 %vm396_vm2, %v1828_v40  ;;  %5533 = vmatprep.mubr.msk.f32.mxu0 %vm6087_vm1, %v6086_v24 }
 0xbb0   :  { %5541 = vmatprep.subr.mxu0 %v6086_v24 }
 0xbb2   :  { %5534 = vmatmul.mubr.msk.f32.vlgmr.msra.gmra.mrb[22].mxu0 %vm396_vm2, %v1826_v4 }
 0xbb3   :  { %5542 = vmatpush3.msra.mxu0 %v6405_v33  ;;  %5543 = vmatprep.mubr.msk.f32.mxu0 %vm6087_vm1, %v6086_v24 }
 0xbb4   :  { %5551 = vmatprep.subr.mxu0 %v6086_v24 }
 0xc7d   :  { %v1821_v42 = vpop.f32.mrb[18].mxu1 }
 0xc7e   :  { %v5530_v43 = vpop.f32.mrb[19].mxu1 }
 0xc81   :  { %v1748_v44 = vpop.f32.mrb[20].mxu0 }
 0xc82   :  { %v1822_v45 = vadd.f32 %v1821_v42, %v1748_v44  ;;  %v5525_v46 = vpop.f32.mrb[21].mxu0 }
 0xc85   :  { %v1899_v47 = vpop.f32.mrb[22].mxu0 }
 0xc86   :  { %v1903_v48 = vmul.f32 0.35355338, %v1899_v47  ;;  %v5535_v49 = vpop.f32.mrb[23].mxu0 }
 0xc88   :  { %v1904_v50 = vsel %vm396_vm2, %v1903_v48, -inf }
 0xc89   :  { %1905 = vmax.xlane.f32.xlu0 %v1904_v50 }
 0xc9f   :  { %1915 = vrot.lane.b32.xlu0 %v6347_v37, %s6089_s29 }
 0xca3   :  { %2065 = vrot.lane.b32.xlu0 %v6331_v32, %s6090_s23 }
 0xd16   :  { %v1906_v33 = vpop.xlane.xlu0 %1905 }
 0xd17   :  { %v1907_v51 = vsub.f32 %v1903_v48, %v1906_v33  ;;  %v2361_v33 = vld [vmem:[#allocation8] sm:$0xff] }
 0xd19   :  { %v1908_v53 = vmul.f32 1.442695, %v1907_v51  ;;  %v2362_v51 = vld [vmem:[#allocation8 + $0x8] sm:$0xff] }
 0xd1a   :  { %v1916_v54 = vpop.permute.xlu0 %1915 }
 0xd1b   :  { %5906 = vpow2.f32 %v1908_v53  ;;  %5537 = vmatpush3.msra.mxu1 %v1916_v54  ;;  %v5798_v53 = vpack.c.bf16 %v2362_v51, %v2361_v33  ;;  %v2363_v54 = vld [vmem:[#allocation8 + $0x10] sm:$0xff]  ;;  %v5165_v33 = vld [vmem:[%s6937_s27 + $0x38] sm:$0xff] }
 0xd1c   :  { %5546 = vmatprep.subr.mxu1 %v6086_v24 }
 0xd1e   :  { %v2066_v60 = vpop.permute.xlu0 %2065 }
 0xd25   :  { %v5907_v55 = vpop.eup %5906 }
 0xd26   :  { %v1910_v56 = vsel %vm396_vm2, %v5907_v55, 0.0 }
 0xd27   :  { %1911 = vadd.xlane.f32.xlu1 %v1910_v56 }
 0xd38   :  { %2067 = vrot.lane.b32.xlu1 %v6329_v28, %s6090_s23 }
 0xdb4   :  { %v1912_v57 = vpop.xlane.xlu1 %1911 }
 0xdb5   :  { %5908 = vrcp.f32 %v1912_v57  ;;  %v2456_v57 = vld [vmem:[%s6920_s14 + $0x8] sm:$0xff] }
 0xdb8   :  { %v2068_v32 = vpop.permute.xlu1 %2067 }
 0xdbf   :  { %v5909_v58 = vpop.eup %5908 }
 0xdc0   :  { %v1914_v59 = vmul.f32 %v5909_v58, %v5907_v55  ;;  %v2364_v55 = vld [vmem:[#allocation8 + $0x18] sm:$0xff]  ;;  %v2457_v58 = vld [vmem:[%s6920_s14 + $0x10] sm:$0xff] }
 0xdc1   :  { %v5802_v56 = vpack.c.bf16 %v2364_v55, %v2363_v54  ;;  %v5171_v54 = vld [vmem:[%s6910_s4 + $0x28] sm:$0xff] }
 0xdc2   :  { %5539 = vmatmul.mubr.msk.f32.vlgmr.msra.gmra.mrb[20].mxu1 %vm396_vm2, %v1914_v59 }
 0xdc3   :  { %5547 = vmatpush3.xpose.msk.msra.mxu1 %vm396_vm2, %v2068_v32  ;;  %5548 = vmatprep.mubr.msk.f32.mxu1 %vm6087_vm1, %v6086_v24  ;;  %v2458_v32 = vld [vmem:[%s6920_s14 + $0x18] sm:$0xff] }
 0xdc4   :  { %5556 = vmatprep.subr.mxu1 %v6086_v24 }
 0xdc6   :  { %5549 = vmatmul.mubr.msk.f32.vlgmr.msra.gmra.mrb[22].mxu1 %vm396_vm2, %v2066_v60  ;;  %v5810_v60 = vpack.c.bf16 %v2458_v32, %v2457_v58 }
 0xdc7   :  { %5557 = vmatpush3.msra.mxu1 %v6425_v52  ;;  %5558 = vmatprep.mubr.msk.f32.mxu1 %vm6087_vm1, %v6086_v24 }
 0xe95   :  { %v1987_v28 = vpop.f32.mrb[20].mxu1 }
 0xe96   :  { %v5540_v61 = vpop.f32.mrb[21].mxu1  ;;  %5544 = vmatmul.mubr.msk.f32.vlgmr.msra.gmra.mrb[24].mxu0 %vm396_vm2, %v1987_v28  ;;  %v2459_v28 = vld [vmem:[%s6920_s14 + $0x20] sm:$0xff] }
 0xe97   :  { %5553 = vmatprep.mubr.msk.f32.mxu0 %vm6087_vm1, %v6086_v24  ;;  %v2460_v61 = vld [vmem:[%s6920_s14 + $0x28] sm:$0xff] }
 0xe99   :  { %v2139_v62 = vpop.f32.mrb[22].mxu1 }
 0xe9a   :  { %v2143_v0 = vmul.f32 0.35355338, %v2139_v62  ;;  %v5550_v1 = vpop.f32.mrb[23].mxu1  ;;  %v5814_v62 = vpack.c.bf16 %v2460_v61, %v2459_v28  ;;  %v5160_v28 = vld [vmem:[%s6922_s16] ss:$0 sm:$0xff] }
 0xe9c   :  { %v2144_v2 = vsel %vm396_vm2, %v2143_v0, -inf }
 0xe9d   :  { %2145 = vmax.xlane.f32.xlu0 %v2144_v2 }
 0xeb3   :  { %2155 = vrot.lane.b32.xlu0 %v6347_v37, %s6090_s23  ;;  %v2318_v37 = vsel %vm132_vm0, %v2314_v10, 0.0 }
 0xf2a   :  { %v2146_v52 = vpop.xlane.xlu0 %2145 }
 0xf2b   :  { %v2147_v63 = vsub.f32 %v2143_v0, %v2146_v52 }
 0xf2d   :  { %v2148_v3 = vmul.f32 1.442695, %v2147_v63 }
 0xf2e   :  { %v2156_v5 = vpop.permute.xlu0 %2155 }
 0xf2f   :  { %5910 = vpow2.f32 %v2148_v3  ;;  %5552 = vmatpush3.msra.mxu0 %v2156_v5 }
 0xf30   :  { %5799 = vmatprep.subr.bf16.mxu0 %v5798_v53 }
 0xf39   :  { %v5911_v8 = vpop.eup %5910 }
 0xf3a   :  { %v2150_v9 = vsel %vm396_vm2, %v5911_v8, 0.0 }
 0xf3b   :  { %2151 = vadd.xlane.f32.xlu1 %v2150_v9  ;;  %v5154_v9 = vld [vmem:[%s6919_s13] ss:$0 sm:$0xff] }
 0xf3f   :  { %2319 = vadd.xlane.f32.xlu1 %v2318_v37 }
 0xf69   :  { %v2060_v12 = vpop.f32.mrb[24].mxu0 }
 0xf6a   :  { %v2064_v15 = vadd.f32 %v2060_v12, %v1822_v45  ;;  %v5545_v17 = vpop.f32.mrb[25].mxu0 }
 0xfc8   :  { %v2152_v18 = vpop.xlane.xlu1 %2151 }
 0xfc9   :  { %5912 = vrcp.f32 %v2152_v18 }
 0xfcc   :  { %v2320_v19 = vpop.xlane.xlu1 %2319 }
 0xfcd   :  { %v2325_v20 = vmul.f32 0.03125, %v2320_v19  ;;  %v5157_v19 = vld [vmem:[%s6921_s15] ss:$0 sm:$0xff] }
 0xfcf   :  { %v2327_v21 = vsub.f32 %v2314_v10, %v2325_v20 }
 0xfd1   :  { %v2329_v22 = vmul.f32 %v2327_v21, %v2327_v21 }
 0xfd3   :  { %v5913_v25 = vpop.eup %5912  ;;  %v2331_v23 = vsel %vm132_vm0, %v2329_v22, 0.0 }
 0xfd4   :  { %v2154_v26 = vmul.f32 %v5913_v25, %v5911_v8  ;;  %2332 = vadd.xlane.f32.xlu0 %v2331_v23 }
 0xfd6   :  { %5554 = vmatmul.mubr.msk.f32.vlgmr.msra.gmra.mrb[26].mxu0 %vm396_vm2, %v2154_v26 }
 0xfd7   :  { %5801 = vmatpush3.bf16.msra.mxu0 %v5798_v53  ;;  %v5170_v53 = vld [vmem:[%s6910_s4 + $0x20] sm:$0xff] }
 0xfd8   :  { %5803 = vmatprep.subr.bf16.mxu0 %v5802_v56  ;;  %v5830_v55 = vpack.c.bf16 %v5171_v54, %v5170_v53 }
 0xfdb   :  { %5805 = vmatpush3.bf16.msra.mxu0 %v5802_v56 }
0x1061   :  { %v2333_v11 = vpop.xlane.xlu0 %2332 }
0x1062   :  { %v2337_v27 = vmul.f32 0.03125, %v2333_v11 }
0x1064   :  { %v2339_v29 = vadd.f32 1e-05, %v2337_v27 }
0x1066   :  { %5914 = vrsqrt.f32 %v2339_v29 }
0x1070   :  { %v5915_v30 = vpop.eup %5914 }
0x1071   :  { %v2343_v35 = vmul.f32 %v5915_v30, %v2327_v21 }
0x1073   :  { %v2351_v38 = vmul.f32 %v5152_v31, %v2343_v35 }
0x1075   :  { %v6524_v39 = vadd.f32 %v5153_v36, %v2351_v38 }
0x1077   :  { %5569 = vmatprep.mubr.msk.f32.mxu0 %vm132_vm0, %v6524_v39 }
0x10a9   :  { %v2227_v34 = vpop.f32.mrb[26].mxu0 }
0x10aa   :  { %v5555_v40 = vpop.f32.mrb[27].mxu0  ;;  %5559 = vmatmul.mubr.msk.f32.vlgmr.msra.gmra.mrb[24].mxu1 %vm396_vm2, %v2227_v34 }
0x117d   :  { %v2300_v41 = vpop.f32.mrb[24].mxu1 }
0x117e   :  { %v2304_v4 = vadd.f32 %v2300_v41, %v2064_v15  ;;  %v5560_v42 = vpop.f32.mrb[25].mxu1 }
0x117f   :  { %v5179_v42 = vld [vmem:[%s6912_s6 + $0x28] sm:$0xff] }
0x1180   :  { %v2313_v43 = vadd.f32 %v5151_v6, %v2304_v4  ;;  %v2461_v6 = vld [vmem:[%s6920_s14 + $0x30] sm:$0xff]  ;;  %v5178_v4 = vld [vmem:[%s6912_s6 + $0x20] sm:$0xff] }
0x1181   :  { %v5818_v8 = vpack.c.bf16 %v2462_v7, %v2461_v6  ;;  %v5173_v6 = vld [vmem:[%s6910_s4 + $0x38] sm:$0xff] }
0x1182   :  { %v2315_v44 = vadd.f32 %v2313_v43, %v6289_v14  ;;  %v2455_v14 = vld [vmem:[%s6920_s14] sm:$0xff]  ;;  %v5838_v43 = vpack.c.bf16 %v5179_v42, %v5178_v4 }
0x1183   :  { %v5806_v59 = vpack.c.bf16 %v2456_v57, %v2455_v14 }
0x1184   :  { %v2321_v45 = vsel %vm132_vm0, %v2315_v44, 0.0 }
0x1185   :  { %2322 = vadd.xlane.f32.xlu1 %v2321_v45  ;;  %5807 = vmatprep.subr.bf16.mxu1 %v5806_v59  ;;  %v5163_v45 = vld [vmem:[%s6937_s27 + $0x28] sm:$0xff] }
0x1186   :  { %5809 = vmatpush3.bf16.msra.mxu1 %v5806_v59 }
0x1187   :  { %5811 = vmatprep.subr.bf16.mxu1 %v5810_v60 }
0x118a   :  { %5813 = vmatpush3.bf16.msra.mxu1 %v5810_v60 }
0x118b   :  { %5815 = vmatprep.subr.bf16.mxu1 %v5814_v62 }
0x118e   :  { %5817 = vmatpush3.bf16.msra.mxu1 %v5814_v62  ;;  %v5161_v62 = vld [vmem:[%s6938_s21] ss:$0 sm:$0xff] }
0x118f   :  { %5819 = vmatprep.subr.bf16.mxu1 %v5818_v8 }
0x1192   :  { %5821 = vmatpush3.bf16.msra.mxu1 %v5818_v8 }
0x1193   :  { %5839 = vmatprep.subr.bf16.mxu1 %v5838_v43 }
0x1212   :  { %v2323_v46 = vpop.xlane.xlu1 %2322 }
0x1213   :  { %v2326_v47 = vmul.f32 0.03125, %v2323_v46 }
0x1215   :  { %v2328_v48 = vsub.f32 %v2315_v44, %v2326_v47  ;;  %v5162_v44 = vld [vmem:[%s6937_s27 + $0x20] sm:$0xff]  ;;  %v5180_v47 = vld [vmem:[%s6912_s6 + $0x30] sm:$0xff] }
0x1216   :  { %v5822_v46 = vpack.c.bf16 %v5163_v45, %v5162_v44 }
0x1217   :  { %v2330_v49 = vmul.f32 %v2328_v48, %v2328_v48 }
0x1218   :  { %5823 = vmatprep.subr.bf16.mxu0 %v5822_v46 }
0x1219   :  { %v2334_v50 = vsel %vm132_vm0, %v2330_v49, 0.0 }
0x121a   :  { %2335 = vadd.xlane.f32.xlu1 %v2334_v50  ;;  %v5164_v50 = vld [vmem:[%s6937_s27 + $0x30] sm:$0xff] }
0x121b   :  { %v5826_v51 = vpack.c.bf16 %v5165_v33, %v5164_v50 }
0x12a7   :  { %v2336_v0 = vpop.xlane.xlu1 %2335 }
0x12a8   :  { %v2338_v1 = vmul.f32 0.03125, %v2336_v0 }
0x12aa   :  { %v2340_v2 = vadd.f32 1e-05, %v2338_v1 }
0x12ac   :  { %5916 = vrsqrt.f32 %v2340_v2 }
0x12b6   :  { %v5917_v52 = vpop.eup %5916 }
0x12b7   :  { %v2344_v63 = vmul.f32 %v5917_v52, %v2328_v48  ;;  %v5181_v48 = vld [vmem:[%s6912_s6 + $0x38] sm:$0xff] }
0x12b8   :  { %v5842_v49 = vpack.c.bf16 %v5181_v48, %v5180_v47 }
0x12b9   :  { %v2352_v3 = vmul.f32 %v5152_v31, %v2344_v63 }
0x12bb   :  { %v2360_v5 = vadd.f32 %v5153_v36, %v2352_v3 }
0x12bd   :  { %5570 = vmatmul.mubr.msk.f32.vlgmr.msra.gmra.mrb[28].mxu0 %vm132_vm0, %v2360_v5 }
0x12be   :  { %5825 = vmatpush3.bf16.msra.mxu0 %v5822_v46 }
0x12bf   :  { %5827 = vmatprep.subr.bf16.mxu0 %v5826_v51 }
0x12c2   :  { %5829 = vmatpush3.bf16.msra.mxu0 %v5826_v51  ;;  %v6686_v51 = vld [vmem:[#allocation7 + $0x28] sm:$0xff] }
0x12c3   :  { %5831 = vmatprep.subr.bf16.mxu0 %v5830_v55 }
0x1390   :  { %v5571_v10 = vpop.f32.mrb[28].mxu0 }
0x1391   :  { %v2450_v37 = vadd.f32 %v5571_v10, %v5154_v9  ;;  %v2444_v12 = vpop.f32.mrb[29].mxu0  ;;  %v5167_v10 = vld [vmem:[%s6909_s3 + $0x1] ss:$0 sm:$0xff] }
0x1392   :  { %v2445_v15 = vadd.f32 %v5154_v9, %v2444_v12 }
0x1393   :  { %v2454_v18 = vmax.f32 %v2450_v37, 0.0 }
0x1394   :  { %v2453_v17 = vmax.f32 %v2445_v15, 0.0 }
0x1396   :  { %5588 = vmatprep.mubr.msk.f32.mxu1 %vm2470_vm3, %v2453_v17 }
0x1397   :  { %5589 = vmatmul.mubr.msk.f32.vlgmr.msra.gmra.mrb[26].mxu1 %vm2470_vm3, %v2454_v18 }
0x1398   :  { %5841 = vmatpush3.bf16.msra.mxu1 %v5838_v43 }
0x1399   :  { %5843 = vmatprep.subr.bf16.mxu1 %v5842_v49 }
0x139c   :  { %5845 = vmatpush3.bf16.msra.mxu1 %v5842_v49 }
0x139d   :  { %5629 = vmatprep.subr.mxu1 %v6086_v24 }
0x146a   :  { %v5590_v20 = vpop.f32.mrb[26].mxu1 }
0x146b   :  { %v2543_v21 = vpop.f32.mrb[27].mxu1  ;;  %v2549_v22 = vadd.f32 %v5590_v20, %v5157_v19 }
0x146c   :  { %v2544_v25 = vadd.f32 %v5157_v19, %v2543_v21  ;;  %v5175_v21 = vld [vmem:[%s6911_s5 + $0x1] ss:$0 sm:$0xff] }
0x146d   :  { %v2553_v11 = vadd.f32 %v2549_v22, %v2360_v5  ;;  %v5172_v5 = vld [vmem:[%s6910_s4 + $0x30] sm:$0xff] }
0x146e   :  { %v2552_v23 = vadd.f32 %v2544_v25, %v6524_v39  ;;  %v5834_v9 = vpack.c.bf16 %v5173_v6, %v5172_v5 }
0x146f   :  { %v2559_v27 = vsel %vm132_vm0, %v2553_v11, 0.0 }
0x1470   :  { %v2556_v26 = vsel %vm132_vm0, %v2552_v23, 0.0 }
0x1471   :  { %2557 = vadd.xlane.f32.xlu1 %v2556_v26 }
0x1475   :  { %2560 = vadd.xlane.f32.xlu1 %v2559_v27 }
0x14fe   :  { %v2558_v29 = vpop.xlane.xlu1 %2557 }
0x14ff   :  { %v2562_v30 = vmul.f32 0.03125, %v2558_v29 }
0x1501   :  { %v2564_v31 = vsub.f32 %v2552_v23, %v2562_v30 }
0x1502   :  { %v2561_v35 = vpop.xlane.xlu1 %2560 }
0x1503   :  { %v2563_v36 = vmul.f32 0.03125, %v2561_v35  ;;  %v2566_v38 = vmul.f32 %v2564_v31, %v2564_v31 }
0x1505   :  { %v2565_v34 = vsub.f32 %v2553_v11, %v2563_v36  ;;  %v2568_v40 = vsel %vm132_vm0, %v2566_v38, 0.0 }
0x1506   :  { %2569 = vadd.xlane.f32.xlu1 %v2568_v40 }
0x1507   :  { %v2567_v41 = vmul.f32 %v2565_v34, %v2565_v34 }
0x1509   :  { %v2571_v39 = vsel %vm132_vm0, %v2567_v41, 0.0 }
0x150a   :  { %2572 = vadd.xlane.f32.xlu1 %v2571_v39 }
0x1593   :  { %v2570_v56 = vpop.xlane.xlu1 %2569 }
0x1594   :  { %v2574_v14 = vmul.f32 0.03125, %v2570_v56 }
0x1596   :  { %v2576_v57 = vadd.f32 1e-05, %v2574_v14  ;;  %v6691_v14 = vld [vmem:[#allocation7 + $0x20] sm:$0xff] }
0x1597   :  { %v2573_v58 = vpop.xlane.xlu1 %2572 }
0x1598   :  { %5918 = vrsqrt.f32 %v2576_v57  ;;  %v2575_v59 = vmul.f32 0.03125, %v2573_v58 }
0x159a   :  { %v2577_v32 = vadd.f32 1e-05, %v2575_v59 }
0x159c   :  { %5920 = vrsqrt.f32 %v2577_v32 }
0x15a2   :  { %v5919_v60 = vpop.eup %5918 }
0x15a3   :  { %v2580_v61 = vmul.f32 %v5919_v60, %v2564_v31 }
0x15a5   :  { %v2588_v0 = vmul.f32 %v5160_v28, %v2580_v61 }
0x15a6   :  { %v5921_v1 = vpop.eup %5920 }
0x15a7   :  { %v2581_v2 = vmul.f32 %v5921_v1, %v2565_v34  ;;  %v6607_v52 = vadd.f32 %v5161_v62, %v2588_v0 }
0x15a9   :  { %v2589_v63 = vmul.f32 %v5160_v28, %v2581_v2  ;;  %5621 = vmatprep.mubr.msk.f32.mxu1 %vm132_vm0, %v6607_v52  ;;  %v2598_v3 = vadd.f32 %v6607_v52, %v6287_v13  ;;  %v5183_v13 = vld [vmem:[%s6913_s7 + $0x1] ss:$0 sm:$0xff] }
0x15ab   :  { %v6619_v7 = vadd.f32 %v5161_v62, %v2589_v63  ;;  %5599 = vmatprep.mubr.msk.f32.mxu0 %vm132_vm0, %v2598_v3 }
0x15ad   :  { %5622 = vmatmul.mubr.msk.f32.vlgmr.msra.gmra.mrb[28].mxu1 %vm132_vm0, %v6619_v7  ;;  %v2599_v8 = vadd.f32 %v6619_v7, %v6293_v16 }
0x15ae   :  { %5631 = vmatprep.mubr.msk.f32.mxu1 %vm6087_vm1, %v6086_v24 }
0x15af   :  { %5600 = vmatmul.mubr.msk.f32.vlgmr.msra.gmra.mrb[30].mxu0 %vm132_vm0, %v2599_v8 }
0x15b0   :  { %5833 = vmatpush3.bf16.msra.mxu0 %v5830_v55  ;;  %5610 = vmatprep.mubr.msk.f32.mxu0 %vm132_vm0, %v2598_v3 }
0x15b1   :  { %5835 = vmatprep.subr.bf16.mxu0 %v5834_v9 }
0x15b4   :  { %5837 = vmatpush3.bf16.msra.mxu0 %v5834_v9 }
0x15b5   :  { %5624 = vmatprep.subr.mxu0 %v6086_v24 }
0x15b7   :  { %5611 = vmatmul.mubr.msk.f32.vlgmr.msra.gmra.mrb[32].mxu0 %vm132_vm0, %v2599_v8 }
0x15b8   :  { %5626 = vmatprep.mubr.msk.f32.mxu0 %vm6087_vm1, %v6086_v24 }
0x1680   :  { %v5623_v16 = vpop.f32.mrb[28].mxu1 }
0x1681   :  { %v6640_v37 = vadd.f32 %v5623_v16, %v5183_v13  ;;  %v2867_v12 = vpop.f32.mrb[29].mxu1 }
0x1682   :  { %v6642_v15 = vadd.f32 %v5183_v13, %v2867_v12  ;;  %v5601_v17 = vpop.f32.mrb[30].mxu0 }
0x1683   :  { %v6644_v18 = vadd.f32 %v5601_v17, %v5167_v10  ;;  %v2685_v19 = vpop.f32.mrb[31].mxu0 }
0x1684   :  { %v6646_v20 = vadd.f32 %v5167_v10, %v2685_v19  ;;  %5630 = vmatpush3.msra.mxu1 %v6642_v15 }
0x1685   :  { %5639 = vmatprep.subr.mxu1 %v6086_v24 }
0x1686   :  { %3042 = vrot.lane.b32.xlu0 %v6646_v20, %s6088_s22 }
0x168a   :  { %v5612_v22 = vpop.f32.mrb[32].mxu0 }
0x168b   :  { %v6655_v25 = vadd.f32 %v5612_v22, %v5175_v21  ;;  %v2773_v23 = vpop.f32.mrb[33].mxu0 }
0x168c   :  { %v6657_v26 = vadd.f32 %v5175_v21, %v2773_v23  ;;  %v6726_v23 = vld [vmem:[#allocation7 + $0x30] sm:$0xff] }
0x168e   :  { %3044 = vrot.lane.b32.xlu1 %v6657_v26, %s6088_s22  ;;  %5625 = vmatpush3.xpose.msk.msra.mxu0 %vm396_vm2, %v6657_v26 }
0x168f   :  { %5634 = vmatprep.subr.mxu0 %v6086_v24 }
0x1691   :  { %5627 = vmatmul.mubr.msk.f32.vlgmr.msra.gmra.mrb[34].mxu0 %vm396_vm2, %v6646_v20 }
0x1692   :  { %5636 = vmatprep.mubr.msk.f32.mxu0 %vm6087_vm1, %v6086_v24 }
0x16f8   :  { %v3043_v27 = vpop.permute.xlu0 %3042 }
0x1700   :  { %v3045_v11 = vpop.permute.xlu1 %3044 }
0x1701   :  { %5635 = vmatpush3.xpose.msk.msra.mxu0 %vm396_vm2, %v3045_v11 }
0x1702   :  { %5644 = vmatprep.subr.mxu0 %v6086_v24 }
0x1704   :  { %5637 = vmatmul.mubr.msk.f32.vlgmr.msra.gmra.mrb[36].mxu0 %vm396_vm2, %v3043_v27 }
0x1705   :  { %5646 = vmatprep.mubr.msk.f32.mxu0 %vm6087_vm1, %v6086_v24  ;;  %5645 = vmatpush3.msra.mxu0 %v6686_v51 }
0x1706   :  { %5654 = vmatprep.subr.mxu0 %v6086_v24 }
0x1764   :  { %v2953_v29 = vpop.f32.mrb[34].mxu0 }
0x1765   :  { %v2957_v30 = vmul.f32 0.35355338, %v2953_v29  ;;  %v5628_v31 = vpop.f32.mrb[35].mxu0 }
0x1767   :  { %v2958_v35 = vsel %vm396_vm2, %v2957_v30, -inf }
0x1768   :  { %2959 = vmax.xlane.f32.xlu1 %v2958_v35 }
0x17d7   :  { %v3116_v36 = vpop.f32.mrb[36].mxu0 }
0x17d8   :  { %v3120_v38 = vmul.f32 0.35355338, %v3116_v36  ;;  %v5638_v34 = vpop.f32.mrb[37].mxu0 }
0x17da   :  { %v3121_v40 = vsel %vm396_vm2, %v3120_v38, -inf }
0x17db   :  { %3122 = vmax.xlane.f32.xlu0 %v3121_v40 }
0x17f1   :  { %3357 = vrot.lane.b32.xlu0 %v6657_v26, %s6089_s29 }
0x17f5   :  { %v2960_v41 = vpop.xlane.xlu1 %2959 }
0x17f6   :  { %v2961_v39 = vsub.f32 %v2957_v30, %v2960_v41 }
0x17f8   :  { %v2962_v4 = vmul.f32 1.442695, %v2961_v39  ;;  %v6742_v39 = vld [vmem:[#allocation7 + $0x38] sm:$0xff] }
0x17fa   :  { %5922 = vpow2.f32 %v2962_v4 }
0x1804   :  { %v5923_v42 = vpop.eup %5922 }
0x1805   :  { %v2964_v43 = vsel %vm396_vm2, %v5923_v42, 0.0 }
0x1806   :  { %2965 = vadd.xlane.f32.xlu1 %v2964_v43 }
0x1868   :  { %v3123_v44 = vpop.xlane.xlu0 %3122 }
0x1869   :  { %v3124_v45 = vsub.f32 %v3120_v38, %v3123_v44 }
0x186b   :  { %v3125_v46 = vmul.f32 1.442695, %v3124_v45 }
0x186c   :  { %v3358_v32 = vpop.permute.xlu0 %3357 }
0x186d   :  { %5924 = vpow2.f32 %v3125_v46 }
0x1877   :  { %v5925_v47 = vpop.eup %5924 }
0x1878   :  { %v3127_v48 = vsel %vm396_vm2, %v5925_v47, 0.0 }
0x1879   :  { %3128 = vadd.xlane.f32.xlu1 %v3127_v48 }
0x188a   :  { %3133 = vrot.lane.b32.xlu1 %v6642_v15, %s6088_s22 }
0x188e   :  { %3355 = vrot.lane.b32.xlu1 %v6646_v20, %s6089_s29 }
0x1893   :  { %v2966_v49 = vpop.xlane.xlu1 %2965 }
0x1894   :  { %5926 = vrcp.f32 %v2966_v49 }
0x189e   :  { %v5927_v50 = vpop.eup %5926 }
0x189f   :  { %v2968_v33 = vmul.f32 %v5927_v50, %v5923_v42 }
0x18a1   :  { %5632 = vmatmul.mubr.msk.f32.vlgmr.msra.gmra.mrb[30].mxu1 %vm396_vm2, %v2968_v33 }
0x18a2   :  { %5641 = vmatprep.mubr.msk.f32.mxu1 %vm6087_vm1, %v6086_v24 }
0x1906   :  { %v3129_v53 = vpop.xlane.xlu1 %3128 }
0x1907   :  { %5928 = vrcp.f32 %v3129_v53 }
0x190a   :  { %v3134_v54 = vpop.permute.xlu1 %3133 }
0x190b   :  { %5640 = vmatpush3.msra.mxu1 %v3134_v54 }
0x190c   :  { %5649 = vmatprep.subr.mxu1 %v6086_v24 }
0x190e   :  { %v3356_v28 = vpop.permute.xlu1 %3355 }
0x1911   :  { %v5929_v55 = vpop.eup %5928 }
0x1912   :  { %v3131_v56 = vmul.f32 %v5929_v55, %v5925_v47 }
0x1914   :  { %5642 = vmatmul.mubr.msk.f32.vlgmr.msra.gmra.mrb[32].mxu1 %vm396_vm2, %v3131_v56 }
0x1915   :  { %5650 = vmatpush3.msra.mxu1 %v6691_v14  ;;  %5651 = vmatprep.mubr.msk.f32.mxu1 %vm6087_vm1, %v6086_v24 }
0x1916   :  { %5659 = vmatprep.subr.mxu1 %v6086_v24 }
0x1974   :  { %v3038_v57 = vpop.f32.mrb[30].mxu1 }
0x1975   :  { %v5633_v58 = vpop.f32.mrb[31].mxu1  ;;  %5652 = vmatmul.mubr.msk.f32.vlgmr.msra.gmra.mrb[34].mxu1 %vm396_vm2, %v3038_v57 }
0x1976   :  { %5661 = vmatprep.mubr.msk.f32.mxu1 %vm6087_vm1, %v6086_v24 }
0x19e7   :  { %v3205_v59 = vpop.f32.mrb[32].mxu1 }
0x19e8   :  { %v5643_v60 = vpop.f32.mrb[33].mxu1  ;;  %5647 = vmatmul.mubr.msk.f32.vlgmr.msra.gmra.mrb[38].mxu0 %vm396_vm2, %v3205_v59 }
0x19e9   :  { %5655 = vmatpush3.xpose.msk.msra.mxu0 %vm396_vm2, %v3358_v32  ;;  %5656 = vmatprep.mubr.msk.f32.mxu0 %vm6087_vm1, %v6086_v24 }
0x19ea   :  { %5664 = vmatprep.subr.mxu0 %v6086_v24 }
0x19ec   :  { %5657 = vmatmul.mubr.msk.f32.vlgmr.msra.gmra.mrb[40].mxu0 %vm396_vm2, %v3356_v28 }
0x19ed   :  { %5666 = vmatprep.mubr.msk.f32.mxu0 %vm6087_vm1, %v6086_v24  ;;  %5665 = vmatpush3.msra.mxu0 %v6726_v23 }
0x19ee   :  { %5674 = vmatprep.subr.mxu0 %v6086_v24 }
0x1a48   :  { %v3351_v61 = vpop.f32.mrb[34].mxu1 }
0x1a49   :  { %v5653_v62 = vpop.f32.mrb[35].mxu1 }
0x1abb   :  { %v3278_v0 = vpop.f32.mrb[38].mxu0 }
0x1abc   :  { %v3352_v1 = vadd.f32 %v3351_v61, %v3278_v0  ;;  %v5648_v2 = vpop.f32.mrb[39].mxu0 }
0x1abf   :  { %v3429_v63 = vpop.f32.mrb[40].mxu0 }
0x1ac0   :  { %v3433_v3 = vmul.f32 0.35355338, %v3429_v63  ;;  %v5658_v5 = vpop.f32.mrb[41].mxu0 }
0x1ac2   :  { %v3434_v6 = vsel %vm396_vm2, %v3433_v3, -inf }
0x1ac3   :  { %3435 = vmax.xlane.f32.xlu1 %v3434_v6 }
0x1ad4   :  { %3597 = vrot.lane.b32.xlu1 %v6657_v26, %s6090_s23 }
0x1ad8   :  { %3595 = vrot.lane.b32.xlu1 %v6646_v20, %s6090_s23 }
0x1b50   :  { %v3436_v8 = vpop.xlane.xlu1 %3435 }
0x1b51   :  { %v3437_v9 = vsub.f32 %v3433_v3, %v3436_v8 }
0x1b53   :  { %v3438_v13 = vmul.f32 1.442695, %v3437_v9 }
0x1b54   :  { %v3598_v21 = vpop.permute.xlu1 %3597 }
0x1b55   :  { %5930 = vpow2.f32 %v3438_v13 }
0x1b58   :  { %v3596_v22 = vpop.permute.xlu1 %3595 }
0x1b5f   :  { %v5931_v16 = vpop.eup %5930 }
0x1b60   :  { %v3440_v10 = vsel %vm396_vm2, %v5931_v16, 0.0 }
0x1b61   :  { %3441 = vadd.xlane.f32.xlu0 %v3440_v10 }
0x1b77   :  { %3445 = vrot.lane.b32.xlu0 %v6642_v15, %s6089_s29 }
0x1bee   :  { %v3442_v12 = vpop.xlane.xlu0 %3441 }
0x1bef   :  { %5932 = vrcp.f32 %v3442_v12 }
0x1bf2   :  { %v3446_v17 = vpop.permute.xlu0 %3445 }
0x1bf3   :  { %5660 = vmatpush3.msra.mxu1 %v3446_v17 }
0x1bf4   :  { %5669 = vmatprep.subr.mxu1 %v6086_v24 }
0x1bf9   :  { %v5933_v19 = vpop.eup %5932 }
0x1bfa   :  { %v3444_v20 = vmul.f32 %v5933_v19, %v5931_v16 }
0x1bfc   :  { %5662 = vmatmul.mubr.msk.f32.vlgmr.msra.gmra.mrb[36].mxu1 %vm396_vm2, %v3444_v20 }
0x1bfd   :  { %5670 = vmatpush3.xpose.msk.msra.mxu1 %vm396_vm2, %v3598_v21  ;;  %5671 = vmatprep.mubr.msk.f32.mxu1 %vm6087_vm1, %v6086_v24 }
0x1bfe   :  { %5679 = vmatprep.subr.mxu1 %v6086_v24 }
0x1c00   :  { %5672 = vmatmul.mubr.msk.f32.vlgmr.msra.gmra.mrb[38].mxu1 %vm396_vm2, %v3596_v22 }
0x1c01   :  { %5681 = vmatprep.mubr.msk.f32.mxu1 %vm6087_vm1, %v6086_v24  ;;  %5680 = vmatpush3.msra.mxu1 %v6742_v39 }
0x1c02   :  { %5689 = vmatprep.subr.mxu1 %v6086_v24 }
0x1ccf   :  { %v3517_v26 = vpop.f32.mrb[36].mxu1 }
0x1cd0   :  { %v5663_v11 = vpop.f32.mrb[37].mxu1  ;;  %5667 = vmatmul.mubr.msk.f32.vlgmr.msra.gmra.mrb[42].mxu0 %vm396_vm2, %v3517_v26 }
0x1cd1   :  { %5676 = vmatprep.mubr.msk.f32.mxu0 %vm6087_vm1, %v6086_v24 }
0x1cd3   :  { %v3669_v27 = vpop.f32.mrb[38].mxu1 }
0x1cd4   :  { %v3673_v29 = vmul.f32 0.35355338, %v3669_v27  ;;  %v5673_v30 = vpop.f32.mrb[39].mxu1 }
0x1cd6   :  { %v3674_v31 = vsel %vm396_vm2, %v3673_v29, -inf }
0x1cd7   :  { %3675 = vmax.xlane.f32.xlu0 %v3674_v31 }
0x1ced   :  { %3685 = vrot.lane.b32.xlu0 %v6642_v15, %s6090_s23 }
0x1cf1   :  { %3996 = vrot.lane.b32.xlu0 %v6644_v18, %s6088_s22 }
0x1d64   :  { %v3676_v35 = vpop.xlane.xlu0 %3675 }
0x1d65   :  { %v3677_v36 = vsub.f32 %v3673_v29, %v3676_v35 }
0x1d67   :  { %v3678_v38 = vmul.f32 1.442695, %v3677_v36 }
0x1d68   :  { %v3686_v34 = vpop.permute.xlu0 %3685 }
0x1d69   :  { %5934 = vpow2.f32 %v3678_v38  ;;  %5675 = vmatpush3.msra.mxu0 %v3686_v34 }
0x1d6a   :  { %5684 = vmatprep.subr.mxu0 %v6086_v24 }
0x1d6c   :  { %v3997_v47 = vpop.permute.xlu0 %3996 }
0x1d73   :  { %v5935_v40 = vpop.eup %5934 }
0x1d74   :  { %v3680_v41 = vsel %vm396_vm2, %v5935_v40, 0.0 }
0x1d75   :  { %3681 = vadd.xlane.f32.xlu1 %v3680_v41 }
0x1d86   :  { %3998 = vrot.lane.b32.xlu1 %v6655_v25, %s6088_s22 }
0x1da3   :  { %v3590_v15 = vpop.f32.mrb[42].mxu0 }
0x1da4   :  { %v3594_v4 = vadd.f32 %v3590_v15, %v3352_v1  ;;  %v5668_v42 = vpop.f32.mrb[43].mxu0 }
0x1e02   :  { %v3682_v43 = vpop.xlane.xlu1 %3681 }
0x1e03   :  { %5936 = vrcp.f32 %v3682_v43 }
0x1e06   :  { %v3999_v46 = vpop.permute.xlu1 %3998 }
0x1e0d   :  { %v5937_v44 = vpop.eup %5936 }
0x1e0e   :  { %v3684_v45 = vmul.f32 %v5937_v44, %v5935_v40 }
0x1e10   :  { %5677 = vmatmul.mubr.msk.f32.vlgmr.msra.gmra.mrb[44].mxu0 %vm396_vm2, %v3684_v45 }
0x1e11   :  { %5685 = vmatpush3.xpose.msk.msra.mxu0 %vm396_vm2, %v6655_v25  ;;  %5686 = vmatprep.mubr.msk.f32.mxu0 %vm6087_vm1, %v6086_v24 }
0x1e12   :  { %5694 = vmatprep.subr.mxu0 %v6086_v24 }
0x1e14   :  { %5687 = vmatmul.mubr.msk.f32.vlgmr.msra.gmra.mrb[46].mxu0 %vm396_vm2, %v6644_v18 }
0x1e15   :  { %5695 = vmatpush3.xpose.msk.msra.mxu0 %vm396_vm2, %v3999_v46  ;;  %5696 = vmatprep.mubr.msk.f32.mxu0 %vm6087_vm1, %v6086_v24 }
0x1e16   :  { %5704 = vmatprep.subr.mxu0 %v6086_v24 }
0x1e18   :  { %5697 = vmatmul.mubr.msk.f32.vlgmr.msra.gmra.mrb[48].mxu0 %vm396_vm2, %v3997_v47 }
0x1e19   :  { %5705 = vmatpush3.msra.mxu0 %v6686_v51  ;;  %5706 = vmatprep.mubr.msk.f32.mxu0 %vm6087_vm1, %v6086_v24 }
0x1e1a   :  { %5714 = vmatprep.subr.mxu0 %v6086_v24 }
0x1ee3   :  { %v3757_v48 = vpop.f32.mrb[44].mxu0 }
0x1ee4   :  { %v5678_v49 = vpop.f32.mrb[45].mxu0  ;;  %5682 = vmatmul.mubr.msk.f32.vlgmr.msra.gmra.mrb[40].mxu1 %vm396_vm2, %v3757_v48 }
0x1ee5   :  { %5690 = vmatpush3.msra.mxu1 %v6640_v37  ;;  %5691 = vmatprep.mubr.msk.f32.mxu1 %vm6087_vm1, %v6086_v24 }
0x1ee6   :  { %5699 = vmatprep.subr.mxu1 %v6086_v24 }
0x1ee7   :  { %v3907_v50 = vpop.f32.mrb[46].mxu0 }
0x1ee8   :  { %v3911_v33 = vmul.f32 0.35355338, %v3907_v50  ;;  %v5688_v53 = vpop.f32.mrb[47].mxu0 }
0x1eea   :  { %v3912_v51 = vsel %vm396_vm2, %v3911_v33, -inf }
0x1eeb   :  { %3913 = vmax.xlane.f32.xlu1 %v3912_v51  ;;  %v4070_v54 = vpop.f32.mrb[48].mxu0 }
0x1eec   :  { %v4074_v55 = vmul.f32 0.35355338, %v4070_v54  ;;  %v5698_v56 = vpop.f32.mrb[49].mxu0 }
0x1eee   :  { %v4075_v57 = vsel %vm396_vm2, %v4074_v55, -inf }
0x1eef   :  { %4076 = vmax.xlane.f32.xlu0 %v4075_v57 }
0x1f78   :  { %v3914_v58 = vpop.xlane.xlu1 %3913 }
0x1f79   :  { %v3915_v59 = vsub.f32 %v3911_v33, %v3914_v58 }
0x1f7b   :  { %v3916_v32 = vmul.f32 1.442695, %v3915_v59 }
0x1f7c   :  { %v4077_v60 = vpop.xlane.xlu0 %4076 }
0x1f7d   :  { %5938 = vpow2.f32 %v3916_v32  ;;  %v4078_v28 = vsub.f32 %v4074_v55, %v4077_v60 }
0x1f7f   :  { %v4079_v61 = vmul.f32 1.442695, %v4078_v28 }
0x1f81   :  { %5940 = vpow2.f32 %v4079_v61 }
0x1f87   :  { %v5939_v62 = vpop.eup %5938 }
0x1f88   :  { %v3918_v0 = vsel %vm396_vm2, %v5939_v62, 0.0 }
0x1f89   :  { %3919 = vadd.xlane.f32.xlu0 %v3918_v0 }
0x1f8b   :  { %v5941_v1 = vpop.eup %5940 }
0x1f8c   :  { %v4081_v2 = vsel %vm396_vm2, %v5941_v1, 0.0 }
0x1f8d   :  { %4082 = vadd.xlane.f32.xlu1 %v4081_v2 }
0x1f9e   :  { %4311 = vrot.lane.b32.xlu1 %v6655_v25, %s6089_s29 }
0x1f9f   :  { %4087 = vrot.lane.b32.xlu0 %v6640_v37, %s6088_s22 }
0x1fa2   :  { %4309 = vrot.lane.b32.xlu1 %v6644_v18, %s6089_s29 }
0x1fb7   :  { %v3830_v63 = vpop.f32.mrb[40].mxu1 }
0x1fb8   :  { %v6778_v3 = vadd.f32 %v3830_v63, %v3594_v4  ;;  %v5683_v5 = vpop.f32.mrb[41].mxu1 }
0x2016   :  { %v3920_v6 = vpop.xlane.xlu0 %3919 }
0x2017   :  { %5942 = vrcp.f32 %v3920_v6 }
0x201a   :  { %v4083_v8 = vpop.xlane.xlu1 %4082  ;;  %v4088_v16 = vpop.permute.xlu0 %4087 }
0x201b   :  { %5944 = vrcp.f32 %v4083_v8 }
0x201e   :  { %v4312_v21 = vpop.permute.xlu1 %4311 }
0x2021   :  { %v5943_v9 = vpop.eup %5942 }
0x2022   :  { %v3922_v13 = vmul.f32 %v5943_v9, %v5939_v62 }
0x2024   :  { %5692 = vmatmul.mubr.msk.f32.vlgmr.msra.gmra.mrb[42].mxu1 %vm396_vm2, %v3922_v13 }
0x2025   :  { %v5945_v10 = vpop.eup %5944  ;;  %5700 = vmatpush3.msra.mxu1 %v4088_v16  ;;  %5701 = vmatprep.mubr.msk.f32.mxu1 %vm6087_vm1, %v6086_v24 }
0x2026   :  { %v4085_v12 = vmul.f32 %v5945_v10, %v5941_v1  ;;  %5709 = vmatprep.subr.mxu1 %v6086_v24 }
0x2028   :  { %5702 = vmatmul.mubr.msk.f32.vlgmr.msra.gmra.mrb[44].mxu1 %vm396_vm2, %v4085_v12 }
0x2029   :  { %5710 = vmatpush3.msra.mxu1 %v6691_v14  ;;  %5711 = vmatprep.mubr.msk.f32.mxu1 %vm6087_vm1, %v6086_v24  ;;  %v4310_v14 = vpop.permute.xlu1 %4309 }
0x202a   :  { %5719 = vmatprep.subr.mxu1 %v6086_v24 }
0x20f7   :  { %v3992_v17 = vpop.f32.mrb[42].mxu1 }
0x20f8   :  { %v5693_v19 = vpop.f32.mrb[43].mxu1  ;;  %5712 = vmatmul.mubr.msk.f32.vlgmr.msra.gmra.mrb[46].mxu1 %vm396_vm2, %v3992_v17 }
0x20f9   :  { %5721 = vmatprep.mubr.msk.f32.mxu1 %vm6087_vm1, %v6086_v24 }
0x20fb   :  { %v4159_v20 = vpop.f32.mrb[44].mxu1 }
0x20fc   :  { %v5703_v22 = vpop.f32.mrb[45].mxu1  ;;  %5707 = vmatmul.mubr.msk.f32.vlgmr.msra.gmra.mrb[50].mxu0 %vm396_vm2, %v4159_v20 }
0x20fd   :  { %5715 = vmatpush3.xpose.msk.msra.mxu0 %vm396_vm2, %v4312_v21  ;;  %5716 = vmatprep.mubr.msk.f32.mxu0 %vm6087_vm1, %v6086_v24 }
0x20fe   :  { %5724 = vmatprep.subr.mxu0 %v6086_v24 }
0x2100   :  { %5717 = vmatmul.mubr.msk.f32.vlgmr.msra.gmra.mrb[52].mxu0 %vm396_vm2, %v4310_v14 }
0x2101   :  { %5725 = vmatpush3.msra.mxu0 %v6726_v23  ;;  %5726 = vmatprep.mubr.msk.f32.mxu0 %vm6087_vm1, %v6086_v24 }
0x2102   :  { %5734 = vmatprep.subr.mxu0 %v6086_v24 }
0x21cb   :  { %v4305_v26 = vpop.f32.mrb[46].mxu1 }
0x21cc   :  { %v5713_v11 = vpop.f32.mrb[47].mxu1 }
0x21cf   :  { %v4232_v27 = vpop.f32.mrb[50].mxu0 }
0x21d0   :  { %v4306_v29 = vadd.f32 %v4305_v26, %v4232_v27  ;;  %v5708_v30 = vpop.f32.mrb[51].mxu0  ;;  %v5223_v27 = vld [vmem:[%s6917_s11 + $0x1] ss:$0 sm:$0xff] }
0x21d3   :  { %v4383_v31 = vpop.f32.mrb[52].mxu0 }
0x21d4   :  { %v4387_v35 = vmul.f32 0.35355338, %v4383_v31  ;;  %v5718_v36 = vpop.f32.mrb[53].mxu0  ;;  %v4848_v31 = vld [vmem:[#allocation8 + $0x20] sm:$0xff] }
0x21d6   :  { %v4388_v38 = vsel %vm396_vm2, %v4387_v35, -inf }
0x21d7   :  { %4389 = vmax.xlane.f32.xlu0 %v4388_v38  ;;  %v4850_v38 = vld [vmem:[#allocation8 + $0x30] sm:$0xff] }
0x21ed   :  { %4399 = vrot.lane.b32.xlu0 %v6640_v37, %s6089_s29  ;;  %s6091_s29 = smov [#allocation10]  }
0x21f1   :  { %4549 = vrot.lane.b32.xlu0 %v6644_v18, %s6090_s23 }
0x2264   :  { %v4390_v23 = vpop.xlane.xlu0 %4389 }
0x2265   :  { %v4391_v34 = vsub.f32 %v4387_v35, %v4390_v23  ;;  %v4849_v35 = vld [vmem:[#allocation8 + $0x28] sm:$0xff]  ;;  %v4851_v23 = vld [vmem:[#allocation8 + $0x38] sm:$0xff] }
0x2266   :  { %v5846_v36 = vpack.c.bf16 %v4849_v35, %v4848_v31 }
0x2267   :  { %v4392_v40 = vmul.f32 1.442695, %v4391_v34  ;;  %v5850_v34 = vpack.c.bf16 %v4851_v23, %v4850_v38 }
0x2268   :  { %v4400_v41 = vpop.permute.xlu0 %4399 }
0x2269   :  { %5946 = vpow2.f32 %v4392_v40  ;;  %5720 = vmatpush3.msra.mxu1 %v4400_v41  ;;  %v5228_v40 = vld [vmem:[%s6920_s14 + $0x40] sm:$0xff]  ;;  %v5229_v41 = vld [vmem:[%s6920_s14 + $0x48] sm:$0xff] }
0x226a   :  { %5729 = vmatprep.subr.mxu1 %v6086_v24 }
0x226c   :  { %v4550_v45 = vpop.permute.xlu0 %4549 }
0x2273   :  { %v5947_v15 = vpop.eup %5946 }
0x2274   :  { %v4394_v4 = vsel %vm396_vm2, %v5947_v15, 0.0 }
0x2275   :  { %4395 = vadd.xlane.f32.xlu1 %v4394_v4  ;;  %v5854_v4 = vpack.c.bf16 %v5229_v41, %v5228_v40 }
0x2286   :  { %4551 = vrot.lane.b32.xlu1 %v6655_v25, %s6090_s23  ;;  %v5219_v25 = vld [vmem:[%s6915_s9 + $0x1] ss:$0 sm:$0xff] }
0x2287   :  { %v4797_v48 = vadd.f32 %v5219_v25, %v6778_v3 }
0x2289   :  { %v4799_v53 = vadd.f32 %v4797_v48, %v6607_v52 }
0x228b   :  { %v4805_v51 = vsel %vm132_vm0, %v4799_v53, 0.0 }
0x2302   :  { %v4396_v42 = vpop.xlane.xlu1 %4395 }
0x2303   :  { %5948 = vrcp.f32 %v4396_v42  ;;  %v5231_v42 = vld [vmem:[%s6920_s14 + $0x58] sm:$0xff] }
0x2306   :  { %v4552_v18 = vpop.permute.xlu1 %4551 }
0x230d   :  { %v5949_v43 = vpop.eup %5948 }
0x230e   :  { %v4398_v44 = vmul.f32 %v5949_v43, %v5947_v15  ;;  %v5230_v15 = vld [vmem:[%s6920_s14 + $0x50] sm:$0xff] }
0x230f   :  { %v5858_v43 = vpack.c.bf16 %v5231_v42, %v5230_v15 }
0x2310   :  { %5722 = vmatmul.mubr.msk.f32.vlgmr.msra.gmra.mrb[48].mxu1 %vm396_vm2, %v4398_v44  ;;  %v5232_v44 = vld [vmem:[%s6920_s14 + $0x60] sm:$0xff] }
0x2311   :  { %5730 = vmatpush3.xpose.msk.msra.mxu1 %vm396_vm2, %v4552_v18  ;;  %5731 = vmatprep.mubr.msk.f32.mxu1 %vm6087_vm1, %v6086_v24  ;;  %v5233_v18 = vld [vmem:[%s6920_s14 + $0x68] sm:$0xff] }
0x2312   :  { %5739 = vmatprep.subr.mxu1 %v6086_v24 }
0x2314   :  { %5732 = vmatmul.mubr.msk.f32.vlgmr.msra.gmra.mrb[50].mxu1 %vm396_vm2, %v4550_v45  ;;  %v5862_v45 = vpack.c.bf16 %v5233_v18, %v5232_v44 }
0x2315   :  { %5740 = vmatpush3.msra.mxu1 %v6742_v39  ;;  %5741 = vmatprep.mubr.msk.f32.mxu1 %vm6087_vm1, %v6086_v24 }
0x2316   :  { %5855 = vmatprep.subr.bf16.mxu1 %v5854_v4 }
0x23e3   :  { %v4471_v46 = vpop.f32.mrb[48].mxu1 }
0x23e4   :  { %v5723_v47 = vpop.f32.mrb[49].mxu1  ;;  %5727 = vmatmul.mubr.msk.f32.vlgmr.msra.gmra.mrb[54].mxu0 %vm396_vm2, %v4471_v46 }
0x23e5   :  { %5736 = vmatprep.mubr.msk.f32.mxu0 %vm6087_vm1, %v6086_v24 }
0x23e7   :  { %v4623_v49 = vpop.f32.mrb[50].mxu1 }
0x23e8   :  { %v4627_v50 = vmul.f32 0.35355338, %v4623_v49  ;;  %v5733_v33 = vpop.f32.mrb[51].mxu1 }
0x23ea   :  { %v4628_v39 = vsel %vm396_vm2, %v4627_v50, -inf }
0x23eb   :  { %4629 = vmax.xlane.f32.xlu1 %v4628_v39  ;;  %v5234_v39 = vld [vmem:[%s6920_s14 + $0x70] sm:$0xff] }
0x23ef   :  { %4806 = vadd.xlane.f32.xlu1 %v4805_v51 }
0x2478   :  { %v4630_v54 = vpop.xlane.xlu1 %4629 }
0x2479   :  { %v4631_v55 = vsub.f32 %v4627_v50, %v4630_v54  ;;  %v5225_v54 = vld [vmem:[%s6919_s13 + $0x1] ss:$0 sm:$0xff] }
0x247b   :  { %v4632_v56 = vmul.f32 1.442695, %v4631_v55 }
0x247c   :  { %v4807_v1 = vpop.xlane.xlu1 %4806 }
0x247d   :  { %5950 = vpow2.f32 %v4632_v56  ;;  %v4811_v2 = vmul.f32 0.03125, %v4807_v1 }
0x247f   :  { %v4813_v5 = vsub.f32 %v4799_v53, %v4811_v2  ;;  %v5235_v53 = vld [vmem:[%s6920_s14 + $0x78] sm:$0xff] }
0x2480   :  { %v5866_v51 = vpack.c.bf16 %v5235_v53, %v5234_v39 }
0x2481   :  { %v4815_v13 = vmul.f32 %v4813_v5, %v4813_v5 }
0x2483   :  { %v4817_v16 = vsel %vm132_vm0, %v4815_v13, 0.0 }
0x2487   :  { %v5951_v57 = vpop.eup %5950 }
0x2488   :  { %v4634_v24 = vsel %vm396_vm2, %v5951_v57, 0.0 }
0x2489   :  { %4635 = vadd.xlane.f32.xlu0 %v4634_v24 }
0x249f   :  { %4639 = vrot.lane.b32.xlu0 %v6640_v37, %s6090_s23  ;;  %s5096_s23 = sshll.u32 %s6091_s29, 4  ;;  %s5097_s23 = int_to_ptr.vmem [resolvable:$true] %s5096_s23 }
0x24a0   :  { %s6050_s1 = scalar_lea.vmem %s5097_s23, 256  ;;  %p6055_p5 = scmp.lt.s32.totalorder %s5097_s23, %s5097_s23 }
0x24a1   :  { %p6051_p4 = scmp.ne.s32.totalorder %s5097_s23, %s6050_s1  ;;  %p6056_p6 = scmp.lt.s32.totalorder %s6050_s1, %s6050_s1 }
0x24a3   :  { %p6057_p7 = por %p6056_p6, %p6055_p5 }
0x24a5   :  { %p6058_p8 = pnand %p6057_p7, %p6051_p4 }
0x24b7   :  { %v4544_v58 = vpop.f32.mrb[54].mxu0 }
0x24b8   :  { %v4548_v59 = vadd.f32 %v4544_v58, %v4306_v29  ;;  %v5728_v32 = vpop.f32.mrb[55].mxu0 }
0x24b9   :  { %v5237_v32 = vld [vmem:[%s6921_s15 + $0x1] ss:$0 sm:$0xff] }
0x2516   :  { %v4636_v60 = vpop.xlane.xlu0 %4635 }
0x2517   :  { %5952 = vrcp.f32 %v4636_v60 }
0x251a   :  { %v4640_v52 = vpop.permute.xlu0 %4639 }
0x251b   :  { %5735 = vmatpush3.msra.mxu0 %v4640_v52 }
0x251c   :  { %5847 = vmatprep.subr.bf16.mxu0 %v5846_v36 }
0x2521   :  { %v5953_v28 = vpop.eup %5952 }
0x2522   :  { %v4638_v61 = vmul.f32 %v5953_v28, %v5951_v57 }
0x2524   :  { %5737 = vmatmul.mubr.msk.f32.vlgmr.msra.gmra.mrb[56].mxu0 %vm396_vm2, %v4638_v61 }
0x2525   :  { %5849 = vmatpush3.bf16.msra.mxu0 %v5846_v36 }
0x2526   :  { %5851 = vmatprep.subr.bf16.mxu0 %v5850_v34 }
0x2529   :  { %5853 = vmatpush3.bf16.msra.mxu0 %v5850_v34 }
0x25f7   :  { %v4711_v62 = vpop.f32.mrb[56].mxu0 }
0x25f8   :  { %v5738_v0 = vpop.f32.mrb[57].mxu0  ;;  %5742 = vmatmul.mubr.msk.f32.vlgmr.msra.gmra.mrb[52].mxu1 %vm396_vm2, %v4711_v62 }
0x25f9   :  { %5857 = vmatpush3.bf16.msra.mxu1 %v5854_v4 }
0x25fa   :  { %5859 = vmatprep.subr.bf16.mxu1 %v5858_v43 }
0x25fd   :  { %5861 = vmatpush3.bf16.msra.mxu1 %v5858_v43 }
0x25fe   :  { %5863 = vmatprep.subr.bf16.mxu1 %v5862_v45 }
0x2601   :  { %5865 = vmatpush3.bf16.msra.mxu1 %v5862_v45 }
0x2602   :  { %5867 = vmatprep.subr.bf16.mxu1 %v5866_v51 }
0x2605   :  { %5869 = vmatpush3.bf16.msra.mxu1 %v5866_v51 }
0x26cb   :  { %v4784_v63 = vpop.f32.mrb[52].mxu1 }
0x26cc   :  { %v4788_v3 = vadd.f32 %v4784_v63, %v4548_v59  ;;  %v5743_v37 = vpop.f32.mrb[53].mxu1 }
0x26ce   :  { %v4798_v6 = vadd.f32 %v5219_v25, %v4788_v3 }
0x26d0   :  { %v4800_v8 = vadd.f32 %v4798_v6, %v6619_v7  ;;  %v5222_v7 = vld [vmem:[%s6916_s10 + $0x1] ss:$0 sm:$0xff] }
0x26d2   :  { %v4808_v9 = vsel %vm132_vm0, %v4800_v8, 0.0 }
0x26d3   :  { %4809 = vadd.xlane.f32.xlu1 %v4808_v9 }
0x26d7   :  { %4818 = vadd.xlane.f32.xlu1 %v4817_v16 }
0x2760   :  { %v4810_v10 = vpop.xlane.xlu1 %4809 }
0x2761   :  { %v4812_v12 = vmul.f32 0.03125, %v4810_v10 }
0x2763   :  { %v4814_v17 = vsub.f32 %v4800_v8, %v4812_v12 }
0x2764   :  { %v4819_v19 = vpop.xlane.xlu1 %4818 }
0x2765   :  { %v4823_v21 = vmul.f32 0.03125, %v4819_v19  ;;  %v4816_v20 = vmul.f32 %v4814_v17, %v4814_v17 }
0x2767   :  { %v4825_v22 = vadd.f32 1e-05, %v4823_v21  ;;  %v4820_v14 = vsel %vm132_vm0, %v4816_v20, 0.0 }
0x2768   :  { %4821 = vadd.xlane.f32.xlu1 %v4820_v14 }
0x2769   :  { %5954 = vrsqrt.f32 %v4825_v22 }
0x2773   :  { %v5955_v26 = vpop.eup %5954 }
0x2774   :  { %v4829_v11 = vmul.f32 %v5955_v26, %v4813_v5  ;;  %v5242_v26 = vld [vmem:[%s6922_s16 + $0x1] ss:$0 sm:$0xff] }
0x2776   :  { %v4837_v29 = vmul.f32 %v5222_v7, %v4829_v11  ;;  %v5243_v11 = vld [vmem:[%s6938_s21 + $0x1] ss:$0 sm:$0xff] }
0x2778   :  { %v4845_v30 = vadd.f32 %v5223_v27, %v4837_v29 }
0x277a   :  { %5752 = vmatprep.mubr.msk.f32.mxu0 %vm132_vm0, %v4845_v30 }
0x27f5   :  { %v4822_v25 = vpop.xlane.xlu1 %4821 }
0x27f6   :  { %v4824_v46 = vmul.f32 0.03125, %v4822_v25 }
0x27f8   :  { %v4826_v47 = vadd.f32 1e-05, %v4824_v46 }
0x27fa   :  { %5956 = vrsqrt.f32 %v4826_v47 }
0x2804   :  { %v5957_v48 = vpop.eup %5956 }
0x2805   :  { %v4830_v49 = vmul.f32 %v5957_v48, %v4814_v17 }
0x2807   :  { %v4838_v50 = vmul.f32 %v5222_v7, %v4830_v49 }
0x2809   :  { %v4846_v33 = vadd.f32 %v5223_v27, %v4838_v50 }
0x280b   :  { %5753 = vmatmul.mubr.msk.f32.vlgmr.msra.gmra.mrb[58].mxu0 %vm132_vm0, %v4846_v33 }
0x28de   :  { %v5754_v55 = vpop.f32.mrb[58].mxu0 }
0x28df   :  { %v4938_v56 = vadd.f32 %v5754_v55, %v5225_v54  ;;  %v4932_v57 = vpop.f32.mrb[59].mxu0 }
0x28e0   :  { %v4933_v24 = vadd.f32 %v5225_v54, %v4932_v57 }
0x28e1   :  { %v4942_v59 = vmax.f32 %v4938_v56, 0.0 }
0x28e2   :  { %v4941_v58 = vmax.f32 %v4933_v24, 0.0 }
0x28e4   :  { %5771 = vmatprep.mubr.msk.f32.mxu1 %vm2470_vm3, %v4941_v58 }
0x28e5   :  { %5772 = vmatmul.mubr.msk.f32.vlgmr.msra.gmra.mrb[54].mxu1 %vm2470_vm3, %v4942_v59 }
0x29b8   :  { %v5773_v60 = vpop.f32.mrb[54].mxu1 }
0x29b9   :  { %v5032_v52 = vpop.f32.mrb[55].mxu1  ;;  %v5038_v28 = vadd.f32 %v5773_v60, %v5237_v32 }
0x29ba   :  { %v5033_v61 = vadd.f32 %v5237_v32, %v5032_v52 }
0x29bb   :  { %v5042_v1 = vadd.f32 %v5038_v28, %v4846_v33 }
0x29bc   :  { %v5041_v62 = vadd.f32 %v5033_v61, %v4845_v30 }
0x29bd   :  { %v5050_v2 = vsel %vm132_vm0, %v5042_v1, 0.0 }
0x29be   :  { %v5047_v0 = vsel %vm132_vm0, %v5041_v62, 0.0 }
0x29bf   :  { %5048 = vadd.xlane.f32.xlu1 %v5047_v0 }
0x29c3   :  { %5051 = vadd.xlane.f32.xlu1 %v5050_v2 }
0x2a4c   :  { %v5049_v63 = vpop.xlane.xlu1 %5048 }
0x2a4d   :  { %v5053_v3 = vmul.f32 0.03125, %v5049_v63 }
0x2a4f   :  { %v5055_v37 = vsub.f32 %v5041_v62, %v5053_v3 }
0x2a50   :  { %v5052_v5 = vpop.xlane.xlu1 %5051 }
0x2a51   :  { %v5054_v6 = vmul.f32 0.03125, %v5052_v5  ;;  %v5057_v8 = vmul.f32 %v5055_v37, %v5055_v37 }
0x2a53   :  { %v5056_v9 = vsub.f32 %v5042_v1, %v5054_v6  ;;  %v5059_v13 = vsel %vm132_vm0, %v5057_v8, 0.0 }
0x2a54   :  { %5060 = vadd.xlane.f32.xlu0 %v5059_v13 }
0x2a55   :  { %v5058_v16 = vmul.f32 %v5056_v9, %v5056_v9 }
0x2a57   :  { %v5062_v10 = vsel %vm132_vm0, %v5058_v16, 0.0 }
0x2a58   :  { %5063 = vadd.xlane.f32.xlu1 %v5062_v10 }
0x2ae1   :  { %v5061_v12 = vpop.xlane.xlu0 %5060 }
0x2ae2   :  { %v5065_v17 = vmul.f32 0.03125, %v5061_v12 }
0x2ae4   :  { %v5067_v19 = vadd.f32 1e-05, %v5065_v17 }
0x2ae5   :  { %v5064_v21 = vpop.xlane.xlu1 %5063 }
0x2ae6   :  { %5958 = vrsqrt.f32 %v5067_v19  ;;  %v5066_v20 = vmul.f32 0.03125, %v5064_v21 }
0x2ae8   :  { %v5068_v22 = vadd.f32 1e-05, %v5066_v20 }
0x2aea   :  { %5960 = vrsqrt.f32 %v5068_v22 }
0x2af0   :  { %v5959_v14 = vpop.eup %5958 }
0x2af1   :  { %v5071_v7 = vmul.f32 %v5959_v14, %v5055_v37 }
0x2af3   :  { %v5079_v27 = vmul.f32 %v5242_v26, %v5071_v7 }
0x2af4   :  { %v5961_v29 = vpop.eup %5960 }
0x2af5   :  { %v5072_v30 = vmul.f32 %v5961_v29, %v5056_v9  ;;  %v5087_v31 = vadd.f32 %v5243_v11, %v5079_v27 }
0x2af7   :  { %v5080_v35 = vmul.f32 %v5242_v26, %v5072_v30  ;;  %5089 = vst.msk [vmem:[#allocation10] sm:$0xff] %vm132_vm0, %v5087_v31 }
0x2af9   :  { %v5088_v36 = vadd.f32 %v5243_v11, %v5080_v35 }
0x2afb   :  { %5090 = vst.msk [vmem:[#allocation10 + $0x8] sm:$0xff] %vm132_vm0, %v5088_v36 }
0x2afc   :  { %6061 = shalt.err (!%p6058_p8)
}
0x2afd   :  { %s6939_s10 = sld [smem:[#allocation19_spill]] }
0x2b03   :  { %s6062_s6 = scalar_lea.hbm %s6939_s10, 256 }
0x2b04   :  { %p6063_p9 = scmp.ne.s32.totalorder %s6939_s10, %s6062_s6  ;;  %p6066_p10 = scmp.lt.u32.totalorder %s6062_s6, %s6939_s10 }
0x2b06   :  { %p6068_p11 = pnand %p6066_p10, %p6063_p9 }
0x2b08   :  { %6071 = shalt.err (!%p6068_p11)
}
0x2b09   :  { %5102 = dma.vmem_to_hbm [thread:$0]  %s5097_s23, 256, %s6939_s10, [#allocation4], %s6082_s25, %s6082_s25, %s6083_s26  }
0x2b0a   :  { %6078 = dma.done.wait [#allocation4], 256  }
0x2b0b   :  { %6079 = vsyncadd [#allocation4], 4294967040 }
0x2b0c   :  { %5106 = vsyncpa [#allocation3], 1 }
0x2b0d   :  { %5107 = vsyncpa [#allocation6], 1 }
0x2b0e   :  { %5108 = vsyncpa [#allocation9], 1 }
0x2b0f   :  { %5109 = vsyncpa [#allocation4], 1 }

</bundles_post_ra>
